<compile_context>
chip_gen: v6e
topology: v6e:2x2x1
jax: 0.10.0
libtpu: 0.0.40
codegen_flags: <defaults>
</compile_context>

<pallas_src>
import functools

import jax
import jax.numpy as jnp
from jax.experimental import pallas as pl
from jax.experimental.pallas import tpu as pltpu

EPS_BN = 1e-5
LANE = 128        # lane width  -> channel / N alignment
SUBLANE = 16      # bf16 packs two rows per sublane -> align M tiles to 16


def _round_up(x, m):
    return (x + m - 1) // m * m


def _pick_tile(dim, cap, align):
    """Largest tile <= cap (multiple of `align`) that evenly divides the padded dim."""
    size = _round_up(dim, align)
    best = align
    t = align
    while t <= min(cap, size):
        if size % t == 0:
            best = t
        t += align
    return best, size


# ----------------------------- Pallas kernels -----------------------------

def _mm_fused_kernel(*refs, relu, mode):
    """Single-K fused matmul: out = act(x@w + b [+ res] [+ x2@w2]).

    mode == "plain": refs = (x, w, b, o)
    mode == "add"  : refs = (x, w, b, res, o)     bf16 residual added in f32 epilogue
    mode == "ds"   : refs = (x, w, b, x2, w2, o)  fused 1x1 downsample as a 2nd MXU dot
    """
    if mode == "ds":
        x_ref, w_ref, b_ref, x2_ref, w2_ref, o_ref = refs
    elif mode == "add":
        x_ref, w_ref, b_ref, r_ref, o_ref = refs
    else:
        x_ref, w_ref, b_ref, o_ref = refs

    acc = jnp.dot(x_ref[...], w_ref[...], preferred_element_type=jnp.float32)
    if mode == "ds":
        acc = acc + jnp.dot(x2_ref[...], w2_ref[...],
                            preferred_element_type=jnp.float32)
    elif mode == "add":
        acc = acc + r_ref[...].astype(jnp.float32)
    y = acc + b_ref[...]
    if relu:
        y = jnp.maximum(y, 0.0)
    o_ref[...] = y.astype(o_ref.dtype)


def _conv3x3_tap_kernel(*refs, stride, Ho, Wo):
    """3x3 conv (+ folded BN bias + ReLU) via in-register tap accumulation.

    refs = (phase_0, ..., phase_{s*s-1}, w, b, out).  Each tap (dy, dx) is a shifted
    static slice of the resident phase tile followed by one MXU dot into a f32
    accumulator -- no im2col patch matrix ever touches HBM.
    """
    nph = stride * stride
    x_refs = refs[:nph]
    w_ref, b_ref, o_ref = refs[nph], refs[nph + 1], refs[nph + 2]
    cin = x_refs[0].shape[-1]
    tn = o_ref.shape[-1]

    acc = jnp.zeros((Ho * Wo, tn), jnp.float32)
    for t in range(9):
        dy, dx = t // 3, t % 3
        ph = (dy % stride) * stride + (dx % stride)      # which phase holds this tap
        oy, ox = dy // stride, dx // stride              # offset within the phase
        xt = x_refs[ph][0, oy:oy + Ho, ox:ox + Wo, :].reshape(Ho * Wo, cin)
        acc = acc + jnp.dot(xt, w_ref[t * cin:(t + 1) * cin, :],
                            preferred_element_type=jnp.float32)
    y = jnp.maximum(acc + b_ref[...], 0.0)
    o_ref[...] = y.reshape(1, Ho, Wo, tn).astype(o_ref.dtype)


# ----------------------------- pallas_call wrappers -----------------------------

def matmul_bias_act(x, w, bias, *, relu, residual=None, x2=None, w2=None,
                    out_dtype=jnp.bfloat16, tm_cap=256, tn_cap=256):
    """act(x @ w + bias [+ residual] [+ x2 @ w2]) as one tiled, pipelined Pallas matmul.

    x:(M,K) bf16, w:(K,N) bf16, bias:(N,) f32; K and N are already lane multiples.
    """
    M, K = x.shape
    N = w.shape[1]
    assert K % LANE == 0 and N % LANE == 0

    tm, Mp = _pick_tile(M, tm_cap, SUBLANE)
    tn, Np = _pick_tile(N, tn_cap, LANE)
    # v7x megacore: make sure the parallel grid has at least 2 steps.
    while (Mp // tm) * (Np // tn) < 2 and tm % 32 == 0:
        tm //= 2

    def pad_rows(a):
        return a if a.shape[0] == Mp else jnp.pad(a, ((0, Mp - a.shape[0]), (0, 0)))

    ins = [pad_rows(x), w, bias.reshape(1, N).astype(jnp.float32)]
    in_specs = [pl.BlockSpec((tm, K), lambda i, j: (i, 0)),
                pl.BlockSpec((K, tn), lambda i, j: (0, j)),
                pl.BlockSpec((1, tn), lambda i, j: (0, j))]
    if x2 is not None:
        mode = "ds"
        K2 = x2.shape[1]
        ins += [pad_rows(x2), w2]
        in_specs += [pl.BlockSpec((tm, K2), lambda i, j: (i, 0)),
                     pl.BlockSpec((K2, tn), lambda i, j: (0, j))]
    elif residual is not None:
        mode = "add"
        ins.append(pad_rows(residual))
        in_specs.append(pl.BlockSpec((tm, tn), lambda i, j: (i, j)))
    else:
        mode = "plain"

    out = pl.pallas_call(
        functools.partial(_mm_fused_kernel, relu=relu, mode=mode),
        out_shape=jax.ShapeDtypeStruct((Mp, Np), out_dtype),
        grid=(Mp // tm, Np // tn),
        in_specs=in_specs,
        out_specs=pl.BlockSpec((tm, tn), lambda i, j: (i, j)),
        compiler_params=pltpu.CompilerParams(
            dimension_semantics=("parallel", "parallel")),
    )(*ins)
    return out if Mp == M else out[:M]


def conv3x3_bn_relu(x, w2_mat, b2, *, stride, tn_cap=256):
    """3x3 conv (stride s, pad 1) + folded BN + ReLU on padded-channel NHWC input."""
    B, H, W, Cp = x.shape
    Ho = (H - 1) // stride + 1
    Wo = (W - 1) // stride + 1

    # One spatial zero-pad, then split into stride^2 phase views (total = one 1x copy of x,
    # instead of the 9x im2col patch matrix).
    Hp = _round_up(H + 2, stride)
    Wp = _round_up(W + 2, stride)
    xp = jnp.pad(x, ((0, 0), (1, Hp - H - 1), (1, Wp - W - 1), (0, 0)))
    phases = [xp[:, py::stride, px::stride, :]
              for py in range(stride) for px in range(stride)]
    Hph, Wph = phases[0].shape[1], phases[0].shape[2]

    N = w2_mat.shape[1]
    tn, Np = _pick_tile(N, tn_cap, LANE)      # N is already a lane multiple -> Np == N

    in_specs = [pl.BlockSpec((1, Hph, Wph, Cp), lambda b, j: (b, 0, 0, 0))
                for _ in range(stride * stride)]
    in_specs += [pl.BlockSpec((9 * Cp, tn), lambda b, j: (0, j)),
                 pl.BlockSpec((1, tn), lambda b, j: (0, j))]

    return pl.pallas_call(
        functools.partial(_conv3x3_tap_kernel, stride=stride, Ho=Ho, Wo=Wo),
        out_shape=jax.ShapeDtypeStruct((B, Ho, Wo, Np), jnp.bfloat16),
        grid=(B, Np // tn),
        in_specs=in_specs,
        out_specs=pl.BlockSpec((1, Ho, Wo, tn), lambda b, j: (b, 0, 0, j)),
        compiler_params=pltpu.CompilerParams(
            dimension_semantics=("parallel", "parallel")),
    )(*phases, w2_mat, b2.reshape(1, N).astype(jnp.float32))


# ----------------------------- parameters -----------------------------

def init_bottleneck_params(key, inplanes, planes, stride):
    expansion = 1
    keys = iter(jax.random.split(key, 32))
    cin_p = _round_up(inplanes, LANE)
    cp = _round_up(planes * expansion, LANE)

    def conv_w(kh, kw, cin, cout):
        std = (2.0 / (cout * kh * kw)) ** 0.5        # kaiming_normal_(fan_out, relu)
        return std * jax.random.normal(next(keys), (kh, kw, cin, cout), jnp.float32)

    def bn(c):
        gamma = jax.random.uniform(next(keys), (c,), jnp.float32, 0.5, 1.5)
        beta = 0.1 * jax.random.normal(next(keys), (c,), jnp.float32)
        mean = 0.1 * jax.random.normal(next(keys), (c,), jnp.float32)
        var = jax.random.uniform(next(keys), (c,), jnp.float32, 0.5, 1.5)
        scale = gamma / jnp.sqrt(var + EPS_BN)
        shift = beta - mean * scale
        return scale, shift

    def fold_pad(w, scale, shift, cin_pad, cout_pad):
        # Fold eval-mode BN (scale into weight, shift -> bias), zero-pad channels to lane
        # multiples ONCE here; padded channels stay exactly zero through the whole block.
        kh, kw, cin, cout = w.shape
        wf = (w * scale[None, None, None, :]).astype(jnp.bfloat16)
        wf = jnp.pad(wf, ((0, 0), (0, 0), (0, cin_pad - cin), (0, cout_pad - cout)))
        bf = jnp.pad(shift.astype(jnp.float32), (0, cout_pad - cout))
        return wf.reshape(kh * kw * cin_pad, cout_pad), bf

    p = {"stride": stride, "inplanes": inplanes, "planes": planes * expansion,
         "cin_p": cin_p, "cp": cp}
    s, b = bn(planes)
    p["w1"], p["b1"] = fold_pad(conv_w(1, 1, inplanes, planes), s, b, cin_p, cp)
    s, b = bn(planes)
    p["w2"], p["b2"] = fold_pad(conv_w(3, 3, planes, planes), s, b, cp, cp)
    s, b = bn(planes * expansion)
    p["w3"], p["b3"] = fold_pad(conv_w(1, 1, planes, planes * expansion), s, b, cp, cp)
    if stride != 1 or inplanes != planes * expansion:
        s, b = bn(planes * expansion)
        p["wd"], p["bd"] = fold_pad(conv_w(1, 1, inplanes, planes * expansion), s, b,
                                    cin_p, cp)
    return p


# ----------------------------- forward -----------------------------

def bottleneck_forward(params, x_nchw):
    """Bottleneck.forward: conv1/bn1/relu -> conv2/bn2/relu -> conv3/bn3 (+residual) -> relu."""
    stride = params["stride"]
    cin, cout = params["inplanes"], params["planes"]
    cin_p, cp = params["cin_p"], params["cp"]
    B, _, H, W = x_nchw.shape

    # NCHW -> NHWC bf16, pad channels to a lane multiple ONCE (carried through the block).
    x = jnp.transpose(x_nchw, (0, 2, 3, 1)).astype(jnp.bfloat16)
    if cin_p != cin:
        x = jnp.pad(x, ((0, 0), (0, 0), (0, 0), (0, cin_p - cin)))

    # conv1 + bn1 + relu    (1x1 conv == matmul over B*H*W rows)
    h = matmul_bias_act(x.reshape(B * H * W, cin_p), params["w1"], params["b1"],
                        relu=True).reshape(B, H, W, cp)

    # conv2 + bn2 + relu    (3x3, stride) -- in-kernel tap accumulation, no im2col
    h = conv3x3_bn_relu(h, params["w2"], params["b2"], stride=stride)
    _, Ho, Wo, _ = h.shape
    M = B * Ho * Wo

    # conv3 + bn3 + residual-add + relu, all fused into a single kernel
    if "wd" in params:
        # downsample (1x1 conv, stride) fused as a second MXU dot -> no f32 residual
        # ever written to / read back from HBM, one fewer pallas_call.
        xs = x if stride == 1 else x[:, ::stride, ::stride, :]
        out = matmul_bias_act(h.reshape(M, cp), params["w3"],
                              params["b3"] + params["bd"], relu=True,
                              x2=xs.reshape(M, cin_p), w2=params["wd"],
                              out_dtype=jnp.float32)
    else:
        # identity residual streamed as bf16, added in f32 in the epilogue
        out = matmul_bias_act(h.reshape(M, cp), params["w3"], params["b3"], relu=True,
                              residual=x.reshape(M, cp), out_dtype=jnp.float32)

    out = out.reshape(B, Ho, Wo, cp)[..., :cout]     # drop channel padding once, at exit
    return jnp.transpose(out, (0, 3, 1, 2))          # back to NCHW, f32


# ----------------------------- pure-JAX reference -----------------------------

def ref_bottleneck_forward(params, x_nchw):
    stride = params["stride"]
    cin, cout = params["inplanes"], params["planes"]
    cin_p, cp = params["cin_p"], params["cp"]
    x = jnp.transpose(x_nchw, (0, 2, 3, 1)).astype(jnp.bfloat16)
    if cin_p != cin:
        x = jnp.pad(x, ((0, 0), (0, 0), (0, 0), (0, cin_p - cin)))

    def conv(h, w_mat, shift, kh, s, pad, cin_w):
        w = w_mat.reshape(kh, kh, cin_w, -1)
        y = jax.lax.conv_general_dilated(
            h.astype(jnp.bfloat16), w, (s, s), [(pad, pad), (pad, pad)],
            dimension_numbers=("NHWC", "HWIO", "NHWC"),
            preferred_element_type=jnp.float32)
        return y + shift

    h = jnp.maximum(conv(x, params["w1"], params["b1"], 1, 1, 0, cin_p), 0.0).astype(jnp.bfloat16)
    h = jnp.maximum(conv(h, params["w2"], params["b2"], 3, stride, 1, cp), 0.0).astype(jnp.bfloat16)
    h = conv(h, params["w3"], params["b3"], 1, 1, 0, cp)
    if "wd" in params:
        res = conv(x, params["wd"], params["bd"], 1, stride, 0, cin_p)
    else:
        res = x.astype(jnp.float32)
    out = jnp.maximum(h + res, 0.0)[..., :cout]
    return jnp.transpose(out, (0, 3, 1, 2))


# ----------------------------- main -----------------------------

def _run_case(key, B, inplanes, planes, stride, H, W):
    kp, kx = jax.random.split(key)
    params = init_bottleneck_params(kp, inplanes, planes, stride)
    x = jax.random.normal(kx, (B, inplanes, H, W), jnp.float32)

    out = jax.jit(functools.partial(bottleneck_forward, params))(x)
    jax.block_until_ready(out)

    ref = jax.jit(functools.partial(ref_bottleneck_forward, params))(x)
    Ho = (H - 1) // stride + 1
    Wo = (W - 1) // stride + 1
    assert out.shape == (B, planes, Ho, Wo), out.shape
    assert bool(jnp.all(jnp.isfinite(out)))
    err = float(jnp.max(jnp.abs(out - ref)))
    assert err < 2e-2, f"max abs error vs reference: {err}"
    return out


if __name__ == "__main__":
    key = jax.random.PRNGKey(0)
    k1, k2 = jax.random.split(key)
    # identity-residual path (stride=1, inplanes == planes -> downsample=None)
    _run_case(k1, B=2, inplanes=32, planes=32, stride=1, H=16, W=16)
    # downsample path (stride=2, channel change -> 1x1 conv + BN fused into conv3 kernel)
    _run_case(k2, B=2, inplanes=32, planes=64, stride=2, H=16, W=16)
    print("KERNEL_OK")
</pallas_src>

<mosaic_0001>
module attributes {stable_mosaic.version = 11 : i64} {
  func.func @_mm_fused_kernel(%arg0: i32, %arg1: i32, %arg2: memref<256x128xbf16, #tpu.memory_space<vmem>>, %arg3: memref<128x128xbf16, #tpu.memory_space<vmem>>, %arg4: memref<1x128xf32, #tpu.memory_space<vmem>>, %arg5: memref<256x128xbf16, #tpu.memory_space<vmem>>) attributes {dimension_semantics = [#tpu.dimension_semantics<parallel>, #tpu.dimension_semantics<parallel>], iteration_bounds = array<i64: 2, 1>, scalar_prefetch = 0 : i64, scratch_operands = 0 : i64, tpu.core_type = #tpu.core_type<tc>, window_params = [{transform_indices = @transform_0, window_bounds = array<i64: 256, 128>}, {transform_indices = @transform_1, window_bounds = array<i64: 128, 128>}, {transform_indices = @transform_2, window_bounds = array<i64: 1, 128>}, {transform_indices = @transform_3, window_bounds = array<i64: 256, 128>}]} {
    %c0 = arith.constant 0 : index
    %c0_0 = arith.constant 0 : index
    %0 = vector.load %arg2[%c0, %c0_0] : memref<256x128xbf16, #tpu.memory_space<vmem>>, vector<256x128xbf16>
    %c0_1 = arith.constant 0 : index
    %c0_2 = arith.constant 0 : index
    %1 = vector.load %arg3[%c0_1, %c0_2] : memref<128x128xbf16, #tpu.memory_space<vmem>>, vector<128x128xbf16>
    %cst = arith.constant dense<0.000000e+00> : vector<256x128xf32>
    %2 = tpu.matmul %0, %1, %cst {dimension_numbers = #tpu.dot_dimension_numbers<[1], [0], [0], [1], [0, 0, 1, 1], [], []>} : vector<256x128xbf16>, vector<128x128xbf16>, vector<256x128xf32> -> vector<256x128xf32>
    %c0_3 = arith.constant 0 : index
    %c0_4 = arith.constant 0 : index
    %3 = vector.load %arg4[%c0_3, %c0_4] : memref<1x128xf32, #tpu.memory_space<vmem>>, vector<1x128xf32>
    %4 = vector.broadcast %3 : vector<1x128xf32> to vector<256x128xf32>
    %5 = arith.addf %2, %4 : vector<256x128xf32>
    %cst_5 = arith.constant 0.000000e+00 : f32
    %6 = vector.broadcast %cst_5 : f32 to vector<256x128xf32>
    %7 = arith.maximumf %5, %6 : vector<256x128xf32>
    %8 = arith.truncf %7 : vector<256x128xf32> to vector<256x128xbf16>
    %c0_6 = arith.constant 0 : index
    %c0_7 = arith.constant 0 : index
    %9 = vector.load %arg5[%c0_6, %c0_7] : memref<256x128xbf16, #tpu.memory_space<vmem>>, vector<256x128xbf16>
    tpu.vector_store %arg5[%c0_6, %c0_7], %8 {strides = array<i32>} : memref<256x128xbf16, #tpu.memory_space<vmem>>, vector<256x128xbf16>,
    return
  }
  func.func @transform_0(%arg0: i32, %arg1: i32) -> (i32, i32) {
    %c0_i32 = arith.constant 0 : i32
    %c0_i32_0 = arith.constant 0 : i32
    return %arg0, %c0_i32 : i32, i32
  }
  func.func @transform_1(%arg0: i32, %arg1: i32) -> (i32, i32) {
    %c0_i32 = arith.constant 0 : i32
    %c0_i32_0 = arith.constant 0 : i32
    return %c0_i32, %arg1 : i32, i32
  }
  func.func @transform_2(%arg0: i32, %arg1: i32) -> (i32, i32) {
    %c0_i32 = arith.constant 0 : i32
    %c0_i32_0 = arith.constant 0 : i32
    return %c0_i32, %arg1 : i32, i32
  }
  func.func @transform_3(%arg0: i32, %arg1: i32) -> (i32, i32) {
    %c0_i32 = arith.constant 0 : i32
    return %arg0, %arg1 : i32, i32
  }
}

module attributes {stable_mosaic.version = 11 : i64} {
  func.func @_conv3x3_tap_kernel(%arg0: i32, %arg1: i32, %arg2: memref<1x18x18x128xbf16, #tpu.memory_space<vmem>>, %arg3: memref<1152x128xbf16, #tpu.memory_space<vmem>>, %arg4: memref<1x128xf32, #tpu.memory_space<vmem>>, %arg5: memref<1x16x16x128xbf16, #tpu.memory_space<vmem>>) attributes {dimension_semantics = [#tpu.dimension_semantics<parallel>, #tpu.dimension_semantics<parallel>], iteration_bounds = array<i64: 2, 1>, scalar_prefetch = 0 : i64, scratch_operands = 0 : i64, tpu.core_type = #tpu.core_type<tc>, window_params = [{transform_indices = @transform_0, window_bounds = array<i64: 1, 18, 18, 128>}, {transform_indices = @transform_1, window_bounds = array<i64: 1152, 128>}, {transform_indices = @transform_2, window_bounds = array<i64: 1, 128>}, {transform_indices = @transform_3, window_bounds = array<i64: 1, 16, 16, 128>}]} {
    %cst = arith.constant 0.000000e+00 : f32
    %0 = vector.broadcast %cst : f32 to vector<256x128xf32>
    %c0 = arith.constant 0 : index
    %c0_0 = arith.constant 0 : index
    %c0_1 = arith.constant 0 : index
    %c0_2 = arith.constant 0 : index
    %1 = vector.load %arg2[%c0, %c0_0, %c0_1, %c0_2] : memref<1x18x18x128xbf16, #tpu.memory_space<vmem>>, vector<1x16x16x128xbf16>
    %2 = vector.shape_cast %1 : vector<1x16x16x128xbf16> to vector<16x16x128xbf16>
    %3 = vector.shape_cast %2 : vector<16x16x128xbf16> to vector<256x128xbf16>
    %c0_3 = arith.constant 0 : index
    %c0_4 = arith.constant 0 : index
    %4 = vector.load %arg3[%c0_3, %c0_4] : memref<1152x128xbf16, #tpu.memory_space<vmem>>, vector<128x128xbf16>
    %cst_5 = arith.constant dense<0.000000e+00> : vector<256x128xf32>
    %5 = tpu.matmul %3, %4, %cst_5 {dimension_numbers = #tpu.dot_dimension_numbers<[1], [0], [0], [1], [0, 0, 1, 1], [], []>} : vector<256x128xbf16>, vector<128x128xbf16>, vector<256x128xf32> -> vector<256x128xf32>
    %6 = arith.addf %0, %5 : vector<256x128xf32>
    %c0_6 = arith.constant 0 : index
    %c0_7 = arith.constant 0 : index
    %c1 = arith.constant 1 : index
    %c0_8 = arith.constant 0 : index
    %7 = vector.load %arg2[%c0_6, %c0_7, %c1, %c0_8] : memref<1x18x18x128xbf16, #tpu.memory_space<vmem>>, vector<1x16x16x128xbf16>
    %8 = vector.shape_cast %7 : vector<1x16x16x128xbf16> to vector<16x16x128xbf16>
    %9 = vector.shape_cast %8 : vector<16x16x128xbf16> to vector<256x128xbf16>
    %c128 = arith.constant 128 : index
    %c0_9 = arith.constant 0 : index
    %10 = vector.load %arg3[%c128, %c0_9] : memref<1152x128xbf16, #tpu.memory_space<vmem>>, vector<128x128xbf16>
    %cst_10 = arith.constant dense<0.000000e+00> : vector<256x128xf32>
    %11 = tpu.matmul %9, %10, %cst_10 {dimension_numbers = #tpu.dot_dimension_numbers<[1], [0], [0], [1], [0, 0, 1, 1], [], []>} : vector<256x128xbf16>, vector<128x128xbf16>, vector<256x128xf32> -> vector<256x128xf32>
    %12 = arith.addf %6, %11 : vector<256x128xf32>
    %c0_11 = arith.constant 0 : index
    %c0_12 = arith.constant 0 : index
    %c2 = arith.constant 2 : index
    %c0_13 = arith.constant 0 : index
    %13 = vector.load %arg2[%c0_11, %c0_12, %c2, %c0_13] : memref<1x18x18x128xbf16, #tpu.memory_space<vmem>>, vector<1x16x16x128xbf16>
    %14 = vector.shape_cast %13 : vector<1x16x16x128xbf16> to vector<16x16x128xbf16>
    %15 = vector.shape_cast %14 : vector<16x16x128xbf16> to vector<256x128xbf16>
    %c256 = arith.constant 256 : index
    %c0_14 = arith.constant 0 : index
    %16 = vector.load %arg3[%c256, %c0_14] : memref<1152x128xbf16, #tpu.memory_space<vmem>>, vector<128x128xbf16>
    %cst_15 = arith.constant dense<0.000000e+00> : vector<256x128xf32>
    %17 = tpu.matmul %15, %16, %cst_15 {dimension_numbers = #tpu.dot_dimension_numbers<[1], [0], [0], [1], [0, 0, 1, 1], [], []>} : vector<256x128xbf16>, vector<128x128xbf16>, vector<256x128xf32> -> vector<256x128xf32>
    %18 = arith.addf %12, %17 : vector<256x128xf32>
    %c0_16 = arith.constant 0 : index
    %c1_17 = arith.constant 1 : index
    %c0_18 = arith.constant 0 : index
    %c0_19 = arith.constant 0 : index
    %19 = vector.load %arg2[%c0_16, %c1_17, %c0_18, %c0_19] : memref<1x18x18x128xbf16, #tpu.memory_space<vmem>>, vector<1x16x16x128xbf16>
    %20 = vector.shape_cast %19 : vector<1x16x16x128xbf16> to vector<16x16x128xbf16>
    %21 = vector.shape_cast %20 : vector<16x16x128xbf16> to vector<256x128xbf16>
    %c384 = arith.constant 384 : index
    %c0_20 = arith.constant 0 : index
    %22 = vector.load %arg3[%c384, %c0_20] : memref<1152x128xbf16, #tpu.memory_space<vmem>>, vector<128x128xbf16>
    %cst_21 = arith.constant dense<0.000000e+00> : vector<256x128xf32>
    %23 = tpu.matmul %21, %22, %cst_21 {dimension_numbers = #tpu.dot_dimension_numbers<[1], [0], [0], [1], [0, 0, 1, 1], [], []>} : vector<256x128xbf16>, vector<128x128xbf16>, vector<256x128xf32> -> vector<256x128xf32>
    %24 = arith.addf %18, %23 : vector<256x128xf32>
    %c0_22 = arith.constant 0 : index
    %c1_23 = arith.constant 1 : index
    %c1_24 = arith.constant 1 : index
    %c0_25 = arith.constant 0 : index
    %25 = vector.load %arg2[%c0_22, %c1_23, %c1_24, %c0_25] : memref<1x18x18x128xbf16, #tpu.memory_space<vmem>>, vector<1x16x16x128xbf16>
    %26 = vector.shape_cast %25 : vector<1x16x16x128xbf16> to vector<16x16x128xbf16>
    %27 = vector.shape_cast %26 : vector<16x16x128xbf16> to vector<256x128xbf16>
    %c512 = arith.constant 512 : index
    %c0_26 = arith.constant 0 : index
    %28 = vector.load %arg3[%c512, %c0_26] : memref<1152x128xbf16, #tpu.memory_space<vmem>>, vector<128x128xbf16>
    %cst_27 = arith.constant dense<0.000000e+00> : vector<256x128xf32>
    %29 = tpu.matmul %27, %28, %cst_27 {dimension_numbers = #tpu.dot_dimension_numbers<[1], [0], [0], [1], [0, 0, 1, 1], [], []>} : vector<256x128xbf16>, vector<128x128xbf16>, vector<256x128xf32> -> vector<256x128xf32>
    %30 = arith.addf %24, %29 : vector<256x128xf32>
    %c0_28 = arith.constant 0 : index
    %c1_29 = arith.constant 1 : index
    %c2_30 = arith.constant 2 : index
    %c0_31 = arith.constant 0 : index
    %31 = vector.load %arg2[%c0_28, %c1_29, %c2_30, %c0_31] : memref<1x18x18x128xbf16, #tpu.memory_space<vmem>>, vector<1x16x16x128xbf16>
    %32 = vector.shape_cast %31 : vector<1x16x16x128xbf16> to vector<16x16x128xbf16>
    %33 = vector.shape_cast %32 : vector<16x16x128xbf16> to vector<256x128xbf16>
    %c640 = arith.constant 640 : index
    %c0_32 = arith.constant 0 : index
    %34 = vector.load %arg3[%c640, %c0_32] : memref<1152x128xbf16, #tpu.memory_space<vmem>>, vector<128x128xbf16>
    %cst_33 = arith.constant dense<0.000000e+00> : vector<256x128xf32>
    %35 = tpu.matmul %33, %34, %cst_33 {dimension_numbers = #tpu.dot_dimension_numbers<[1], [0], [0], [1], [0, 0, 1, 1], [], []>} : vector<256x128xbf16>, vector<128x128xbf16>, vector<256x128xf32> -> vector<256x128xf32>
    %36 = arith.addf %30, %35 : vector<256x128xf32>
    %c0_34 = arith.constant 0 : index
    %c2_35 = arith.constant 2 : index
    %c0_36 = arith.constant 0 : index
    %c0_37 = arith.constant 0 : index
    %37 = vector.load %arg2[%c0_34, %c2_35, %c0_36, %c0_37] : memref<1x18x18x128xbf16, #tpu.memory_space<vmem>>, vector<1x16x16x128xbf16>
    %38 = vector.shape_cast %37 : vector<1x16x16x128xbf16> to vector<16x16x128xbf16>
    %39 = vector.shape_cast %38 : vector<16x16x128xbf16> to vector<256x128xbf16>
    %c768 = arith.constant 768 : index
    %c0_38 = arith.constant 0 : index
    %40 = vector.load %arg3[%c768, %c0_38] : memref<1152x128xbf16, #tpu.memory_space<vmem>>, vector<128x128xbf16>
    %cst_39 = arith.constant dense<0.000000e+00> : vector<256x128xf32>
    %41 = tpu.matmul %39, %40, %cst_39 {dimension_numbers = #tpu.dot_dimension_numbers<[1], [0], [0], [1], [0, 0, 1, 1], [], []>} : vector<256x128xbf16>, vector<128x128xbf16>, vector<256x128xf32> -> vector<256x128xf32>
    %42 = arith.addf %36, %41 : vector<256x128xf32>
    %c0_40 = arith.constant 0 : index
    %c2_41 = arith.constant 2 : index
    %c1_42 = arith.constant 1 : index
    %c0_43 = arith.constant 0 : index
    %43 = vector.load %arg2[%c0_40, %c2_41, %c1_42, %c0_43] : memref<1x18x18x128xbf16, #tpu.memory_space<vmem>>, vector<1x16x16x128xbf16>
    %44 = vector.shape_cast %43 : vector<1x16x16x128xbf16> to vector<16x16x128xbf16>
    %45 = vector.shape_cast %44 : vector<16x16x128xbf16> to vector<256x128xbf16>
    %c896 = arith.constant 896 : index
    %c0_44 = arith.constant 0 : index
    %46 = vector.load %arg3[%c896, %c0_44] : memref<1152x128xbf16, #tpu.memory_space<vmem>>, vector<128x128xbf16>
    %cst_45 = arith.constant dense<0.000000e+00> : vector<256x128xf32>
    %47 = tpu.matmul %45, %46, %cst_45 {dimension_numbers = #tpu.dot_dimension_numbers<[1], [0], [0], [1], [0, 0, 1, 1], [], []>} : vector<256x128xbf16>, vector<128x128xbf16>, vector<256x128xf32> -> vector<256x128xf32>
    %48 = arith.addf %42, %47 : vector<256x128xf32>
    %c0_46 = arith.constant 0 : index
    %c2_47 = arith.constant 2 : index
    %c2_48 = arith.constant 2 : index
    %c0_49 = arith.constant 0 : index
    %49 = vector.load %arg2[%c0_46, %c2_47, %c2_48, %c0_49] : memref<1x18x18x128xbf16, #tpu.memory_space<vmem>>, vector<1x16x16x128xbf16>
    %50 = vector.shape_cast %49 : vector<1x16x16x128xbf16> to vector<16x16x128xbf16>
    %51 = vector.shape_cast %50 : vector<16x16x128xbf16> to vector<256x128xbf16>
    %c1024 = arith.constant 1024 : index
    %c0_50 = arith.constant 0 : index
    %52 = vector.load %arg3[%c1024, %c0_50] : memref<1152x128xbf16, #tpu.memory_space<vmem>>, vector<128x128xbf16>
    %cst_51 = arith.constant dense<0.000000e+00> : vector<256x128xf32>
    %53 = tpu.matmul %51, %52, %cst_51 {dimension_numbers = #tpu.dot_dimension_numbers<[1], [0], [0], [1], [0, 0, 1, 1], [], []>} : vector<256x128xbf16>, vector<128x128xbf16>, vector<256x128xf32> -> vector<256x128xf32>
    %54 = arith.addf %48, %53 : vector<256x128xf32>
    %c0_52 = arith.constant 0 : index
    %c0_53 = arith.constant 0 : index
    %55 = vector.load %arg4[%c0_52, %c0_53] : memref<1x128xf32, #tpu.memory_space<vmem>>, vector<1x128xf32>
    %56 = vector.broadcast %55 : vector<1x128xf32> to vector<256x128xf32>
    %57 = arith.addf %54, %56 : vector<256x128xf32>
    %cst_54 = arith.constant 0.000000e+00 : f32
    %58 = vector.broadcast %cst_54 : f32 to vector<256x128xf32>
    %59 = arith.maximumf %57, %58 : vector<256x128xf32>
    %60 = vector.shape_cast %59 : vector<256x128xf32> to vector<1x16x16x128xf32>
    %61 = arith.truncf %60 : vector<1x16x16x128xf32> to vector<1x16x16x128xbf16>
    %c0_55 = arith.constant 0 : index
    %c0_56 = arith.constant 0 : index
    %c0_57 = arith.constant 0 : index
    %c0_58 = arith.constant 0 : index
    %62 = vector.load %arg5[%c0_55, %c0_56, %c0_57, %c0_58] : memref<1x16x16x128xbf16, #tpu.memory_space<vmem>>, vector<1x16x16x128xbf16>
    tpu.vector_store %arg5[%c0_55, %c0_56, %c0_57, %c0_58], %61 {strides = array<i32>} : memref<1x16x16x128xbf16, #tpu.memory_space<vmem>>, vector<1x16x16x128xbf16>,
    return
  }
  func.func @transform_0(%arg0: i32, %arg1: i32) -> (i32, i32, i32, i32) {
    %c0_i32 = arith.constant 0 : i32
    %c0_i32_0 = arith.constant 0 : i32
    %c0_i32_1 = arith.constant 0 : i32
    %c0_i32_2 = arith.constant 0 : i32
    return %arg0, %c0_i32, %c0_i32_0, %c0_i32_1 : i32, i32, i32, i32
  }
  func.func @transform_1(%arg0: i32, %arg1: i32) -> (i32, i32) {
    %c0_i32 = arith.constant 0 : i32
    %c0_i32_0 = arith.constant 0 : i32
    return %c0_i32, %arg1 : i32, i32
  }
  func.func @transform_2(%arg0: i32, %arg1: i32) -> (i32, i32) {
    %c0_i32 = arith.constant 0 : i32
    %c0_i32_0 = arith.constant 0 : i32
    return %c0_i32, %arg1 : i32, i32
  }
  func.func @transform_3(%arg0: i32, %arg1: i32) -> (i32, i32, i32, i32) {
    %c0_i32 = arith.constant 0 : i32
    %c0_i32_0 = arith.constant 0 : i32
    %c0_i32_1 = arith.constant 0 : i32
    return %arg0, %c0_i32, %c0_i32_0, %arg1 : i32, i32, i32, i32
  }
}

module attributes {stable_mosaic.version = 11 : i64} {
  func.func @_mm_fused_kernel(%arg0: i32, %arg1: i32, %arg2: memref<256x128xbf16, #tpu.memory_space<vmem>>, %arg3: memref<128x128xbf16, #tpu.memory_space<vmem>>, %arg4: memref<1x128xf32, #tpu.memory_space<vmem>>, %arg5: memref<256x128xbf16, #tpu.memory_space<vmem>>, %arg6: memref<256x128xf32, #tpu.memory_space<vmem>>) attributes {dimension_semantics = [#tpu.dimension_semantics<parallel>, #tpu.dimension_semantics<parallel>], iteration_bounds = array<i64: 2, 1>, scalar_prefetch = 0 : i64, scratch_operands = 0 : i64, tpu.core_type = #tpu.core_type<tc>, window_params = [{transform_indices = @transform_0, window_bounds = array<i64: 256, 128>}, {transform_indices = @transform_1, window_bounds = array<i64: 128, 128>}, {transform_indices = @transform_2, window_bounds = array<i64: 1, 128>}, {transform_indices = @transform_3, window_bounds = array<i64: 256, 128>}, {transform_indices = @transform_4, window_bounds = array<i64: 256, 128>}]} {
    %c0 = arith.constant 0 : index
    %c0_0 = arith.constant 0 : index
    %0 = vector.load %arg2[%c0, %c0_0] : memref<256x128xbf16, #tpu.memory_space<vmem>>, vector<256x128xbf16>
    %c0_1 = arith.constant 0 : index
    %c0_2 = arith.constant 0 : index
    %1 = vector.load %arg3[%c0_1, %c0_2] : memref<128x128xbf16, #tpu.memory_space<vmem>>, vector<128x128xbf16>
    %cst = arith.constant dense<0.000000e+00> : vector<256x128xf32>
    %2 = tpu.matmul %0, %1, %cst {dimension_numbers = #tpu.dot_dimension_numbers<[1], [0], [0], [1], [0, 0, 1, 1], [], []>} : vector<256x128xbf16>, vector<128x128xbf16>, vector<256x128xf32> -> vector<256x128xf32>
    %c0_3 = arith.constant 0 : index
    %c0_4 = arith.constant 0 : index
    %3 = vector.load %arg5[%c0_3, %c0_4] : memref<256x128xbf16, #tpu.memory_space<vmem>>, vector<256x128xbf16>
    %4 = arith.extf %3 : vector<256x128xbf16> to vector<256x128xf32>
    %5 = arith.addf %2, %4 : vector<256x128xf32>
    %c0_5 = arith.constant 0 : index
    %c0_6 = arith.constant 0 : index
    %6 = vector.load %arg4[%c0_5, %c0_6] : memref<1x128xf32, #tpu.memory_space<vmem>>, vector<1x128xf32>
    %7 = vector.broadcast %6 : vector<1x128xf32> to vector<256x128xf32>
    %8 = arith.addf %5, %7 : vector<256x128xf32>
    %cst_7 = arith.constant 0.000000e+00 : f32
    %9 = vector.broadcast %cst_7 : f32 to vector<256x128xf32>
    %10 = arith.maximumf %8, %9 : vector<256x128xf32>
    %c0_8 = arith.constant 0 : index
    %c0_9 = arith.constant 0 : index
    %11 = vector.load %arg6[%c0_8, %c0_9] : memref<256x128xf32, #tpu.memory_space<vmem>>, vector<256x128xf32>
    tpu.vector_store %arg6[%c0_8, %c0_9], %10 {strides = array<i32>} : memref<256x128xf32, #tpu.memory_space<vmem>>, vector<256x128xf32>,
    return
  }
  func.func @transform_0(%arg0: i32, %arg1: i32) -> (i32, i32) {
    %c0_i32 = arith.constant 0 : i32
    %c0_i32_0 = arith.constant 0 : i32
    return %arg0, %c0_i32 : i32, i32
  }
  func.func @transform_1(%arg0: i32, %arg1: i32) -> (i32, i32) {
    %c0_i32 = arith.constant 0 : i32
    %c0_i32_0 = arith.constant 0 : i32
    return %c0_i32, %arg1 : i32, i32
  }
  func.func @transform_2(%arg0: i32, %arg1: i32) -> (i32, i32) {
    %c0_i32 = arith.constant 0 : i32
    %c0_i32_0 = arith.constant 0 : i32
    return %c0_i32, %arg1 : i32, i32
  }
  func.func @transform_3(%arg0: i32, %arg1: i32) -> (i32, i32) {
    %c0_i32 = arith.constant 0 : i32
    return %arg0, %arg1 : i32, i32
  }
  func.func @transform_4(%arg0: i32, %arg1: i32) -> (i32, i32) {
    %c0_i32 = arith.constant 0 : i32
    return %arg0, %arg1 : i32, i32
  }
}

</mosaic_0001>

<bundles_post_ra>
// kernel: bottleneck_forward.3
= control target key start
LH: loop header
LB: loop body
LE: loop exit
PB: predicated region body
PF: predicated region fallthrough
CT: control target
= control target key end

     0   :  { %s1257_s12 = smov 0   ;;  %s1259_s13 = smov 0   ;;  %s1394_s0 = inlined_call_operand.vmem [shape: bf16[512,128], index: 0, kind: input, shape index: {}]   ;;  %s1395_s1 = inlined_call_operand.vmem [shape: bf16[128,128], index: 1, kind: input, shape index: {}]   ;;  %s1396_s2 = inlined_call_operand.vmem [shape: f32[1,128], index: 2, kind: input, shape index: {}]   ;;  %s1397_s3 = inlined_call_operand.vmem [shape: bf16[512,128], index: 3, kind: output, shape index: {}]  }
   0x1   :  { %s1261_s14 = smov 0  }
   0x2 LB: > { %s25_s15 = sadd.s32 1, %s1231_s13  ;;  %p886_p0 = scmp.ge.s32.totalorder %s1235_s14, 1  ;;  %s1235_s14 = sphi %s1261_s14, %s13_s14   ;;  %s1231_s13 = sphi %s1259_s13, %s1399_s13   ;;  %s1227_s12 = sphi %s1257_s12, %s1398_s12  }
   0x3   : > { %p27_p1 = scmp.ge.s32.totalorder %s25_s15, 2  ;;  %p169_p2 = scmp.lt.s32.totalorder %s1235_s14, 3 }
   0x5   : > { %s1401_s15 = smov (%p27_p1, %s25_s15), 0  ;;  %p170_p3 = pnand %p886_p0, %p169_p2 }
   0x6   : > { %s887_s18 = sshll.u32 (!%p170_p3), %s1227_s12, 5 }
   0x7   : > { %173 = sbr.rel (%p170_p3) target bundleno = 275 (0x113), region = 32  ;;  %p204_p4 = scmp.lt.s32.totalorder (!%p170_p3), %s887_s18, 63 }
   0xc   : > { %v1189_v0 = vld [vmem:[%s1395_s1 + $0x38] sm:$0xff]   ;;  %v1190_v1 = vld [vmem:[%s1395_s1 + $0x30] sm:$0xff]   ;;  %s1403_s18 = smov (!%p204_p4, %s887_s18), 63  ;;  %v1191_v2 = vld [vmem:[%s1395_s1 + $0x28] sm:$0xff]  }
   0xd   : > { %1101 = vmatprep.subr.bf16.mxu0 %v1189_v0  ;;  %1149 = vmatprep.subr.bf16.mxu1 %v1189_v0  ;;  %s888_s23 = sshll.u32 %s1403_s18, 2  ;;  %v1192_v3 = vld [vmem:[%s1395_s1 + $0x20] sm:$0xff]   ;;  %v1193_v6 = vld [vmem:[%s1395_s1 + $0x18] sm:$0xff]   ;;  %v1194_v7 = vld [vmem:[%s1395_s1 + $0x10] sm:$0xff]  }
   0xe   : > { %1102 = vmatpush3.bf16.msra.mxu0 %v1189_v0  ;;  %1157 = vmatpush3.bf16.msra.mxu1 %v1189_v0  ;;  %s1292_s26 = scalar_lea.vmem %s1394_s0, %s888_s23  ;;  %v1195_v8 = vld [vmem:[%s1395_s1 + $0x8] sm:$0xff]   ;;  %v1196_v9 = vld [vmem:[%s1395_s1] sm:$0xff]   ;;  %s1343_s17 = scalar_lea.vmem %s1397_s3, %s888_s23 }
   0xf   : > { %1103 = vmatprep.subr.bf16.mxu0 %v1190_v1  ;;  %1150 = vmatprep.subr.bf16.mxu1 %v1190_v1  ;;  %v1197_v4 = vld [vmem:[%s1292_s26] sm:$0xff]   ;;  %v1199_v10 = vld [vmem:[%s1292_s26 + $0x8] sm:$0xff]   ;;  %v1201_v12 = vld [vmem:[%s1292_s26 + $0x10] sm:$0xff]  }
  0x10   : > { %v1198_v5 = vld [vmem:[%s1292_s26 + $0x40] sm:$0xff]   ;;  %1117 = vmatprep.mubr.bf16.mxu0 %v1197_v4  ;;  %v1200_v11 = vld [vmem:[%s1292_s26 + $0x48] sm:$0xff]   ;;  %v1202_v13 = vld [vmem:[%s1292_s26 + $0x50] sm:$0xff]  }
  0x11   : > { %1133 = vmatprep.mubr.bf16.mxu1 %v1198_v5  ;;  %v1203_v14 = vld [vmem:[%s1292_s26 + $0x18] sm:$0xff]   ;;  %v1205_v16 = vld [vmem:[%s1292_s26 + $0x20] sm:$0xff]   ;;  %v1207_v18 = vld [vmem:[%s1292_s26 + $0x28] sm:$0xff]  }
  0x12   : > { %1104 = vmatpush3.bf16.msra.mxu0 %v1190_v1  ;;  %1158 = vmatpush3.bf16.msra.mxu1 %v1190_v1  ;;  %v1204_v15 = vld [vmem:[%s1292_s26 + $0x58] sm:$0xff]   ;;  %v1206_v17 = vld [vmem:[%s1292_s26 + $0x60] sm:$0xff]   ;;  %v1208_v19 = vld [vmem:[%s1292_s26 + $0x68] sm:$0xff]  }
  0x13   : > { %1105 = vmatprep.subr.bf16.mxu0 %v1191_v2  ;;  %1151 = vmatprep.subr.bf16.mxu1 %v1191_v2  ;;  %v1209_v20 = vld [vmem:[%s1292_s26 + $0x30] sm:$0xff]   ;;  %v1211_v22 = vld [vmem:[%s1292_s26 + $0x38] sm:$0xff]   ;;  %v1328_v24 = vld [vmem:[%s1396_s2] ss:$0 sm:$0xff] }
  0x14   : > { %v1210_v21 = vld [vmem:[%s1292_s26 + $0x70] sm:$0xff]   ;;  %v1212_v23 = vld [vmem:[%s1292_s26 + $0x78] sm:$0xff]  }
  0x16   : > { %1106 = vmatpush3.bf16.msra.mxu0 %v1191_v2  ;;  %1159 = vmatpush3.bf16.msra.mxu1 %v1191_v2 }
  0x17   : > { %1107 = vmatprep.subr.bf16.mxu0 %v1192_v3  ;;  %1152 = vmatprep.subr.bf16.mxu1 %v1192_v3 }
  0x1a   : > { %1108 = vmatpush3.bf16.msra.mxu0 %v1192_v3  ;;  %1160 = vmatpush3.bf16.msra.mxu1 %v1192_v3 }
  0x1b   : > { %1109 = vmatprep.subr.bf16.mxu0 %v1193_v6  ;;  %1153 = vmatprep.subr.bf16.mxu1 %v1193_v6 }
  0x1e   : > { %1110 = vmatpush3.bf16.msra.mxu0 %v1193_v6  ;;  %1161 = vmatpush3.bf16.msra.mxu1 %v1193_v6 }
  0x1f   : > { %1111 = vmatprep.subr.bf16.mxu0 %v1194_v7  ;;  %1154 = vmatprep.subr.bf16.mxu1 %v1194_v7 }
  0x22   : > { %1112 = vmatpush3.bf16.msra.mxu0 %v1194_v7  ;;  %1162 = vmatpush3.bf16.msra.mxu1 %v1194_v7 }
  0x23   : > { %1113 = vmatprep.subr.bf16.mxu0 %v1195_v8  ;;  %1155 = vmatprep.subr.bf16.mxu1 %v1195_v8 }
  0x26   : > { %1114 = vmatpush3.bf16.msra.mxu0 %v1195_v8  ;;  %1163 = vmatpush3.bf16.msra.mxu1 %v1195_v8 }
  0x27   : > { %1115 = vmatprep.subr.bf16.mxu0 %v1196_v9  ;;  %1156 = vmatprep.subr.bf16.mxu1 %v1196_v9 }
  0x2a   : > { %1116 = vmatpush3.bf16.msra.mxu0 %v1196_v9  ;;  %1164 = vmatpush3.bf16.msra.mxu1 %v1196_v9 }
  0x2d   : > { %1118 = vmatmul.mubr.bf16.vlgmr.msra.gmra.mxu0 %v1199_v10  ;;  %1134 = vmatmul.mubr.bf16.vlgmr.msra.gmra.mxu1 %v1200_v11 }
  0x2e   : > { %1121 = vmatprep.mubr.bf16.mxu0 %v1201_v12  ;;  %1137 = vmatprep.mubr.bf16.mxu1 %v1202_v13 }
  0x35   : > { %1122 = vmatmul.mubr.bf16.gmra.mxu0 %v1203_v14  ;;  %1138 = vmatmul.mubr.bf16.gmra.mxu1 %v1204_v15 }
  0x36   : > { %1125 = vmatprep.mubr.bf16.mxu0 %v1205_v16  ;;  %1141 = vmatprep.mubr.bf16.mxu1 %v1206_v17 }
  0x3d   : > { %1126 = vmatmul.mubr.bf16.gmra.mxu0 %v1207_v18  ;;  %1142 = vmatmul.mubr.bf16.gmra.mxu1 %v1208_v19 }
  0x3e   : > { %1129 = vmatprep.mubr.bf16.mxu0 %v1209_v20  ;;  %1145 = vmatprep.mubr.bf16.mxu1 %v1210_v21 }
  0x45   : > { %1130 = vmatmul.mubr.bf16.gmra.mxu0 %v1211_v22  ;;  %1146 = vmatmul.mubr.bf16.gmra.mxu1 %v1212_v23 }
  0xed   : > { %v1119_v25 = vpop.f32.mrf.mxu0  ;;  %v1135_v26 = vpop.f32.mrf.mxu1 }
  0xee   : > { %v468_v27 = vadd.f32 %v1119_v25, %v1328_v24  ;;  %v532_v28 = vadd.f32 %v1135_v26, %v1328_v24 }
  0xef   : > { %v459_v29 = vpop.f32.mrf.mxu0  ;;  %v523_v30 = vpop.f32.mrf.mxu1 }
  0xf0   : > { %v460_v31 = vadd.f32 %v1328_v24, %v459_v29  ;;  %v524_v32 = vadd.f32 %v1328_v24, %v523_v30  ;;  %v588_v37 = vmax.f32 %v468_v27, 0.0  ;;  %v604_v38 = vmax.f32 %v532_v28, 0.0 }
  0xf1   : > { %v1120_v33 = vpop.f32.mrf.mxu0  ;;  %v1136_v34 = vpop.f32.mrf.mxu1 }
  0xf2   : > { %v471_v35 = vadd.f32 %v1120_v33, %v1328_v24  ;;  %v535_v36 = vadd.f32 %v1136_v34, %v1328_v24  ;;  %v586_v45 = vmax.f32 %v460_v31, 0.0  ;;  %v602_v46 = vmax.f32 %v524_v32, 0.0 }
  0xf3   : > { %v462_v39 = vpop.f32.mrf.mxu0  ;;  %v526_v40 = vpop.f32.mrf.mxu1 }
  0xf4   : > { %v589_v41 = vmax.f32 %v471_v35, 0.0  ;;  %v605_v42 = vmax.f32 %v535_v36, 0.0  ;;  %v463_v43 = vadd.f32 %v1328_v24, %v462_v39  ;;  %v527_v44 = vadd.f32 %v1328_v24, %v526_v40 }
  0xf5   : > { %v1123_v47 = vpop.f32.mrf.mxu0  ;;  %v1139_v48 = vpop.f32.mrf.mxu1 }
  0xf6   : > { %v990_v49 = vpack.c.bf16 %v589_v41, %v588_v37  ;;  %v1030_v50 = vpack.c.bf16 %v605_v42, %v604_v38  ;;  %v587_v51 = vmax.f32 %v463_v43, 0.0  ;;  %v603_v52 = vmax.f32 %v527_v44, 0.0 }
  0xf7   : > { %v484_v53 = vadd.f32 %v1123_v47, %v1328_v24  ;;  %v548_v54 = vadd.f32 %v1139_v48, %v1328_v24  ;;  %v475_v55 = vpop.f32.mrf.mxu0  ;;  %v539_v56 = vpop.f32.mrf.mxu1 }
  0xf8   : > { %1062 = vst [vmem:[%s1343_s17 + $0x8] sm:$0xff] %v990_v49   ;;  %1070 = vst [vmem:[%s1343_s17 + $0x48] sm:$0xff] %v1030_v50   ;;  %v985_v57 = vpack.c.bf16 %v587_v51, %v586_v45  ;;  %v1025_v58 = vpack.c.bf16 %v603_v52, %v602_v46  ;;  %v476_v59 = vadd.f32 %v1328_v24, %v475_v55 }
  0xf9   : > { %v540_v60 = vadd.f32 %v1328_v24, %v539_v56  ;;  %v1124_v61 = vpop.f32.mrf.mxu0  ;;  %v1140_v62 = vpop.f32.mrf.mxu1  ;;  %v592_v1 = vmax.f32 %v484_v53, 0.0  ;;  %v608_v2 = vmax.f32 %v548_v54, 0.0 }
  0xfa   : > { %986 = vst [vmem:[%s1343_s17] sm:$0xff] %v985_v57   ;;  %1069 = vst [vmem:[%s1343_s17 + $0x40] sm:$0xff] %v1025_v58   ;;  %v487_v63 = vadd.f32 %v1124_v61, %v1328_v24  ;;  %v551_v0 = vadd.f32 %v1140_v62, %v1328_v24  ;;  %v590_v9 = vmax.f32 %v476_v59, 0.0 }
  0xfb   : > { %v478_v3 = vpop.f32.mrf.mxu0  ;;  %v542_v4 = vpop.f32.mrf.mxu1  ;;  %v606_v10 = vmax.f32 %v540_v60, 0.0 }
  0xfc   : > { %v593_v5 = vmax.f32 %v487_v63, 0.0  ;;  %v609_v6 = vmax.f32 %v551_v0, 0.0  ;;  %v479_v7 = vadd.f32 %v1328_v24, %v478_v3  ;;  %v543_v8 = vadd.f32 %v1328_v24, %v542_v4 }
  0xfd   : > { %v1127_v11 = vpop.f32.mrf.mxu0  ;;  %v1143_v12 = vpop.f32.mrf.mxu1 }
  0xfe   : > { %v1000_v13 = vpack.c.bf16 %v593_v5, %v592_v1  ;;  %v1040_v14 = vpack.c.bf16 %v609_v6, %v608_v2  ;;  %v591_v15 = vmax.f32 %v479_v7, 0.0  ;;  %v607_v16 = vmax.f32 %v543_v8, 0.0 }
  0xff   : > { %v500_v17 = vadd.f32 %v1127_v11, %v1328_v24  ;;  %v564_v18 = vadd.f32 %v1143_v12, %v1328_v24  ;;  %v491_v19 = vpop.f32.mrf.mxu0  ;;  %v555_v20 = vpop.f32.mrf.mxu1 }
 0x100   : > { %1064 = vst [vmem:[%s1343_s17 + $0x18] sm:$0xff] %v1000_v13   ;;  %1072 = vst [vmem:[%s1343_s17 + $0x58] sm:$0xff] %v1040_v14   ;;  %v995_v21 = vpack.c.bf16 %v591_v15, %v590_v9  ;;  %v1035_v22 = vpack.c.bf16 %v607_v16, %v606_v10  ;;  %v492_v23 = vadd.f32 %v1328_v24, %v491_v19 }
 0x101   : > { %v556_v25 = vadd.f32 %v1328_v24, %v555_v20  ;;  %v1128_v26 = vpop.f32.mrf.mxu0  ;;  %v1144_v27 = vpop.f32.mrf.mxu1  ;;  %v596_v30 = vmax.f32 %v500_v17, 0.0  ;;  %v612_v31 = vmax.f32 %v564_v18, 0.0 }
 0x102   : > { %1063 = vst [vmem:[%s1343_s17 + $0x10] sm:$0xff] %v995_v21   ;;  %1071 = vst [vmem:[%s1343_s17 + $0x50] sm:$0xff] %v1035_v22   ;;  %v503_v28 = vadd.f32 %v1128_v26, %v1328_v24  ;;  %v567_v29 = vadd.f32 %v1144_v27, %v1328_v24  ;;  %v594_v38 = vmax.f32 %v492_v23, 0.0 }
 0x103   : > { %v494_v32 = vpop.f32.mrf.mxu0  ;;  %v558_v33 = vpop.f32.mrf.mxu1  ;;  %v610_v39 = vmax.f32 %v556_v25, 0.0 }
 0x104   : > { %v597_v34 = vmax.f32 %v503_v28, 0.0  ;;  %v613_v35 = vmax.f32 %v567_v29, 0.0  ;;  %v495_v36 = vadd.f32 %v1328_v24, %v494_v32  ;;  %v559_v37 = vadd.f32 %v1328_v24, %v558_v33 }
 0x105   : > { %v1131_v40 = vpop.f32.mrf.mxu0  ;;  %v1147_v41 = vpop.f32.mrf.mxu1 }
 0x106   : > { %v1010_v42 = vpack.c.bf16 %v597_v34, %v596_v30  ;;  %v1050_v43 = vpack.c.bf16 %v613_v35, %v612_v31  ;;  %v595_v44 = vmax.f32 %v495_v36, 0.0  ;;  %v611_v45 = vmax.f32 %v559_v37, 0.0 }
 0x107   : > { %v516_v46 = vadd.f32 %v1131_v40, %v1328_v24  ;;  %v580_v47 = vadd.f32 %v1147_v41, %v1328_v24  ;;  %v507_v48 = vpop.f32.mrf.mxu0  ;;  %v571_v49 = vpop.f32.mrf.mxu1 }
 0x108   : > { %1066 = vst [vmem:[%s1343_s17 + $0x28] sm:$0xff] %v1010_v42   ;;  %1074 = vst [vmem:[%s1343_s17 + $0x68] sm:$0xff] %v1050_v43   ;;  %v1005_v50 = vpack.c.bf16 %v595_v44, %v594_v38  ;;  %v1045_v51 = vpack.c.bf16 %v611_v45, %v610_v39  ;;  %v508_v52 = vadd.f32 %v1328_v24, %v507_v48 }
 0x109   : > { %v572_v53 = vadd.f32 %v1328_v24, %v571_v49  ;;  %v1132_v54 = vpop.f32.mrf.mxu0  ;;  %v1148_v55 = vpop.f32.mrf.mxu1  ;;  %v600_v58 = vmax.f32 %v516_v46, 0.0  ;;  %v616_v59 = vmax.f32 %v580_v47, 0.0 }
 0x10a   : > { %1065 = vst [vmem:[%s1343_s17 + $0x20] sm:$0xff] %v1005_v50   ;;  %1073 = vst [vmem:[%s1343_s17 + $0x60] sm:$0xff] %v1045_v51   ;;  %v519_v56 = vadd.f32 %v1132_v54, %v1328_v24  ;;  %v583_v57 = vadd.f32 %v1148_v55, %v1328_v24  ;;  %v598_v2 = vmax.f32 %v508_v52, 0.0 }
 0x10b   : > { %v510_v60 = vpop.f32.mrf.mxu0  ;;  %v574_v61 = vpop.f32.mrf.mxu1  ;;  %v614_v3 = vmax.f32 %v572_v53, 0.0 }
 0x10c   : > { %v601_v62 = vmax.f32 %v519_v56, 0.0  ;;  %v617_v63 = vmax.f32 %v583_v57, 0.0  ;;  %v511_v0 = vadd.f32 %v1328_v24, %v510_v60  ;;  %v575_v1 = vadd.f32 %v1328_v24, %v574_v61 }
 0x10e   : > { %v1020_v4 = vpack.c.bf16 %v601_v62, %v600_v58  ;;  %v1060_v5 = vpack.c.bf16 %v617_v63, %v616_v59  ;;  %v599_v6 = vmax.f32 %v511_v0, 0.0  ;;  %v615_v7 = vmax.f32 %v575_v1, 0.0 }
 0x110   : > { %1068 = vst [vmem:[%s1343_s17 + $0x38] sm:$0xff] %v1020_v4   ;;  %1076 = vst [vmem:[%s1343_s17 + $0x78] sm:$0xff] %v1060_v5   ;;  %v1015_v8 = vpack.c.bf16 %v599_v6, %v598_v2  ;;  %v1055_v9 = vpack.c.bf16 %v615_v7, %v614_v3 }
 0x112   : > { %1067 = vst [vmem:[%s1343_s17 + $0x30] sm:$0xff] %v1015_v8   ;;  %1075 = vst [vmem:[%s1343_s17 + $0x70] sm:$0xff] %v1055_v9  }
 0x113 PF: > { %s13_s14 = sadd.s32 1, %s1235_s14   ;;  %s1398_s12 = smov %s1231_s13 }
 0x114   : > { %p10_p5 = scmp.ge.s32.totalorder %s13_s14, 4   ;;  %s1399_s13 = smov %s1401_s15 }
 0x116   :  { %12 = sbr.rel (!%p10_p5) target bundleno = 2 (0x2), region = 68 }

// kernel: bottleneck_forward.5
= control target key start
LH: loop header
LB: loop body
LE: loop exit
PB: predicated region body
PF: predicated region fallthrough
CT: control target
= control target key end

     0   :  { %s1227_s15 = smov 0   ;;  %s1229_s16 = smov 0   ;;  %s1450_s0 = inlined_call_operand.vmem [shape: bf16[512,128], index: 0, kind: input, shape index: {}]   ;;  %s1451_s1 = inlined_call_operand.vmem [shape: bf16[128,128], index: 1, kind: input, shape index: {}]   ;;  %s1452_s2 = inlined_call_operand.vmem [shape: f32[1,128], index: 2, kind: input, shape index: {}]   ;;  %s1453_s3 = inlined_call_operand.vmem [shape: bf16[512,128], index: 3, kind: input, shape index: {}]   ;;  %s1454_s4 = inlined_call_operand.vmem [shape: f32[512,128], index: 4, kind: output, shape index: {}]  }
   0x1   :  { %s1231_s17 = smov 0  }
   0x2 LB: > { %s26_s18 = sadd.s32 1, %s1196_s16  ;;  %p929_p0 = scmp.ge.s32.totalorder %s1200_s17, 1  ;;  %s1200_s17 = sphi %s1231_s17, %s14_s17   ;;  %s1196_s16 = sphi %s1229_s16, %s1456_s16   ;;  %s1192_s15 = sphi %s1227_s15, %s1455_s15  }
   0x3   : > { %p28_p1 = scmp.ge.s32.totalorder %s26_s18, 2  ;;  %p210_p2 = scmp.lt.s32.totalorder %s1200_s17, 3 }
   0x5   : > { %s1458_s18 = smov (%p28_p1, %s26_s18), 0  ;;  %p211_p3 = pnand %p929_p0, %p210_p2 }
   0x6   : > { %s930_s21 = sshll.u32 (!%p211_p3), %s1192_s15, 5 }
   0x7   : > { %214 = sbr.rel (%p211_p3) target bundleno = 275 (0x113), region = 36  ;;  %p255_p4 = scmp.lt.s32.totalorder (!%p211_p3), %s930_s21, 63 }
   0xc   : > { %v1154_v0 = vld [vmem:[%s1451_s1 + $0x38] sm:$0xff]   ;;  %v1155_v1 = vld [vmem:[%s1451_s1 + $0x30] sm:$0xff]   ;;  %s1460_s21 = smov (!%p255_p4, %s930_s21), 63  ;;  %v1156_v2 = vld [vmem:[%s1451_s1 + $0x28] sm:$0xff]  }
   0xd   : > { %1066 = vmatprep.subr.bf16.mxu0 %v1154_v0  ;;  %1114 = vmatprep.subr.bf16.mxu1 %v1154_v0  ;;  %s931_s26 = sshll.u32 %s1460_s21, 2  ;;  %v1157_v3 = vld [vmem:[%s1451_s1 + $0x20] sm:$0xff]   ;;  %v1158_v6 = vld [vmem:[%s1451_s1 + $0x18] sm:$0xff]   ;;  %v1159_v7 = vld [vmem:[%s1451_s1 + $0x10] sm:$0xff]   ;;  %s935_s23 = sshll.u32 %s1460_s21, 3 }
   0xe   : > { %1067 = vmatpush3.bf16.msra.mxu0 %v1154_v0  ;;  %1122 = vmatpush3.bf16.msra.mxu1 %v1154_v0  ;;  %s1262_s29 = scalar_lea.vmem %s1450_s0, %s931_s26  ;;  %v1160_v8 = vld [vmem:[%s1451_s1 + $0x8] sm:$0xff]   ;;  %v1161_v9 = vld [vmem:[%s1451_s1] sm:$0xff]   ;;  %s1300_s19 = scalar_lea.vmem %s1453_s3, %s931_s26 }
   0xf   : > { %1068 = vmatprep.subr.bf16.mxu0 %v1155_v1  ;;  %1115 = vmatprep.subr.bf16.mxu1 %v1155_v1  ;;  %v1162_v4 = vld [vmem:[%s1262_s29] sm:$0xff]   ;;  %v1164_v10 = vld [vmem:[%s1262_s29 + $0x8] sm:$0xff]   ;;  %v1166_v12 = vld [vmem:[%s1262_s29 + $0x10] sm:$0xff]   ;;  %s1329_s25 = scalar_lea.vmem %s1454_s4, %s935_s23 }
  0x10   : > { %v1163_v5 = vld [vmem:[%s1262_s29 + $0x40] sm:$0xff]   ;;  %1082 = vmatprep.mubr.bf16.mxu0 %v1162_v4  ;;  %v1165_v11 = vld [vmem:[%s1262_s29 + $0x48] sm:$0xff]   ;;  %v1167_v13 = vld [vmem:[%s1262_s29 + $0x50] sm:$0xff]  }
  0x11   : > { %1098 = vmatprep.mubr.bf16.mxu1 %v1163_v5  ;;  %v1168_v14 = vld [vmem:[%s1262_s29 + $0x18] sm:$0xff]   ;;  %v1170_v16 = vld [vmem:[%s1262_s29 + $0x20] sm:$0xff]   ;;  %v1172_v18 = vld [vmem:[%s1262_s29 + $0x28] sm:$0xff]  }
  0x12   : > { %1069 = vmatpush3.bf16.msra.mxu0 %v1155_v1  ;;  %1123 = vmatpush3.bf16.msra.mxu1 %v1155_v1  ;;  %v1169_v15 = vld [vmem:[%s1262_s29 + $0x58] sm:$0xff]   ;;  %v1171_v17 = vld [vmem:[%s1262_s29 + $0x60] sm:$0xff]   ;;  %v1173_v19 = vld [vmem:[%s1262_s29 + $0x68] sm:$0xff]  }
  0x13   : > { %1070 = vmatprep.subr.bf16.mxu0 %v1156_v2  ;;  %1116 = vmatprep.subr.bf16.mxu1 %v1156_v2  ;;  %v1174_v20 = vld [vmem:[%s1262_s29 + $0x30] sm:$0xff]   ;;  %v1176_v22 = vld [vmem:[%s1262_s29 + $0x38] sm:$0xff]   ;;  %v1027_v24 = vld [vmem:[%s1300_s19 + $0x8] sm:$0xff]  }
  0x14   : > { %v1175_v21 = vld [vmem:[%s1262_s29 + $0x70] sm:$0xff]   ;;  %v1177_v23 = vld [vmem:[%s1262_s29 + $0x78] sm:$0xff]   ;;  %v1035_v25 = vld [vmem:[%s1300_s19 + $0x48] sm:$0xff]   ;;  %v969_v28 = vunpack.c.l.bf16 %v1027_v24  ;;  %v970_v41 = vunpack.c.h.bf16 %v1027_v24 }
  0x15   : > { %v964_v26 = vld [vmem:[%s1300_s19] sm:$0xff]   ;;  %v1001_v29 = vunpack.c.l.bf16 %v1035_v25  ;;  %v1313_v37 = vld [vmem:[%s1300_s19 + $0x18] sm:$0xff]   ;;  %v1002_v42 = vunpack.c.h.bf16 %v1035_v25  ;;  %v1321_v49 = vld [vmem:[%s1300_s19 + $0x10] sm:$0xff]  }
  0x16   : > { %1071 = vmatpush3.bf16.msra.mxu0 %v1156_v2  ;;  %1124 = vmatpush3.bf16.msra.mxu1 %v1156_v2  ;;  %v1034_v27 = vld [vmem:[%s1300_s19 + $0x40] sm:$0xff]   ;;  %v965_v30 = vunpack.c.l.bf16 %v964_v26  ;;  %v1316_v38 = vld [vmem:[%s1300_s19 + $0x58] sm:$0xff]   ;;  %v966_v43 = vunpack.c.h.bf16 %v964_v26  ;;  %v1324_v50 = vld [vmem:[%s1300_s19 + $0x50] sm:$0xff]   ;;  %v977_v53 = vunpack.c.l.bf16 %v1313_v37  ;;  %v973_v63 = vunpack.c.l.bf16 %v1321_v49 }
  0x17   : > { %1072 = vmatprep.subr.bf16.mxu0 %v1157_v3  ;;  %1117 = vmatprep.subr.bf16.mxu1 %v1157_v3  ;;  %v997_v31 = vunpack.c.l.bf16 %v1034_v27  ;;  %v1309_v33 = vld [vmem:[%s1452_s2] ss:$0 sm:$0xff]  ;;  %v998_v44 = vunpack.c.h.bf16 %v1034_v27  ;;  %v1009_v54 = vunpack.c.l.bf16 %v1316_v38  ;;  %v1005_v0 = vunpack.c.l.bf16 %v1324_v50 }
  0x18   : > { %v1358_v27 = vld [vmem:[%s1300_s19 + $0x20] sm:$0xff]  }
  0x1a   : > { %1073 = vmatpush3.bf16.msra.mxu0 %v1157_v3  ;;  %1125 = vmatpush3.bf16.msra.mxu1 %v1157_v3 }
  0x1b   : > { %1074 = vmatprep.subr.bf16.mxu0 %v1158_v6  ;;  %1118 = vmatprep.subr.bf16.mxu1 %v1158_v6 }
  0x1e   : > { %1075 = vmatpush3.bf16.msra.mxu0 %v1158_v6  ;;  %1126 = vmatpush3.bf16.msra.mxu1 %v1158_v6 }
  0x1f   : > { %1076 = vmatprep.subr.bf16.mxu0 %v1159_v7  ;;  %1119 = vmatprep.subr.bf16.mxu1 %v1159_v7 }
  0x22   : > { %1077 = vmatpush3.bf16.msra.mxu0 %v1159_v7  ;;  %1127 = vmatpush3.bf16.msra.mxu1 %v1159_v7 }
  0x23   : > { %1078 = vmatprep.subr.bf16.mxu0 %v1160_v8  ;;  %1120 = vmatprep.subr.bf16.mxu1 %v1160_v8 }
  0x26   : > { %1079 = vmatpush3.bf16.msra.mxu0 %v1160_v8  ;;  %1128 = vmatpush3.bf16.msra.mxu1 %v1160_v8 }
  0x27   : > { %1080 = vmatprep.subr.bf16.mxu0 %v1161_v9  ;;  %1121 = vmatprep.subr.bf16.mxu1 %v1161_v9 }
  0x2a   : > { %1081 = vmatpush3.bf16.msra.mxu0 %v1161_v9  ;;  %1129 = vmatpush3.bf16.msra.mxu1 %v1161_v9  ;;  %v978_v9 = vunpack.c.h.bf16 %v1313_v37 }
  0x2d   : > { %1083 = vmatmul.mubr.bf16.vlgmr.msra.gmra.mxu0 %v1164_v10  ;;  %1099 = vmatmul.mubr.bf16.vlgmr.msra.gmra.mxu1 %v1165_v11  ;;  %v1010_v10 = vunpack.c.h.bf16 %v1316_v38 }
  0x2e   : > { %1086 = vmatprep.mubr.bf16.mxu0 %v1166_v12  ;;  %1102 = vmatprep.mubr.bf16.mxu1 %v1167_v13 }
  0x35   : > { %1087 = vmatmul.mubr.bf16.gmra.mxu0 %v1168_v14  ;;  %1103 = vmatmul.mubr.bf16.gmra.mxu1 %v1169_v15  ;;  %v1348_v15 = vld [vmem:[%s1300_s19 + $0x28] sm:$0xff]  }
  0x36   : > { %1090 = vmatprep.mubr.bf16.mxu0 %v1170_v16  ;;  %1106 = vmatprep.mubr.bf16.mxu1 %v1171_v17  ;;  %v1351_v16 = vld [vmem:[%s1300_s19 + $0x68] sm:$0xff]  }
  0x3d   : > { %1091 = vmatmul.mubr.bf16.gmra.mxu0 %v1172_v18  ;;  %1107 = vmatmul.mubr.bf16.gmra.mxu1 %v1173_v19 }
  0x3e   : > { %1094 = vmatprep.mubr.bf16.mxu0 %v1174_v20  ;;  %1110 = vmatprep.mubr.bf16.mxu1 %v1175_v21  ;;  %v974_v21 = vunpack.c.h.bf16 %v1321_v49 }
  0x45   : > { %1095 = vmatmul.mubr.bf16.gmra.mxu0 %v1176_v22  ;;  %1111 = vmatmul.mubr.bf16.gmra.mxu1 %v1177_v23  ;;  %v1006_v22 = vunpack.c.h.bf16 %v1324_v50 }
  0xed   : > { %v1084_v32 = vpop.f32.mrf.mxu0  ;;  %v1100_v34 = vpop.f32.mrf.mxu1 }
  0xee   : > { %v585_v35 = vadd.f32 %v1084_v32, %v969_v28  ;;  %v649_v36 = vadd.f32 %v1100_v34, %v1001_v29  ;;  %v1361_v28 = vld [vmem:[%s1300_s19 + $0x60] sm:$0xff]   ;;  %v985_v34 = vunpack.c.l.bf16 %v1348_v15 }
  0xef   : > { %v576_v39 = vpop.f32.mrf.mxu0  ;;  %v640_v40 = vpop.f32.mrf.mxu1 }
  0xf0   : > { %v712_v45 = vadd.f32 %v1309_v33, %v585_v35  ;;  %v728_v46 = vadd.f32 %v1309_v33, %v649_v36  ;;  %v577_v47 = vadd.f32 %v965_v30, %v576_v39  ;;  %v641_v48 = vadd.f32 %v997_v31, %v640_v40 }
  0xf1   : > { %v1085_v51 = vpop.f32.mrf.mxu0  ;;  %v1101_v52 = vpop.f32.mrf.mxu1  ;;  %v1017_v35 = vunpack.c.l.bf16 %v1351_v16 }
  0xf2   : > { %v744_v55 = vmax.f32 %v712_v45, 0.0  ;;  %v760_v56 = vmax.f32 %v728_v46, 0.0  ;;  %v710_v57 = vadd.f32 %v1309_v33, %v577_v47  ;;  %v726_v58 = vadd.f32 %v1309_v33, %v641_v48 }
  0xf3   : > { %v588_v59 = vadd.f32 %v1085_v51, %v970_v41  ;;  %v652_v60 = vadd.f32 %v1101_v52, %v1002_v42  ;;  %v579_v61 = vpop.f32.mrf.mxu0  ;;  %v643_v62 = vpop.f32.mrf.mxu1  ;;  %v1013_v45 = vunpack.c.l.bf16 %v1361_v28 }
  0xf4   : > { %776 = vst [vmem:[%s1329_s25 + $0x10] sm:$0xff] %v744_v55  ;;  %792 = vst [vmem:[%s1329_s25 + $0x90] sm:$0xff] %v760_v56  ;;  %v742_v1 = vmax.f32 %v710_v57, 0.0  ;;  %v758_v2 = vmax.f32 %v726_v58, 0.0  ;;  %v580_v3 = vadd.f32 %v966_v43, %v579_v61  ;;  %v644_v4 = vadd.f32 %v998_v44, %v643_v62  ;;  %v1385_v61 = vld [vmem:[%s1300_s19 + $0x78] sm:$0xff]  }
  0xf5   : > { %v713_v5 = vadd.f32 %v1309_v33, %v588_v59  ;;  %v729_v6 = vadd.f32 %v1309_v33, %v652_v60  ;;  %v1088_v7 = vpop.f32.mrf.mxu0  ;;  %v1104_v8 = vpop.f32.mrf.mxu1  ;;  %v981_v44 = vunpack.c.l.bf16 %v1358_v27  ;;  %v1018_v55 = vunpack.c.h.bf16 %v1351_v16  ;;  %v1382_v60 = vld [vmem:[%s1300_s19 + $0x38] sm:$0xff]  }
  0xf6   : > { %774 = vst [vmem:[%s1329_s25] sm:$0xff] %v742_v1  ;;  %790 = vst [vmem:[%s1329_s25 + $0x80] sm:$0xff] %v758_v2  ;;  %v711_v11 = vadd.f32 %v1309_v33, %v580_v3  ;;  %v727_v12 = vadd.f32 %v1309_v33, %v644_v4  ;;  %v601_v13 = vadd.f32 %v1088_v7, %v977_v53  ;;  %v982_v2 = vunpack.c.h.bf16 %v1358_v27 }
  0xf7   : > { %v665_v14 = vadd.f32 %v1104_v8, %v1009_v54  ;;  %v745_v17 = vmax.f32 %v713_v5, 0.0  ;;  %v761_v18 = vmax.f32 %v729_v6, 0.0  ;;  %v592_v19 = vpop.f32.mrf.mxu0  ;;  %v656_v20 = vpop.f32.mrf.mxu1  ;;  %v986_v54 = vunpack.c.h.bf16 %v1348_v15  ;;  %v1394_v8 = vld [vmem:[%s1300_s19 + $0x30] sm:$0xff]  }
  0xf8   : > { %v743_v23 = vmax.f32 %v711_v11, 0.0  ;;  %v759_v24 = vmax.f32 %v727_v12, 0.0  ;;  %v716_v25 = vadd.f32 %v1309_v33, %v601_v13  ;;  %v593_v29 = vadd.f32 %v973_v63, %v592_v19 }
  0xf9   : > { %v732_v26 = vadd.f32 %v1309_v33, %v665_v14  ;;  %777 = vst [vmem:[%s1329_s25 + $0x18] sm:$0xff] %v745_v17  ;;  %793 = vst [vmem:[%s1329_s25 + $0x98] sm:$0xff] %v761_v18  ;;  %v657_v30 = vadd.f32 %v1005_v0, %v656_v20  ;;  %v1089_v31 = vpop.f32.mrf.mxu0  ;;  %v1105_v32 = vpop.f32.mrf.mxu1  ;;  %v1014_v3 = vunpack.c.h.bf16 %v1361_v28  ;;  %v993_v14 = vunpack.c.l.bf16 %v1382_v60 }
  0xfa   : > { %775 = vst [vmem:[%s1329_s25 + $0x8] sm:$0xff] %v743_v23  ;;  %791 = vst [vmem:[%s1329_s25 + $0x88] sm:$0xff] %v759_v24  ;;  %v748_v36 = vmax.f32 %v716_v25, 0.0  ;;  %v604_v38 = vadd.f32 %v1089_v31, %v978_v9  ;;  %v668_v39 = vadd.f32 %v1105_v32, %v1010_v10  ;;  %v714_v40 = vadd.f32 %v1309_v33, %v593_v29  ;;  %v1397_v9 = vld [vmem:[%s1300_s19 + $0x70] sm:$0xff]  }
  0xfb   : > { %v764_v37 = vmax.f32 %v732_v26, 0.0  ;;  %v730_v41 = vadd.f32 %v1309_v33, %v657_v30  ;;  %v595_v42 = vpop.f32.mrf.mxu0  ;;  %v659_v43 = vpop.f32.mrf.mxu1  ;;  %v1025_v15 = vunpack.c.l.bf16 %v1385_v61  ;;  %v989_v24 = vunpack.c.l.bf16 %v1394_v8 }
  0xfc   : > { %780 = vst [vmem:[%s1329_s25 + $0x30] sm:$0xff] %v748_v36  ;;  %v717_v46 = vadd.f32 %v1309_v33, %v604_v38  ;;  %v733_v47 = vadd.f32 %v1309_v33, %v668_v39  ;;  %v596_v48 = vadd.f32 %v974_v21, %v595_v42  ;;  %v660_v49 = vadd.f32 %v1006_v22, %v659_v43 }
  0xfd   : > { %796 = vst [vmem:[%s1329_s25 + $0xb0] sm:$0xff] %v764_v37  ;;  %v746_v50 = vmax.f32 %v714_v40, 0.0  ;;  %v762_v51 = vmax.f32 %v730_v41, 0.0  ;;  %v1092_v52 = vpop.f32.mrf.mxu0  ;;  %v1108_v53 = vpop.f32.mrf.mxu1  ;;  %v1021_v25 = vunpack.c.l.bf16 %v1397_v9  ;;  %v1026_v36 = vunpack.c.h.bf16 %v1385_v61 }
  0xfe   : > { %v749_v56 = vmax.f32 %v717_v46, 0.0  ;;  %v765_v57 = vmax.f32 %v733_v47, 0.0  ;;  %v715_v58 = vadd.f32 %v1309_v33, %v596_v48  ;;  %v731_v59 = vadd.f32 %v1309_v33, %v660_v49 }
  0xff   : > { %778 = vst [vmem:[%s1329_s25 + $0x20] sm:$0xff] %v746_v50  ;;  %794 = vst [vmem:[%s1329_s25 + $0xa0] sm:$0xff] %v762_v51  ;;  %v617_v62 = vadd.f32 %v1092_v52, %v985_v34  ;;  %v681_v63 = vadd.f32 %v1108_v53, %v1017_v35  ;;  %v608_v0 = vpop.f32.mrf.mxu0  ;;  %v672_v1 = vpop.f32.mrf.mxu1  ;;  %v994_v35 = vunpack.c.h.bf16 %v1382_v60  ;;  %v1022_v46 = vunpack.c.h.bf16 %v1397_v9 }
 0x100   : > { %781 = vst [vmem:[%s1329_s25 + $0x38] sm:$0xff] %v749_v56  ;;  %797 = vst [vmem:[%s1329_s25 + $0xb8] sm:$0xff] %v765_v57  ;;  %v747_v4 = vmax.f32 %v715_v58, 0.0  ;;  %v763_v5 = vmax.f32 %v731_v59, 0.0  ;;  %v609_v6 = vadd.f32 %v981_v44, %v608_v0  ;;  %v673_v7 = vadd.f32 %v1013_v45, %v672_v1 }
 0x101   : > { %v720_v10 = vadd.f32 %v1309_v33, %v617_v62  ;;  %v736_v11 = vadd.f32 %v1309_v33, %v681_v63  ;;  %v1093_v12 = vpop.f32.mrf.mxu0  ;;  %v1109_v13 = vpop.f32.mrf.mxu1  ;;  %v990_v45 = vunpack.c.h.bf16 %v1394_v8 }
 0x102   : > { %779 = vst [vmem:[%s1329_s25 + $0x28] sm:$0xff] %v747_v4  ;;  %795 = vst [vmem:[%s1329_s25 + $0xa8] sm:$0xff] %v763_v5  ;;  %v718_v16 = vadd.f32 %v1309_v33, %v609_v6  ;;  %v734_v17 = vadd.f32 %v1309_v33, %v673_v7  ;;  %v620_v18 = vadd.f32 %v1093_v12, %v986_v54 }
 0x103   : > { %v684_v19 = vadd.f32 %v1109_v13, %v1018_v55  ;;  %v752_v20 = vmax.f32 %v720_v10, 0.0  ;;  %v768_v21 = vmax.f32 %v736_v11, 0.0  ;;  %v611_v22 = vpop.f32.mrf.mxu0  ;;  %v675_v23 = vpop.f32.mrf.mxu1 }
 0x104   : > { %v750_v26 = vmax.f32 %v718_v16, 0.0  ;;  %v766_v27 = vmax.f32 %v734_v17, 0.0  ;;  %v721_v28 = vadd.f32 %v1309_v33, %v620_v18  ;;  %v612_v30 = vadd.f32 %v982_v2, %v611_v22 }
 0x105   : > { %v737_v29 = vadd.f32 %v1309_v33, %v684_v19  ;;  %784 = vst [vmem:[%s1329_s25 + $0x50] sm:$0xff] %v752_v20  ;;  %800 = vst [vmem:[%s1329_s25 + $0xd0] sm:$0xff] %v768_v21  ;;  %v676_v31 = vadd.f32 %v1014_v3, %v675_v23  ;;  %v1096_v32 = vpop.f32.mrf.mxu0  ;;  %v1112_v34 = vpop.f32.mrf.mxu1 }
 0x106   : > { %782 = vst [vmem:[%s1329_s25 + $0x40] sm:$0xff] %v750_v26  ;;  %798 = vst [vmem:[%s1329_s25 + $0xc0] sm:$0xff] %v766_v27  ;;  %v753_v37 = vmax.f32 %v721_v28, 0.0  ;;  %v633_v39 = vadd.f32 %v1096_v32, %v993_v14  ;;  %v697_v40 = vadd.f32 %v1112_v34, %v1025_v15  ;;  %v719_v41 = vadd.f32 %v1309_v33, %v612_v30 }
 0x107   : > { %v769_v38 = vmax.f32 %v737_v29, 0.0  ;;  %v735_v42 = vadd.f32 %v1309_v33, %v676_v31  ;;  %v624_v43 = vpop.f32.mrf.mxu0  ;;  %v688_v44 = vpop.f32.mrf.mxu1 }
 0x108   : > { %785 = vst [vmem:[%s1329_s25 + $0x58] sm:$0xff] %v753_v37  ;;  %v724_v47 = vadd.f32 %v1309_v33, %v633_v39  ;;  %v740_v48 = vadd.f32 %v1309_v33, %v697_v40  ;;  %v625_v49 = vadd.f32 %v989_v24, %v624_v43  ;;  %v689_v50 = vadd.f32 %v1021_v25, %v688_v44 }
 0x109   : > { %801 = vst [vmem:[%s1329_s25 + $0xd8] sm:$0xff] %v769_v38  ;;  %v751_v51 = vmax.f32 %v719_v41, 0.0  ;;  %v767_v52 = vmax.f32 %v735_v42, 0.0  ;;  %v1097_v53 = vpop.f32.mrf.mxu0  ;;  %v1113_v54 = vpop.f32.mrf.mxu1 }
 0x10a   : > { %v756_v55 = vmax.f32 %v724_v47, 0.0  ;;  %v772_v56 = vmax.f32 %v740_v48, 0.0  ;;  %v722_v57 = vadd.f32 %v1309_v33, %v625_v49  ;;  %v738_v58 = vadd.f32 %v1309_v33, %v689_v50 }
 0x10b   : > { %783 = vst [vmem:[%s1329_s25 + $0x48] sm:$0xff] %v751_v51  ;;  %799 = vst [vmem:[%s1329_s25 + $0xc8] sm:$0xff] %v767_v52  ;;  %v636_v59 = vadd.f32 %v1097_v53, %v994_v35  ;;  %v700_v60 = vadd.f32 %v1113_v54, %v1026_v36  ;;  %v627_v61 = vpop.f32.mrf.mxu0  ;;  %v691_v62 = vpop.f32.mrf.mxu1 }
 0x10c   : > { %788 = vst [vmem:[%s1329_s25 + $0x70] sm:$0xff] %v756_v55  ;;  %804 = vst [vmem:[%s1329_s25 + $0xf0] sm:$0xff] %v772_v56  ;;  %v754_v63 = vmax.f32 %v722_v57, 0.0  ;;  %v770_v0 = vmax.f32 %v738_v58, 0.0  ;;  %v628_v1 = vadd.f32 %v990_v45, %v627_v61  ;;  %v692_v2 = vadd.f32 %v1022_v46, %v691_v62 }
 0x10d   : > { %v725_v3 = vadd.f32 %v1309_v33, %v636_v59  ;;  %v741_v4 = vadd.f32 %v1309_v33, %v700_v60 }
 0x10e   : > { %786 = vst [vmem:[%s1329_s25 + $0x60] sm:$0xff] %v754_v63  ;;  %802 = vst [vmem:[%s1329_s25 + $0xe0] sm:$0xff] %v770_v0  ;;  %v723_v5 = vadd.f32 %v1309_v33, %v628_v1  ;;  %v739_v6 = vadd.f32 %v1309_v33, %v692_v2 }
 0x10f   : > { %v757_v7 = vmax.f32 %v725_v3, 0.0  ;;  %v773_v8 = vmax.f32 %v741_v4, 0.0 }
 0x110   : > { %v755_v9 = vmax.f32 %v723_v5, 0.0  ;;  %v771_v10 = vmax.f32 %v739_v6, 0.0 }
 0x111   : > { %789 = vst [vmem:[%s1329_s25 + $0x78] sm:$0xff] %v757_v7  ;;  %805 = vst [vmem:[%s1329_s25 + $0xf8] sm:$0xff] %v773_v8 }
 0x112   : > { %787 = vst [vmem:[%s1329_s25 + $0x68] sm:$0xff] %v755_v9  ;;  %803 = vst [vmem:[%s1329_s25 + $0xe8] sm:$0xff] %v771_v10 }
 0x113 PF: > { %s14_s17 = sadd.s32 1, %s1200_s17   ;;  %s1455_s15 = smov %s1196_s16 }
 0x114   : > { %p11_p5 = scmp.ge.s32.totalorder %s14_s17, 4   ;;  %s1456_s16 = smov %s1458_s18 }
 0x116   :  { %13 = sbr.rel (!%p11_p5) target bundleno = 2 (0x2), region = 75 }

// kernel: bottleneck_forward.4
= control target key start
LH: loop header
LB: loop body
LE: loop exit
PB: predicated region body
PF: predicated region fallthrough
CT: control target
= control target key end

     0   :  { %s6851_s12 = smov 0   ;;  %s6853_s13 = smov 0   ;;  %s9534_s0 = inlined_call_operand.vmem [shape: bf16[2,18,18,128], index: 0, kind: input, shape index: {}]   ;;  %s9535_s1 = inlined_call_operand.vmem [shape: bf16[1152,128], index: 1, kind: input, shape index: {}]   ;;  %s9536_s2 = inlined_call_operand.vmem [shape: f32[1,128], index: 2, kind: input, shape index: {}]   ;;  %s9537_s3 = inlined_call_operand.vmem [shape: bf16[2,16,16,128], index: 3, kind: output, shape index: {}]  }
   0x1   :  { %s6855_s14 = smov 0  }
   0x2 LB: > { %s25_s15 = sadd.s32 1, %s6825_s13  ;;  %p5366_p0 = scmp.ge.s32.totalorder %s6829_s14, 1  ;;  %s6829_s14 = sphi %s6855_s14, %s13_s14   ;;  %s6825_s13 = sphi %s6853_s13, %s9730_s13   ;;  %s6821_s12 = sphi %s6851_s12, %s9729_s12  }
   0x3   : > { %p27_p1 = scmp.ge.s32.totalorder %s25_s15, 2  ;;  %p168_p2 = scmp.lt.s32.totalorder %s6829_s14, 3 }
   0x5   : > { %s9732_s15 = smov (%p27_p1, %s25_s15), 0  ;;  %p169_p3 = pnand %p5366_p0, %p168_p2 }
   0x7   : > { %172 = sbr.rel (%p169_p3) target bundleno = 559 (0x22f), region = 32 }
   0xc   : > { %v6678_v0 = vld [vmem:[%s9535_s1 + $0x78] sm:$0xff]   ;;  %p202_p4 = scmp.lt.s32.totalorder %s6821_s12, 1  ;;  %v6679_v1 = vld [vmem:[%s9535_s1 + $0x70] sm:$0xff]   ;;  %v6680_v2 = vld [vmem:[%s9535_s1 + $0x68] sm:$0xff]   ;;  %vm287_vm0 = vsmask.f32 3328 }
   0xd   : > { %6205 = vmatprep.subr.bf16.mxu0 %v6678_v0  ;;  %6637 = vmatprep.subr.bf16.mxu1 %v6678_v0  ;;  %v6681_v3 = vld [vmem:[%s9535_s1 + $0x60] sm:$0xff]   ;;  %vm288_vm1 = vsmask.f32 7440  ;;  %v6682_v17 = vld [vmem:[%s9535_s1 + $0x58] sm:$0xff]   ;;  %v6683_v33 = vld [vmem:[%s9535_s1 + $0x50] sm:$0xff]   ;;  %vm1316_vm3 = vcmask 1042432  }
   0xe   : > { %s9734_s12 = smov (!%p202_p4, %s6821_s12), 1  ;;  %6206 = vmatpush3.bf16.msra.mxu0 %v6678_v0  ;;  %6645 = vmatpush3.bf16.msra.mxu1 %v6678_v0  ;;  %vm6915_vm2 = vmor %vm287_vm0, %vm288_vm1  ;;  %v6684_v58 = vld [vmem:[%s9535_s1 + $0x48] sm:$0xff]   ;;  %vm1317_vm4 = vcmask 1046532  }
   0xf   : > { %6207 = vmatprep.subr.bf16.mxu0 %v6679_v1  ;;  %6638 = vmatprep.subr.bf16.mxu1 %v6679_v1  ;;  %s6653_s22 = smul.u32 216, %s9734_s12  ;;  %vm7226_vm5 = vmor %vm1316_vm3, %vm1317_vm4  ;;  %s5861_s6 = sshll.u32 %s9734_s12, 7 }
  0x10   : > { %s9431_s8 = scalar_lea.vmem %s9537_s3, %s5861_s6 }
  0x11   : > { %s6884_s25 = scalar_lea.vmem %s9534_s0, %s6653_s22 }
  0x12   : > { %6208 = vmatpush3.bf16.msra.mxu0 %v6679_v1  ;;  %6646 = vmatpush3.bf16.msra.mxu1 %v6679_v1  ;;  %v6890_v4 = vld [vmem:[%s6884_s25] sm:$0xf]  ;;  %v6893_v5 = vld [vmem:[%s6884_s25 + $0x4] sm:$0xf]  ;;  %v6896_v6 = vld [vmem:[%s6884_s25 + $0x8] sm:$0x1] }
  0x13   : > { %6209 = vmatprep.subr.bf16.mxu0 %v6680_v2  ;;  %6639 = vmatprep.subr.bf16.mxu1 %v6680_v2  ;;  %v291_v7 = vshrl.u32 %v6890_v4, 16  ;;  %v294_v8 = vshll.u32 %v6890_v4, 16  ;;  %v300_v9 = vshll.u32 %v6893_v5, 16  ;;  %v304_v10 = vshrl.u32 %v6893_v5, 16  ;;  %v239_v12 = vld [vmem:[%s6884_s25 + $0x60] sm:$0xf] }
  0x14   : > { %v310_v11 = vshll.u32 %v6896_v6, 16  ;;  %v240_v15 = vld [vmem:[%s6884_s25 + $0x64] sm:$0xf]  ;;  %v279_v16 = vld [vmem:[%s6884_s25 + $0x68] sm:$0x1]  ;;  %v483_v21 = vshrl.u32 %v239_v12, 16 }
  0x15   : > { %v293_v13 = vrot.slane %v291_v7, 4  ;;  %v296_v14 = vrot.slane %v294_v8, 5  ;;  %v302_v18 = vrot.slane %v300_v9, 5  ;;  %v306_v19 = vrot.slane %v304_v10, 4  ;;  %v6911_v26 = vld [vmem:[%s6884_s25 + $0xc] sm:$0xf] }
  0x16   : > { %6210 = vmatpush3.bf16.msra.mxu0 %v6680_v2  ;;  %6647 = vmatpush3.bf16.msra.mxu1 %v6680_v2  ;;  %v486_v23 = vshll.u32 %v239_v12, 16  ;;  %v492_v24 = vshll.u32 %v240_v15, 16  ;;  %v496_v25 = vshrl.u32 %v240_v15, 16  ;;  %v312_v29 = vrot.slane %v310_v11, 5  ;;  %v6920_v32 = vld [vmem:[%s6884_s25 + $0x10] sm:$0xf] }
  0x17   : > { %6211 = vmatprep.subr.bf16.mxu0 %v6681_v3  ;;  %6640 = vmatprep.subr.bf16.mxu1 %v6681_v3  ;;  %v297_v22 = vor.u32 %v296_v14, %v293_v13  ;;  %v307_v28 = vor.u32 %v306_v19, %v302_v18  ;;  %v485_v30 = vrot.slane %v483_v21, 4  ;;  %v502_v31 = vshll.u32 %v279_v16, 16  ;;  %v6926_v40 = vld [vmem:[%s6884_s25 + $0x14] sm:$0x1]  ;;  %v241_v47 = vld [vmem:[%s6884_s25 + $0x6c] sm:$0xf] }
  0x18   : > { %v488_v35 = vrot.slane %v486_v23, 5  ;;  %v494_v36 = vrot.slane %v492_v24, 5  ;;  %v498_v37 = vrot.slane %v496_v25, 4  ;;  %v315_v41 = vshrl.u32 %v6911_v26, 16  ;;  %v242_v52 = vld [vmem:[%s6884_s25 + $0x70] sm:$0xf] }
  0x19   : > { %v298_v34 = vrot.slane %v297_v22, 4  ;;  %v308_v38 = vrot.slane %v307_v28, 4  ;;  %v504_v39 = vrot.slane %v502_v31, 5  ;;  %v318_v42 = vshll.u32 %v6911_v26, 16  ;;  %v280_v57 = vld [vmem:[%s6884_s25 + $0x74] sm:$0x1] }
  0x1a   : > { %6212 = vmatpush3.bf16.msra.mxu0 %v6681_v3  ;;  %6648 = vmatpush3.bf16.msra.mxu1 %v6681_v3  ;;  %v489_v44 = vor.u32 %v488_v35, %v485_v30  ;;  %v499_v45 = vor.u32 %v498_v37, %v494_v36  ;;  %v324_v46 = vshll.u32 %v6920_v32, 16  ;;  %v317_v49 = vrot.slane %v315_v41, 4  ;;  %v6949_v14 = vld [vmem:[%s6884_s25 + $0x18] sm:$0xf]  ;;  %v6685_v15 = vld [vmem:[%s9535_s1 + $0x40] sm:$0xff]  }
  0x1b   : > { %6213 = vmatprep.subr.bf16.mxu0 %v6682_v17  ;;  %6641 = vmatprep.subr.bf16.mxu1 %v6682_v17  ;;  %v303_v43 = vsel %vm6915_vm2, %v298_v34, %v302_v18  ;;  %v313_v48 = vsel %vm6915_vm2, %v308_v38, %v312_v29  ;;  %v320_v50 = vrot.slane %v318_v42, 5  ;;  %v328_v51 = vshrl.u32 %v6920_v32, 16  ;;  %v6957_v19 = vld [vmem:[%s6884_s25 + $0x1c] sm:$0xf]  ;;  %v6962_v25 = vld [vmem:[%s6884_s25 + $0x20] sm:$0x1] }
  0x1c   : > { %v5370_v53 = vcombine.low %v303_v43, %v313_v48  ;;  %v490_v54 = vrot.slane %v489_v44, 4  ;;  %v500_v55 = vrot.slane %v499_v45, 4  ;;  %v326_v56 = vrot.slane %v324_v46, 5  ;;  %v243_v34 = vld [vmem:[%s6884_s25 + $0x78] sm:$0xf] }
  0x1d   : > { %v321_v59 = vor.u32 %v320_v50, %v317_v49  ;;  %v330_v60 = vrot.slane %v328_v51, 4  ;;  %v334_v61 = vshll.u32 %v6926_v40, 16  ;;  %v507_v1 = vshrl.u32 %v241_v47, 16  ;;  %v6686_v41 = vld [vmem:[%s9535_s1 + $0x38] sm:$0xff]   ;;  %v281_v49 = vld [vmem:[%s6884_s25 + $0x80] sm:$0x1] }
  0x1e   : > { %6214 = vmatpush3.bf16.msra.mxu0 %v6682_v17  ;;  %6649 = vmatpush3.bf16.msra.mxu1 %v6682_v17  ;;  %v495_v63 = vsel %vm6915_vm2, %v490_v54, %v494_v36  ;;  %v505_v0 = vsel %vm6915_vm2, %v500_v55, %v504_v39  ;;  %v510_v2 = vshll.u32 %v241_v47, 16  ;;  %v516_v12 = vshll.u32 %v242_v52, 16  ;;  %v6971_v39 = vld [vmem:[%s6884_s25 + $0x7c] sm:$0xf] }
  0x1f   : > { %6215 = vmatprep.subr.bf16.mxu0 %v6683_v33  ;;  %6642 = vmatprep.subr.bf16.mxu1 %v6683_v33  ;;  %v5378_v3 = vcombine.low %v495_v63, %v505_v0  ;;  %v322_v7 = vrot.slane %v321_v59, 4  ;;  %v331_v8 = vor.u32 %v330_v60, %v326_v56  ;;  %v336_v9 = vrot.slane %v334_v61, 5  ;;  %v6687_v42 = vld [vmem:[%s9535_s1 + $0xb8] sm:$0xff]   ;;  %v6689_v59 = vld [vmem:[%s9535_s1 + $0xb0] sm:$0xff]   ;;  %v6998_v0 = vld [vmem:[%s6884_s25 + $0x28] sm:$0xf] }
  0x20   : > { %6221 = vmatprep.mubr.bf16.mxu0 %v5370_v53  ;;  %v509_v10 = vrot.slane %v507_v1, 4  ;;  %v512_v11 = vrot.slane %v510_v2, 5  ;;  %v520_v13 = vshrl.u32 %v242_v52, 16  ;;  %v526_v18 = vshll.u32 %v280_v57, 16  ;;  %v6688_v52 = vld [vmem:[%s9535_s1 + $0x30] sm:$0xff]  }
  0x21   : > { %v327_v16 = vsel %vm6915_vm2, %v322_v7, %v326_v56  ;;  %v332_v17 = vrot.slane %v331_v8, 4  ;;  %6237 = vmatprep.mubr.bf16.mxu1 %v5378_v3  ;;  %v518_v23 = vrot.slane %v516_v12, 5  ;;  %v339_v28 = vshrl.u32 %v6949_v14, 16  ;;  %v6989_v57 = vld [vmem:[%s6884_s25 + $0x24] sm:$0xf] }
  0x22   : > { %6216 = vmatpush3.bf16.msra.mxu0 %v6683_v33  ;;  %6650 = vmatpush3.bf16.msra.mxu1 %v6683_v33  ;;  %v513_v22 = vor.u32 %v512_v11, %v509_v10  ;;  %v522_v24 = vrot.slane %v520_v13, 4  ;;  %v528_v30 = vrot.slane %v526_v18, 5  ;;  %v342_v31 = vshll.u32 %v6949_v14, 16  ;;  %v7001_v8 = vld [vmem:[%s6884_s25 + $0x2c] sm:$0x1] }
  0x23   : > { %6217 = vmatprep.subr.bf16.mxu0 %v6684_v58  ;;  %6643 = vmatprep.subr.bf16.mxu1 %v6684_v58  ;;  %v337_v29 = vsel %vm6915_vm2, %v332_v17, %v336_v9  ;;  %v348_v33 = vshll.u32 %v6957_v19, 16  ;;  %v341_v38 = vrot.slane %v339_v28, 4  ;;  %v352_v45 = vshrl.u32 %v6957_v19, 16  ;;  %v7005_v13 = vld [vmem:[%s6884_s25 + $0x84] sm:$0xf] }
  0x24   : > { %v5371_v35 = vcombine.low %v327_v16, %v337_v29  ;;  %v514_v36 = vrot.slane %v513_v22, 4  ;;  %v523_v37 = vor.u32 %v522_v24, %v518_v23  ;;  %v344_v43 = vrot.slane %v342_v31, 5  ;;  %v7012_v22 = vld [vmem:[%s6884_s25 + $0x88] sm:$0xf] }
  0x25   : > { %v350_v44 = vrot.slane %v348_v33, 5  ;;  %v358_v46 = vshll.u32 %v6962_v25, 16  ;;  %v531_v50 = vshrl.u32 %v243_v34, 16  ;;  %v534_v51 = vshll.u32 %v243_v34, 16 }
  0x26   : > { %6218 = vmatpush3.bf16.msra.mxu0 %v6684_v58  ;;  %6651 = vmatpush3.bf16.msra.mxu1 %v6684_v58  ;;  %v519_v47 = vsel %vm6915_vm2, %v514_v36, %v518_v23  ;;  %v524_v48 = vrot.slane %v523_v37, 4  ;;  %v345_v53 = vor.u32 %v344_v43, %v341_v38  ;;  %v354_v54 = vrot.slane %v352_v45, 4  ;;  %v7021_v36 = vld [vmem:[%s6884_s25 + $0x8c] sm:$0x1] }
  0x27   : > { %6219 = vmatprep.subr.bf16.mxu0 %v6685_v15  ;;  %6644 = vmatprep.subr.bf16.mxu1 %v6685_v15  ;;  %v360_v55 = vrot.slane %v358_v46, 5  ;;  %v540_v56 = vshll.u32 %v6971_v39, 16  ;;  %v533_v60 = vrot.slane %v531_v50, 4  ;;  %v536_v61 = vrot.slane %v534_v51, 5  ;;  %v6691_v37 = vld [vmem:[%s9535_s1 + $0xa8] sm:$0xff]  }
  0x28   : > { %v529_v58 = vsel %vm6915_vm2, %v524_v48, %v528_v30  ;;  %v544_v63 = vshrl.u32 %v6971_v39, 16  ;;  %v346_v2 = vrot.slane %v345_v53, 4  ;;  %v355_v3 = vor.u32 %v354_v54, %v350_v44  ;;  %v6690_v30 = vld [vmem:[%s9535_s1 + $0x28] sm:$0xff]   ;;  %v7036_v53 = vld [vmem:[%s6884_s25 + $0x30] sm:$0xf] }
  0x29   : > { %v5379_v1 = vcombine.low %v519_v47, %v529_v58  ;;  %v542_v7 = vrot.slane %v540_v56, 5  ;;  %v537_v9 = vor.u32 %v536_v61, %v533_v60  ;;  %v550_v11 = vshll.u32 %v281_v49, 16  ;;  %v7045_v60 = vld [vmem:[%s6884_s25 + $0x34] sm:$0xf] }
  0x2a   : > { %6220 = vmatpush3.bf16.msra.mxu0 %v6685_v15  ;;  %6652 = vmatpush3.bf16.msra.mxu1 %v6685_v15  ;;  %v546_v10 = vrot.slane %v544_v63, 4  ;;  %v363_v12 = vshrl.u32 %v6989_v57, 16  ;;  %v351_v15 = vsel %vm6915_vm2, %v346_v2, %v350_v44  ;;  %v356_v16 = vrot.slane %v355_v3, 4 }
  0x2b   : > { %6253 = vmatprep.subr.bf16.mxu1 %v6686_v41  ;;  %6301 = vmatprep.subr.bf16.mxu0 %v6687_v42  ;;  %v366_v17 = vshll.u32 %v6989_v57, 16  ;;  %v372_v18 = vshll.u32 %v6998_v0, 16  ;;  %v538_v23 = vrot.slane %v537_v9, 4  ;;  %v552_v28 = vrot.slane %v550_v11, 5 }
  0x2c   : > { %v547_v24 = vor.u32 %v546_v10, %v542_v7  ;;  %v365_v29 = vrot.slane %v363_v12, 4  ;;  %v361_v31 = vsel %vm6915_vm2, %v356_v16, %v360_v55  ;;  %v382_v43 = vshll.u32 %v7001_v8, 16  ;;  %v7053_v16 = vld [vmem:[%s6884_s25 + $0x38] sm:$0x1] }
  0x2d   : > { %6222 = vmatmul.mubr.bf16.vlgmr.msra.gmra.mxu0 %v5371_v35  ;;  %6238 = vmatmul.mubr.bf16.vlgmr.msra.gmra.mxu1 %v5379_v1  ;;  %v368_v33 = vrot.slane %v366_v17, 5  ;;  %v374_v34 = vrot.slane %v372_v18, 5  ;;  %v376_v35 = vshrl.u32 %v6998_v0, 16  ;;  %v5372_v38 = vcombine.low %v351_v15, %v361_v31  ;;  %v7057_v18 = vld [vmem:[%s6884_s25 + $0x90] sm:$0xf] }
  0x2e   : > { %6254 = vmatpush3.bf16.msra.mxu1 %v6686_v41  ;;  %6302 = vmatpush3.bf16.msra.mxu0 %v6687_v42  ;;  %v543_v41 = vsel %vm6915_vm2, %v538_v23, %v542_v7  ;;  %v548_v42 = vrot.slane %v547_v24, 4  ;;  %v555_v46 = vshrl.u32 %v7005_v13, 16  ;;  %v558_v47 = vshll.u32 %v7005_v13, 16  ;;  %v7063_v31 = vld [vmem:[%s6884_s25 + $0x94] sm:$0xf] }
  0x2f   : > { %6255 = vmatprep.subr.bf16.mxu1 %v6688_v52  ;;  %6303 = vmatprep.subr.bf16.mxu0 %v6689_v59  ;;  %v369_v44 = vor.u32 %v368_v33, %v365_v29  ;;  %v378_v45 = vrot.slane %v376_v35, 4  ;;  %v384_v49 = vrot.slane %v382_v43, 5  ;;  %v564_v50 = vshll.u32 %v7012_v22, 16 }
  0x30   : > { %v553_v48 = vsel %vm6915_vm2, %v548_v42, %v552_v28  ;;  %v568_v51 = vshrl.u32 %v7012_v22, 16  ;;  %6225 = vmatprep.mubr.bf16.mxu0 %v5372_v38  ;;  %v557_v58 = vrot.slane %v555_v46, 4  ;;  %v560_v61 = vrot.slane %v558_v47, 5  ;;  %v6695_v38 = vld [vmem:[%s9535_s1 + $0x98] sm:$0xff]   ;;  %v6696_v46 = vld [vmem:[%s9535_s1 + $0x10] sm:$0xff]  }
  0x31   : > { %v5380_v54 = vcombine.low %v543_v41, %v553_v48  ;;  %v370_v55 = vrot.slane %v369_v44, 4  ;;  %v379_v56 = vor.u32 %v378_v45, %v374_v34  ;;  %v566_v63 = vrot.slane %v564_v50, 5  ;;  %v7073_v44 = vld [vmem:[%s6884_s25 + $0x98] sm:$0x1] }
  0x32   : > { %6256 = vmatpush3.bf16.msra.mxu1 %v6688_v52  ;;  %6304 = vmatpush3.bf16.msra.mxu0 %v6689_v59  ;;  %v6692_v52 = vld [vmem:[%s9535_s1 + $0x20] sm:$0xff]   ;;  %v570_v1 = vrot.slane %v568_v51, 4  ;;  %v574_v2 = vshll.u32 %v7021_v36, 16  ;;  %v387_v9 = vshrl.u32 %v7036_v53, 16  ;;  %v390_v10 = vshll.u32 %v7036_v53, 16 }
  0x33   : > { %6257 = vmatprep.subr.bf16.mxu1 %v6690_v30  ;;  %v6693_v59 = vld [vmem:[%s9535_s1 + $0xa0] sm:$0xff]   ;;  %6305 = vmatprep.subr.bf16.mxu0 %v6691_v37  ;;  %v375_v3 = vsel %vm6915_vm2, %v370_v55, %v374_v34  ;;  %v380_v7 = vrot.slane %v379_v56, 4  ;;  %v561_v11 = vor.u32 %v560_v61, %v557_v58  ;;  %v396_v17 = vshll.u32 %v7045_v60, 16  ;;  %v7086_v51 = vld [vmem:[%s6884_s25 + $0x3c] sm:$0xf]  ;;  %v6697_v55 = vld [vmem:[%s9535_s1 + $0x90] sm:$0xff]  }
  0x34   : > { %6241 = vmatprep.mubr.bf16.mxu1 %v5380_v54  ;;  %v571_v12 = vor.u32 %v570_v1, %v566_v63  ;;  %v576_v15 = vrot.slane %v574_v2, 5  ;;  %v389_v24 = vrot.slane %v387_v9, 4  ;;  %v392_v28 = vrot.slane %v390_v10, 5  ;;  %v7089_v54 = vld [vmem:[%s6884_s25 + $0x40] sm:$0xf] }
  0x35   : > { %v385_v23 = vsel %vm6915_vm2, %v380_v7, %v384_v49  ;;  %v400_v29 = vshrl.u32 %v7045_v60, 16  ;;  %v562_v34 = vrot.slane %v561_v11, 4  ;;  %v406_v43 = vshll.u32 %v7053_v16, 16  ;;  %v7096_v7 = vld [vmem:[%s6884_s25 + $0x44] sm:$0x1] }
  0x36   : > { %6258 = vmatpush3.bf16.msra.mxu1 %v6690_v30  ;;  %6306 = vmatpush3.bf16.msra.mxu0 %v6691_v37  ;;  %v6694_v30 = vld [vmem:[%s9535_s1 + $0x18] sm:$0xff]   ;;  %v5373_v33 = vcombine.low %v375_v3, %v385_v23  ;;  %v572_v35 = vrot.slane %v571_v12, 4  ;;  %v398_v37 = vrot.slane %v396_v17, 5  ;;  %v393_v41 = vor.u32 %v392_v28, %v389_v24  ;;  %v7108_v28 = vld [vmem:[%s6884_s25 + $0xa0] sm:$0xf] }
  0x37   : > { %6259 = vmatprep.subr.bf16.mxu1 %v6692_v52  ;;  %6307 = vmatprep.subr.bf16.mxu0 %v6693_v59  ;;  %v402_v42 = vrot.slane %v400_v29, 4  ;;  %v579_v45 = vshrl.u32 %v7057_v18, 16  ;;  %v567_v47 = vsel %vm6915_vm2, %v562_v34, %v566_v63  ;;  %v582_v49 = vshll.u32 %v7057_v18, 16  ;;  %v7099_v9 = vld [vmem:[%s6884_s25 + $0x9c] sm:$0xf]  ;;  %v6698_v29 = vld [vmem:[%s9535_s1 + $0x8] sm:$0xff]  }
  0x38   : > { %6226 = vmatmul.mubr.bf16.gmra.mxu0 %v5373_v33  ;;  %v577_v48 = vsel %vm6915_vm2, %v572_v35, %v576_v15  ;;  %v588_v50 = vshll.u32 %v7063_v31, 16  ;;  %v394_v58 = vrot.slane %v393_v41, 4  ;;  %v408_v63 = vrot.slane %v406_v43, 5  ;;  %v6699_v41 = vld [vmem:[%s9535_s1 + $0x88] sm:$0xff]  }
  0x39   : > { %v5381_v56 = vcombine.low %v567_v47, %v577_v48  ;;  %v403_v61 = vor.u32 %v402_v42, %v398_v37  ;;  %v584_v1 = vrot.slane %v582_v49, 5  ;;  %v592_v3 = vshrl.u32 %v7063_v31, 16 }
  0x3a   : > { %6260 = vmatpush3.bf16.msra.mxu1 %v6692_v52  ;;  %6308 = vmatpush3.bf16.msra.mxu0 %v6693_v59  ;;  %v581_v52 = vrot.slane %v579_v45, 4  ;;  %v590_v2 = vrot.slane %v588_v50, 5  ;;  %v399_v10 = vsel %vm6915_vm2, %v394_v58, %v398_v37  ;;  %v598_v11 = vshll.u32 %v7073_v44, 16 }
  0x3b   : > { %6261 = vmatprep.subr.bf16.mxu1 %v6694_v30  ;;  %6309 = vmatprep.subr.bf16.mxu0 %v6695_v38  ;;  %v404_v59 = vrot.slane %v403_v61, 4  ;;  %v411_v12 = vshrl.u32 %v7086_v51, 16  ;;  %v594_v17 = vrot.slane %v592_v3, 4  ;;  %v414_v23 = vshll.u32 %v7086_v51, 16  ;;  %v7124_v61 = vld [vmem:[%s6884_s25 + $0xa4] sm:$0x1] }
  0x3c   : > { %6242 = vmatmul.mubr.bf16.gmra.mxu1 %v5381_v56  ;;  %v585_v15 = vor.u32 %v584_v1, %v581_v52  ;;  %v420_v24 = vshll.u32 %v7089_v54, 16  ;;  %v600_v34 = vrot.slane %v598_v11, 5  ;;  %v424_v37 = vshrl.u32 %v7089_v54, 16 }
  0x3d   : > { %v409_v33 = vsel %vm6915_vm2, %v404_v59, %v408_v63  ;;  %v413_v35 = vrot.slane %v411_v12, 4  ;;  %v595_v43 = vor.u32 %v594_v17, %v590_v2  ;;  %v416_v45 = vrot.slane %v414_v23, 5  ;;  %v7129_v59 = vld [vmem:[%s6884_s25 + $0x48] sm:$0xf]  ;;  %v7138_v17 = vld [vmem:[%s6884_s25 + $0x4c] sm:$0xf] }
  0x3e   : > { %6262 = vmatpush3.bf16.msra.mxu1 %v6694_v30  ;;  %6310 = vmatpush3.bf16.msra.mxu0 %v6695_v38  ;;  %v5374_v42 = vcombine.low %v399_v10, %v409_v33  ;;  %v586_v30 = vrot.slane %v585_v15, 4  ;;  %v422_v47 = vrot.slane %v420_v24, 5  ;;  %v426_v48 = vrot.slane %v424_v37, 4 }
  0x3f   : > { %6263 = vmatprep.subr.bf16.mxu1 %v6696_v46  ;;  %6311 = vmatprep.subr.bf16.mxu0 %v6697_v55  ;;  %v430_v49 = vshll.u32 %v7096_v7, 16  ;;  %v603_v50 = vshrl.u32 %v7099_v9, 16  ;;  %v596_v56 = vrot.slane %v595_v43, 4  ;;  %v417_v58 = vor.u32 %v416_v45, %v413_v35 }
  0x40   : > { %6229 = vmatprep.mubr.bf16.mxu0 %v5374_v42  ;;  %v591_v38 = vsel %vm6915_vm2, %v586_v30, %v590_v2  ;;  %v606_v63 = vshll.u32 %v7099_v9, 16  ;;  %v427_v52 = vor.u32 %v426_v48, %v422_v47  ;;  %v612_v10 = vshll.u32 %v7108_v28, 16  ;;  %v6700_v2 = vld [vmem:[%s9535_s1] sm:$0xff]   ;;  %v7147_v30 = vld [vmem:[%s6884_s25 + $0x50] sm:$0x1] }
  0x41   : > { %v432_v1 = vrot.slane %v430_v49, 5  ;;  %v605_v3 = vrot.slane %v603_v50, 4  ;;  %v601_v11 = vsel %vm6915_vm2, %v596_v56, %v600_v34  ;;  %v418_v12 = vrot.slane %v417_v58, 4 }
  0x42   : > { %6264 = vmatpush3.bf16.msra.mxu1 %v6696_v46  ;;  %6312 = vmatpush3.bf16.msra.mxu0 %v6697_v55  ;;  %v608_v15 = vrot.slane %v606_v63, 5  ;;  %v616_v46 = vshrl.u32 %v7108_v28, 16  ;;  %v6701_v55 = vld [vmem:[%s9535_s1 + $0x80] sm:$0xff]   ;;  %v5382_v23 = vcombine.low %v591_v38, %v601_v11  ;;  %v428_v24 = vrot.slane %v427_v52, 4  ;;  %v7155_v38 = vld [vmem:[%s6884_s25 + $0xa8] sm:$0xf] }
  0x43   : > { %6265 = vmatprep.subr.bf16.mxu1 %v6698_v29  ;;  %6313 = vmatprep.subr.bf16.mxu0 %v6699_v41  ;;  %v614_v33 = vrot.slane %v612_v10, 5  ;;  %v622_v35 = vshll.u32 %v7124_v61, 16  ;;  %v423_v34 = vsel %vm6915_vm2, %v418_v12, %v422_v47  ;;  %v435_v43 = vshrl.u32 %v7129_v59, 16  ;;  %9564 = vst [vmem:[#allocation2_spill] sm:$0xff] %v7155_v38  ;;  %v7160_v47 = vld [vmem:[%s9535_s1 + $0xf8] sm:$0xff]  }
  0x44   : > { %v609_v37 = vor.u32 %v608_v15, %v605_v3  ;;  %v618_v42 = vrot.slane %v616_v46, 4  ;;  %6245 = vmatprep.mubr.bf16.mxu1 %v5382_v23  ;;  %v433_v45 = vsel %vm6915_vm2, %v428_v24, %v432_v1  ;;  %v438_v49 = vshll.u32 %v7129_v59, 16  ;;  %v7163_v52 = vld [vmem:[%s6884_s25 + $0xac] sm:$0xf]  ;;  %v7168_v1 = vld [vmem:[%s9535_s1 + $0x138] sm:$0xff]  }
  0x45   : > { %v624_v48 = vrot.slane %v622_v35, 5  ;;  %v444_v50 = vshll.u32 %v7138_v17, 16  ;;  %v437_v63 = vrot.slane %v435_v43, 4  ;;  %v448_v10 = vshrl.u32 %v7138_v17, 16  ;;  %v7173_v12 = vld [vmem:[%s6884_s25 + $0xb0] sm:$0x1] }
  0x46   : > { %6266 = vmatpush3.bf16.msra.mxu1 %v6698_v29  ;;  %6314 = vmatpush3.bf16.msra.mxu0 %v6699_v41  ;;  %v5375_v29 = vcombine.low %v423_v34, %v433_v45  ;;  %v610_v56 = vrot.slane %v609_v37, 4  ;;  %v619_v58 = vor.u32 %v618_v42, %v614_v33  ;;  %v440_v41 = vrot.slane %v438_v49, 5  ;;  %9565 = vst [vmem:[#allocation3_spill] sm:$0xff] %v7173_v12  ;;  %v7176_v15 = vld [vmem:[%s6884_s25 + $0x54] sm:$0xf] }
  0x47   : > { %6267 = vmatprep.subr.bf16.mxu1 %v6700_v2  ;;  %6315 = vmatprep.subr.bf16.mxu0 %v6701_v55  ;;  %v446_v3 = vrot.slane %v444_v50, 5  ;;  %v454_v11 = vshll.u32 %v7147_v30, 16  ;;  %v627_v24 = vshrl.u32 %v7155_v38, 16  ;;  %v630_v35 = vshll.u32 %v7155_v38, 16  ;;  %v7183_v34 = vld [vmem:[%s6884_s25 + $0x58] sm:$0xf] }
  0x48   : > { %6230 = vmatmul.mubr.bf16.gmra.mxu0 %v5375_v29  ;;  %v615_v46 = vsel %vm6915_vm2, %v610_v56, %v614_v33  ;;  %v620_v23 = vrot.slane %v619_v58, 4  ;;  %v441_v37 = vor.u32 %v440_v41, %v437_v63  ;;  %v450_v42 = vrot.slane %v448_v10, 4 }
  0x49   : > { %v456_v43 = vrot.slane %v454_v11, 5  ;;  %v636_v45 = vshll.u32 %v7163_v52, 16  ;;  %v629_v49 = vrot.slane %v627_v24, 4  ;;  %v632_v50 = vrot.slane %v630_v35, 5 }
  0x4a   : > { %6268 = vmatpush3.bf16.msra.mxu1 %v6700_v2  ;;  %6316 = vmatpush3.bf16.msra.mxu0 %v6701_v55  ;;  %v625_v33 = vsel %vm6915_vm2, %v620_v23, %v624_v48  ;;  %v640_v29 = vshrl.u32 %v7163_v52, 16  ;;  %v442_v56 = vrot.slane %v441_v37, 4  ;;  %v451_v58 = vor.u32 %v450_v42, %v446_v3  ;;  %v7192_v55 = vld [vmem:[%s6884_s25 + $0x5c] sm:$0x1]  ;;  %v7197_v48 = vld [vmem:[%s6884_s25 + $0xb4] sm:$0xf] }
  0x4b   : > { %6349 = vmatprep.subr.bf16.mxu1 %v7160_v47  ;;  %6397 = vmatprep.subr.bf16.mxu0 %v7168_v1  ;;  %v5383_v2 = vcombine.low %v615_v46, %v625_v33  ;;  %v638_v63 = vrot.slane %v636_v45, 5  ;;  %v633_v41 = vor.u32 %v632_v50, %v629_v49  ;;  %v646_v11 = vshll.u32 %v7173_v12, 16  ;;  %9566 = vst [vmem:[#allocation4_spill] sm:$0xff] %v7197_v48  ;;  %v7204_v37 = vld [vmem:[%s6884_s25 + $0xb8] sm:$0xf] }
  0x4c   : > { %v642_v10 = vrot.slane %v640_v29, 4  ;;  %v459_v21 = vshrl.u32 %v7176_v15, 16  ;;  %v447_v23 = vsel %vm6915_vm2, %v442_v56, %v446_v3  ;;  %v452_v24 = vrot.slane %v451_v58, 4  ;;  %9567 = vst [vmem:[#allocation5_spill] sm:$0xff] %v7204_v37  ;;  %v7210_v3 = vld [vmem:[%s6884_s25 + $0xbc] sm:$0x1] }
  0x4d   : > { %6246 = vmatmul.mubr.bf16.gmra.mxu1 %v5383_v2  ;;  %v462_v46 = vshll.u32 %v7176_v15, 16  ;;  %v468_v35 = vshll.u32 %v7183_v34, 16  ;;  %v634_v42 = vrot.slane %v633_v41, 4  ;;  %v648_v33 = vrot.slane %v646_v11, 5  ;;  %9568 = vst [vmem:[#allocation6_spill] sm:$0xff] %v7210_v3 }
  0x4e   : > { %v643_v45 = vor.u32 %v642_v10, %v638_v63  ;;  %v461_v49 = vrot.slane %v459_v21, 4  ;;  %v457_v50 = vsel %vm6915_vm2, %v452_v24, %v456_v43  ;;  %v472_v62 = vshrl.u32 %v7183_v34, 16  ;;  %v1268_v10 = vld [vmem:[%s6884_s25] sm:$0xe] }
  0x4f   : > { %v464_v29 = vrot.slane %v462_v46, 5  ;;  %v470_v2 = vrot.slane %v468_v35, 5  ;;  %v5376_v56 = vcombine.low %v447_v23, %v457_v50  ;;  %v639_v58 = vsel %vm6915_vm2, %v634_v42, %v638_v63 }
  0x50   : > { %v644_v20 = vrot.slane %v643_v45, 4  ;;  %v478_v41 = vshll.u32 %v7192_v55, 16  ;;  %v474_v21 = vrot.slane %v472_v62, 4  ;;  %v651_v12 = vshrl.u32 %v7197_v48, 16 }
  0x51   : > { %v465_v11 = vor.u32 %v464_v29, %v461_v49  ;;  %v654_v43 = vshll.u32 %v7197_v48, 16  ;;  %6233 = vmatprep.mubr.bf16.mxu0 %v5376_v56  ;;  %v660_v46 = vshll.u32 %v7204_v37, 16  ;;  %v664_v63 = vshrl.u32 %v7204_v37, 16  ;;  %v1269_v49 = vld [vmem:[%s6884_s25 + $0xc] sm:$0xe] }
  0x52   : > { %v649_v24 = vsel %vm6915_vm2, %v644_v20, %v648_v33  ;;  %v480_v23 = vrot.slane %v478_v41, 5  ;;  %v475_v45 = vor.u32 %v474_v21, %v470_v2  ;;  %v653_v50 = vrot.slane %v651_v12, 4  ;;  %v1270_v20 = vld [vmem:[%s6884_s25 + $0x18] sm:$0xe] }
  0x53   : > { %v5384_v35 = vcombine.low %v639_v58, %v649_v24  ;;  %v466_v42 = vrot.slane %v465_v11, 4  ;;  %v656_v62 = vrot.slane %v654_v43, 5  ;;  %v662_v29 = vrot.slane %v660_v46, 5 }
  0x54   : > { %v666_v38 = vrot.slane %v664_v63, 4  ;;  %v670_v48 = vshll.u32 %v7210_v3, 16  ;;  %v476_v58 = vrot.slane %v475_v45, 4  ;;  %v5418_v41 = vrot.slane %v1268_v10, 9 }
  0x55   : > { %6249 = vmatprep.mubr.bf16.mxu1 %v5384_v35  ;;  %v471_v33 = vsel %vm6915_vm2, %v466_v42, %v470_v2  ;;  %v1321_v12 = vrot.slane %v6893_v5, 5  ;;  %v657_v11 = vor.u32 %v656_v62, %v653_v50  ;;  %v5419_v24 = vrot.slane %v1269_v49, 9 }
  0x56   : > { %v667_v21 = vor.u32 %v666_v38, %v662_v29  ;;  %v672_v43 = vrot.slane %v670_v48, 5  ;;  %v481_v46 = vsel %vm6915_vm2, %v476_v58, %v480_v23  ;;  %v1328_v35 = vrot.slane %v6920_v32, 5 }
  0x57   : > { %v1322_v63 = vsel %vm7226_vm5, %v5418_v41, %v1321_v12  ;;  %v1323_v3 = vrot.slane %v1321_v12, 4  ;;  %v5377_v37 = vcombine.low %v471_v33, %v481_v46  ;;  %v658_v2 = vrot.slane %v657_v11, 4  ;;  %v1272_v12 = vld [vmem:[%s6884_s25 + $0x30] sm:$0xe]  ;;  %v1274_v46 = vld [vmem:[%s6884_s25 + $0x48] sm:$0xe] }
  0x58   : > { %v668_v42 = vrot.slane %v667_v21, 4  ;;  %v5394_v10 = vcombine.low %v6890_v4, %v6893_v5  ;;  %v9571_v38 = vrot.slane %v6896_v6, 5  ;;  %v1330_v45 = vrot.slane %v1328_v35, 4 }
  0x59   : > { %v5420_v23 = vrot.slane %v1270_v20, 9  ;;  %6234 = vmatmul.mubr.bf16.gmra.mxu0 %v5377_v37  ;;  %v663_v50 = vsel %vm6915_vm2, %v658_v2, %v662_v29  ;;  %v1335_v33 = vrot.slane %v6957_v19, 5  ;;  %v1329_v4 = vsel %vm7226_vm5, %v5419_v24, %v1328_v35  ;;  %v1273_v24 = vld [vmem:[%s6884_s25 + $0x3c] sm:$0xe] }
  0x5a   : > { %v1325_v48 = vsel %vm7226_vm5, %v1323_v3, %v9571_v38  ;;  %v673_v49 = vsel %vm6915_vm2, %v668_v42, %v672_v43  ;;  %v9572_v5 = vrot.slane %v6926_v40, 5  ;;  %v1338_v37 = vrot.slane %v6962_v25, 5  ;;  %v1271_v3 = vld [vmem:[%s6884_s25 + $0x24] sm:$0xe]  ;;  %v6709_v25 = vld [vmem:[%s9535_s1 + $0x130] sm:$0xff]  }
  0x5b   : > { %v5434_v62 = vcombine.low %v1322_v63, %v1325_v48  ;;  %v5385_v58 = vcombine.low %v663_v50, %v673_v49  ;;  %v1336_v29 = vsel %vm7226_vm5, %v5420_v23, %v1335_v33  ;;  %v1337_v20 = vrot.slane %v1335_v33, 4  ;;  %v6708_v23 = vld [vmem:[%s9535_s1 + $0xf0] sm:$0xff]  }
  0x5c   : > { %v1332_v6 = vsel %vm7226_vm5, %v1330_v45, %v9572_v5  ;;  %v1342_v41 = vrot.slane %v6998_v0, 5  ;;  %v5421_v21 = vrot.slane %v1271_v3, 9  ;;  %v1349_v43 = vrot.slane %v7045_v60, 5  ;;  %v7301_v3 = vld [vmem:[%s6884_s25 + $0x68] sm:$0x1] }
  0x5d   : > { %6317 = vmatprep.mubr.bf16.mxu0 %v5434_v62  ;;  %6250 = vmatmul.mubr.bf16.gmra.mxu1 %v5385_v58  ;;  %v5435_v11 = vcombine.low %v1329_v4, %v1332_v6  ;;  %v1339_v40 = vsel %vm7226_vm5, %v1337_v20, %v1338_v37  ;;  %v1345_v2 = vrot.slane %v7001_v8, 5  ;;  %v5422_v42 = vrot.slane %v1272_v12, 9  ;;  %v1275_v37 = vld [vmem:[%s6884_s25 + $0x54] sm:$0xe]  ;;  %v7325_v12 = vld [vmem:[%s6884_s25 + $0x60] sm:$0xe] }
  0x5e   : > { %6269 = vmatprep.mubr.bf16.mxu1 %v5394_v10  ;;  %v5436_v63 = vcombine.low %v1336_v29, %v1339_v40  ;;  %v1344_v35 = vrot.slane %v1342_v41, 4  ;;  %v1351_v38 = vrot.slane %v1349_v43, 4  ;;  %v1352_v10 = vrot.slane %v7053_v16, 5 }
  0x5f   : > { %v1356_v48 = vrot.slane %v7089_v54, 5  ;;  %v5396_v45 = vcombine.low %v6949_v14, %v6957_v19  ;;  %v1363_v50 = vrot.slane %v7138_v17, 5  ;;  %v5423_v49 = vrot.slane %v1273_v24, 9  ;;  %v6717_v24 = vld [vmem:[%s9535_s1 + $0x120] sm:$0xff]  }
  0x60   : > { %v1359_v8 = vrot.slane %v7096_v7, 5  ;;  %v5424_v33 = vrot.slane %v1274_v46, 9  ;;  %v1343_v14 = vsel %vm7226_vm5, %v5421_v21, %v1342_v41  ;;  %v1346_v19 = vsel %vm7226_vm5, %v1344_v35, %v1345_v2  ;;  %v7337_v46 = vld [vmem:[%s6884_s25 + $0x78] sm:$0xe]  ;;  %v6716_v2 = vld [vmem:[%s9535_s1 + $0xe0] sm:$0xff]  }
  0x61   : > { %6318 = vmatmul.mubr.bf16.vlgmr.msra.gmra.mxu0 %v5435_v11  ;;  %v1358_v62 = vrot.slane %v1356_v48, 4  ;;  %v1365_v16 = vrot.slane %v1363_v50, 4  ;;  %v1366_v58 = vrot.slane %v7147_v30, 5  ;;  %v1350_v4 = vsel %vm7226_vm5, %v5422_v42, %v1349_v43  ;;  %v7328_v11 = vld [vmem:[%s6884_s25 + $0x6c] sm:$0xe] }
  0x62   : > { %6398 = vmatpush3.bf16.msra.mxu0 %v7168_v1  ;;  %6321 = vmatprep.mubr.bf16.mxu0 %v5436_v63  ;;  %v1353_v7 = vsel %vm7226_vm5, %v1351_v38, %v1352_v10  ;;  %v6713_v1 = vld [vmem:[%s9535_s1 + $0x128] sm:$0xff]   ;;  %v1370_v5 = vrot.slane %v7183_v34, 5  ;;  %v9573_v6 = vcombine.low %v6911_v26, %v6920_v32  ;;  %v5397_v30 = vcombine.low %v6989_v57, %v6998_v0  ;;  %v1279_v63 = vld [vmem:[%s6884_s25 + $0x84] sm:$0xe]  ;;  %v1280_v42 = vld [vmem:[%s6884_s25 + $0x90] sm:$0xe] }
  0x63   : > { %6399 = vmatprep.subr.bf16.mxu0 %v6709_v25  ;;  %v1380_v29 = vrot.slane %v7301_v3, 5  ;;  %v5437_v20 = vcombine.low %v1343_v14, %v1346_v19  ;;  %v7307_v41 = vsel %vm7226_vm5, %v5423_v49, %v1356_v48  ;;  %v7311_v26 = vsel %vm7226_vm5, %v1358_v62, %v1359_v8  ;;  %v6712_v32 = vld [vmem:[%s9535_s1 + $0xe8] sm:$0xff]   ;;  %v7356_v48 = vld [vmem:[%s6884_s25 + $0x64] sm:$0xf]  ;;  %v1281_v49 = vld [vmem:[%s6884_s25 + $0x9c] sm:$0xe] }
  0x64   : > { %v5438_v57 = vcombine.low %v1350_v4, %v1353_v7  ;;  %v7318_v0 = vsel %vm7226_vm5, %v5424_v33, %v1363_v50  ;;  %v5398_v40 = vcombine.low %v7036_v53, %v7045_v60  ;;  %v5425_v21 = vrot.slane %v1275_v37, 9  ;;  %v7378_v4 = vld [vmem:[%s6884_s25 + $0x74] sm:$0x1] }
  0x65   : > { %6270 = vmatmul.mubr.bf16.vlgmr.msra.gmra.mxu1 %v9573_v6  ;;  %v1373_v43 = vrot.slane %v7192_v55, 5  ;;  %v5399_v35 = vcombine.low %v7086_v51, %v7089_v54  ;;  %v5439_v53 = vcombine.low %v7307_v41, %v7311_v26  ;;  %v5400_v60 = vcombine.low %v7129_v59, %v7138_v17  ;;  %v6802_v54 = vld [vmem:[%s6884_s25 + $0x80] sm:$0x1] }
  0x66   : > { %6350 = vmatpush3.bf16.msra.mxu1 %v7160_v47  ;;  %6273 = vmatprep.mubr.bf16.mxu1 %v5396_v45  ;;  %v7322_v47 = vsel %vm7226_vm5, %v1365_v16, %v1366_v58  ;;  %v5401_v55 = vcombine.low %v7176_v15, %v7183_v34  ;;  %v5426_v10 = vrot.slane %v7325_v12, 9  ;;  %v1377_v45 = vrot.slane %v7356_v48, 5  ;;  %v7374_v16 = vld [vmem:[%s6884_s25 + $0x70] sm:$0xf]  ;;  %v6803_v17 = vld [vmem:[%s6884_s25 + $0x60] sm:$0xf] }
  0x67   : > { %6351 = vmatprep.subr.bf16.mxu1 %v6708_v23  ;;  %6400 = vmatpush3.bf16.msra.mxu0 %v6709_v25  ;;  %v1372_v25 = vrot.slane %v1370_v5, 4  ;;  %v5440_v38 = vcombine.low %v7318_v0, %v7322_v47  ;;  %v5427_v62 = vrot.slane %v7328_v11, 9  ;;  %v1398_v8 = vrot.slane %v7012_v22, 5  ;;  %v1282_v0 = vld [vmem:[%s6884_s25 + $0xa8] sm:$0xe]  ;;  %v7558_v15 = vld [vmem:[%s9535_s1 + $0x1b8] sm:$0xff]  }
  0x68   : > { %6401 = vmatprep.subr.bf16.mxu0 %v6713_v1  ;;  %v1401_v33 = vrot.slane %v7021_v36, 5  ;;  %v7367_v14 = vsel %vm7226_vm5, %v5425_v21, %v1370_v5  ;;  %v1384_v58 = vrot.slane %v7374_v16, 5  ;;  %v1387_v7 = vrot.slane %v7378_v4, 5  ;;  %v6720_v36 = vld [vmem:[%s9535_s1 + $0xd8] sm:$0xff]  }
  0x69   : > { %6322 = vmatmul.mubr.bf16.gmra.mxu0 %v5437_v20  ;;  %v7371_v19 = vsel %vm7226_vm5, %v1372_v25, %v1373_v43  ;;  %v5428_v5 = vrot.slane %v7337_v46, 9  ;;  %v1400_v37 = vrot.slane %v1398_v8, 4  ;;  %v5430_v41 = vrot.slane %v1280_v42, 9  ;;  %v5514_v42 = vld [vmem:[%s6884_s25 + $0xc] sm:$0xf] }
  0x6a   : > { %6352 = vmatpush3.bf16.msra.mxu1 %v6708_v23  ;;  %6325 = vmatprep.mubr.bf16.mxu0 %v5438_v57  ;;  %v5429_v23 = vrot.slane %v1279_v63, 9  ;;  %v1405_v26 = vrot.slane %v7063_v31, 5  ;;  %v1408_v57 = vrot.slane %v7073_v44, 5  ;;  %v1391_v47 = vrot.slane %v6971_v39, 5 }
  0x6b   : > { %6353 = vmatprep.subr.bf16.mxu1 %v6712_v32  ;;  %6402 = vmatpush3.bf16.msra.mxu0 %v6713_v1  ;;  %v6721_v1 = vld [vmem:[%s9535_s1 + $0x118] sm:$0xff]   ;;  %v7402_v21 = vsel %vm7226_vm5, %v1400_v37, %v1401_v33  ;;  %v1412_v63 = vrot.slane %v7108_v28, 5  ;;  %v5432_v33 = vrot.slane %v1282_v0, 9  ;;  %v1419_v37 = vrot.slane %v7163_v52, 5  ;;  %v6724_v0 = vld [vmem:[%s9535_s1 + $0xd0] sm:$0xff]  }
  0x6c   : > { %6403 = vmatprep.subr.bf16.mxu0 %v6717_v24  ;;  %v7390_v6 = vsel %vm7226_vm5, %v5429_v23, %v1398_v8  ;;  %v7410_v44 = vsel %vm7226_vm5, %v5430_v41, %v1405_v26  ;;  %v1407_v43 = vrot.slane %v1405_v26, 4  ;;  %v6725_v23 = vld [vmem:[%s9535_s1 + $0x110] sm:$0xff]   ;;  %v1415_v8 = vrot.slane %v7124_v61, 5  ;;  %v9575_v61 = vld [vmem:[#allocation3_spill] sm:$0xff] }
  0x6d   : > { %6274 = vmatmul.mubr.bf16.gmra.mxu1 %v5397_v30  ;;  %v1379_v30 = vrot.slane %v1377_v45, 4  ;;  %v1414_v20 = vrot.slane %v1412_v63, 4  ;;  %v1422_v50 = vrot.slane %v9575_v61, 5  ;;  %v1378_v61 = vsel %vm7226_vm5, %v5426_v10, %v1377_v45  ;;  %v5517_v45 = vld [vmem:[%s6884_s25 + $0x18] sm:$0xf] }
  0x6e   : > { %6277 = vmatprep.mubr.bf16.mxu1 %v5398_v40  ;;  %6354 = vmatpush3.bf16.msra.mxu1 %v6712_v32  ;;  %v5431_v40 = vrot.slane %v1281_v49, 9  ;;  %v7422_v32 = vld [vmem:[%s6884_s25 + $0x10] sm:$0xf]  ;;  %v7426_v41 = vsel %vm7226_vm5, %v1407_v43, %v1408_v57  ;;  %v1421_v57 = vrot.slane %v1419_v37, 4  ;;  %v2187_v12 = vshrl.u32 %v5514_v42, 16 }
  0x6f   : > { %6355 = vmatprep.subr.bf16.mxu1 %v6716_v2  ;;  %6404 = vmatpush3.bf16.msra.mxu0 %v6717_v24  ;;  %v9574_v24 = vld [vmem:[#allocation2_spill] sm:$0xff]  ;;  %v9577_v43 = vld [vmem:[#allocation4_spill] sm:$0xff]  ;;  %v2190_v10 = vshll.u32 %v5514_v42, 16  ;;  %v1386_v51 = vrot.slane %v1384_v58, 4  ;;  %v2196_v59 = vshll.u32 %v7422_v32, 16  ;;  %v1392_v4 = vsel %vm7226_vm5, %v5428_v5, %v1391_v47 }
  0x70   : > { %6405 = vmatprep.subr.bf16.mxu0 %v6721_v1  ;;  %v7430_v26 = vsel %vm7226_vm5, %v5431_v40, %v1412_v63  ;;  %v9576_v40 = vld [vmem:[#allocation5_spill] sm:$0xff]  ;;  %v7496_v42 = vld [vmem:[%s6884_s25 + $0x14] sm:$0x1]  ;;  %v2189_v63 = vrot.slane %v2187_v12, 4  ;;  %v9579_v5 = vld [vmem:[#allocation6_spill] sm:$0xff] }
  0x71   : > { %6326 = vmatmul.mubr.bf16.gmra.mxu0 %v5439_v53  ;;  %v2192_v49 = vrot.slane %v2190_v10, 5  ;;  %v5520_v53 = vld [vmem:[%s6884_s25 + $0x24] sm:$0xf]  ;;  %v1388_v11 = vsel %vm7226_vm5, %v1386_v51, %v1387_v7 }
  0x72   : > { %6356 = vmatpush3.bf16.msra.mxu1 %v6716_v2  ;;  %6329 = vmatprep.mubr.bf16.mxu0 %v5440_v38  ;;  %v7440_v2 = vsel %vm7226_vm5, %v5432_v33, %v1419_v37  ;;  %v5441_v38 = vcombine.low %v7367_v14, %v7371_v19  ;;  %v1381_v33 = vsel %vm7226_vm5, %v1379_v30, %v1380_v29  ;;  %v6729_v14 = vld [vmem:[%s9535_s1 + $0x108] sm:$0xff]   ;;  %v6733_v30 = vld [vmem:[%s9535_s1 + $0x100] sm:$0xff]   ;;  %v7515_v19 = vrot.slane %v2196_v59, 5 }
  0x73   : > { %6357 = vmatprep.subr.bf16.mxu1 %v6720_v36  ;;  %6406 = vmatpush3.bf16.msra.mxu0 %v6721_v1  ;;  %v7458_v37 = vsel %vm7226_vm5, %v1414_v20, %v1415_v8  ;;  %v7470_v29 = vsel %vm7226_vm5, %v1421_v57, %v1422_v50  ;;  %v6728_v50 = vld [vmem:[%s9535_s1 + $0xc8] sm:$0xff]   ;;  %v7485_v1 = vld [vmem:[%s6884_s25 + $0xb4] sm:$0xe]  ;;  %v5442_v20 = vcombine.low %v1378_v61, %v1381_v33  ;;  %v2200_v8 = vshrl.u32 %v7422_v32, 16  ;;  %v7513_v61 = vld [vmem:[%s6884_s25 + $0x1c] sm:$0xf] }
  0x74   : > { %6407 = vmatprep.subr.bf16.mxu0 %v6725_v23  ;;  %v7500_v57 = vld [vmem:[%s6884_s25 + $0x6c] sm:$0xf]  ;;  %v2211_v33 = vshrl.u32 %v5517_v45, 16  ;;  %v2220_v51 = vshll.u32 %v7513_v61, 16  ;;  %v2224_v39 = vshrl.u32 %v7513_v61, 16  ;;  %v2235_v59 = vshrl.u32 %v5520_v53, 16 }
  0x75   : > { %6278 = vmatmul.mubr.bf16.gmra.mxu1 %v5399_v35  ;;  %v1394_v35 = vrot.slane %v6802_v54, 5  ;;  %v5403_v54 = vcombine.low %v7500_v57, %v7374_v16  ;;  %v2202_v3 = vrot.slane %v2200_v8, 4  ;;  %v2238_v46 = vshll.u32 %v5520_v53, 16  ;;  %v6806_v8 = vld [vmem:[%s6884_s25 + $0x7c] sm:$0xf] }
  0x76   : > { %6281 = vmatprep.mubr.bf16.mxu1 %v5400_v60  ;;  %6358 = vmatpush3.bf16.msra.mxu1 %v6720_v36  ;;  %v5402_v60 = vcombine.low %v6803_v17, %v7356_v48  ;;  %v1393_v36 = vrot.slane %v1391_v47, 4  ;;  %v7510_v48 = vsel %vm7226_vm5, %v5427_v62, %v1384_v58  ;;  %v2214_v17 = vshll.u32 %v5517_v45, 16  ;;  %v6732_v58 = vld [vmem:[%s9535_s1 + $0xc0] sm:$0xff]   ;;  %v7540_v45 = vld [vmem:[%s6884_s25 + $0x28] sm:$0xf] }
  0x77   : > { %6359 = vmatprep.subr.bf16.mxu1 %v6724_v0  ;;  %6408 = vmatpush3.bf16.msra.mxu0 %v6725_v23  ;;  %v9547_v62 = vrot.slane %v9576_v40, 5  ;;  %v7527_v23 = vld [vmem:[%s6884_s25 + $0x20] sm:$0x1]  ;;  %v2213_v12 = vrot.slane %v2211_v33, 4  ;;  %9578 = vst [vmem:[#allocation2_spill] sm:$0xff] %v7540_v45  ;;  %v5443_v34 = vcombine.low %v7510_v48, %v1388_v11  ;;  %v2244_v53 = vshll.u32 %v7540_v45, 16 }
  0x78   : > { %6409 = vmatprep.subr.bf16.mxu0 %v6729_v14  ;;  %v2216_v10 = vrot.slane %v2214_v17, 5  ;;  %v1395_v7 = vsel %vm7226_vm5, %v1393_v36, %v1394_v35  ;;  %v2193_v35 = vor.u32 %v2192_v49, %v2189_v63  ;;  %v7553_v36 = vld [vmem:[%s9535_s1 + $0x178] sm:$0xff]   ;;  %v5523_v63 = vld [vmem:[%s6884_s25 + $0x30] sm:$0xf]  ;;  %v7574_v48 = vld [vmem:[%s6884_s25 + $0x34] sm:$0xf] }
  0x79   : > { %6330 = vmatmul.mubr.bf16.gmra.mxu0 %v5441_v38  ;;  %v2206_v38 = vshll.u32 %v7496_v42, 16  ;;  %v5444_v17 = vcombine.low %v1392_v4, %v1395_v7  ;;  %9581 = vst [vmem:[#allocation5_spill] sm:$0xff] %v7574_v48  ;;  %v7576_v11 = vrot.slane %v2220_v51, 5  ;;  %v2240_v47 = vrot.slane %v2238_v46, 5  ;;  %v7595_v46 = vld [vmem:[%s6884_s25 + $0x40] sm:$0xf] }
  0x7a   : > { %6360 = vmatpush3.bf16.msra.mxu1 %v6724_v0  ;;  %6333 = vmatprep.mubr.bf16.mxu0 %v5442_v20  ;;  %v2203_v20 = vor.u32 %v2202_v3, %v7515_v19  ;;  %v2217_v49 = vor.u32 %v2216_v10, %v2213_v12  ;;  %v6805_v3 = vld [vmem:[%s6884_s25 + $0x78] sm:$0xf]  ;;  %v2226_v12 = vrot.slane %v2224_v39, 4  ;;  %v2237_v10 = vrot.slane %v2235_v59, 4  ;;  %9582 = vst [vmem:[#allocation4_spill] sm:$0xff] %v7595_v46 }
  0x7b   : > { %6361 = vmatprep.subr.bf16.mxu1 %v6728_v50  ;;  %6410 = vmatpush3.bf16.msra.mxu0 %v6729_v14  ;;  %v2230_v14 = vshll.u32 %v7527_v23, 16  ;;  %v5404_v33 = vcombine.low %v6805_v3, %v6806_v8  ;;  %v7567_v25 = vrot.slane %v2206_v38, 5  ;;  %v7579_v0 = vld [vmem:[%s6884_s25 + $0x38] sm:$0x1]  ;;  %v7581_v4 = vrot.slane %v2193_v35, 4 }
  0x7c   : > { %6411 = vmatprep.subr.bf16.mxu0 %v6733_v30  ;;  %v7583_v7 = vrot.slane %v2203_v20, 4  ;;  %v2259_v3 = vshrl.u32 %v5523_v63, 16  ;;  %v5526_v8 = vld [vmem:[%s6884_s25 + $0x3c] sm:$0xf]  ;;  %v7591_v51 = vrot.slane %v2244_v53, 5  ;;  %v2262_v39 = vshll.u32 %v5523_v63, 16 }
  0x7d   : > { %6282 = vmatmul.mubr.bf16.gmra.mxu1 %v5401_v55  ;;  %v1428_v55 = vrot.slane %v9547_v62, 4  ;;  %v7585_v38 = vrot.slane %v2230_v14, 5  ;;  %v2268_v59 = vshll.u32 %v7574_v48, 16  ;;  %v2272_v20 = vshrl.u32 %v7574_v48, 16 }
  0x7e   : > { %6285 = vmatprep.mubr.bf16.mxu1 %v5402_v60  ;;  %6362 = vmatpush3.bf16.msra.mxu1 %v6728_v50  ;;  %v7570_v60 = vld [vmem:[%s6884_s25 + $0x2c] sm:$0x1]  ;;  %v2248_v50 = vshrl.u32 %v7540_v45, 16  ;;  %v2227_v14 = vor.u32 %v2226_v12, %v7576_v11  ;;  %v2261_v53 = vrot.slane %v2259_v3, 4  ;;  %v2264_v63 = vrot.slane %v2262_v39, 5 }
  0x7f   : > { %6363 = vmatprep.subr.bf16.mxu1 %v6732_v58  ;;  %9580 = vst [vmem:[#allocation3_spill] sm:$0xff] %v7570_v60  ;;  %6412 = vmatpush3.bf16.msra.mxu0 %v6733_v30  ;;  %v7589_v30 = vrot.slane %v2217_v49, 4  ;;  %v2283_v49 = vshrl.u32 %v5526_v8, 16  ;;  %v2286_v62 = vshll.u32 %v5526_v8, 16  ;;  %v2274_v48 = vrot.slane %v2272_v20, 4 }
  0x80   : > { %6493 = vmatprep.subr.bf16.mxu0 %v7558_v15  ;;  %v2250_v35 = vrot.slane %v2248_v50, 4  ;;  %v7605_v50 = vrot.slane %v2268_v59, 5  ;;  %v7608_v45 = vld [vmem:[%s6884_s25 + $0x44] sm:$0x1]  ;;  %v2296_v12 = vshrl.u32 %v7595_v46, 16  ;;  %v9583_v16 = vrot.slane %v9576_v40, 5 }
  0x81   : > { %6334 = vmatmul.mubr.bf16.gmra.mxu0 %v5443_v34  ;;  %v2254_v34 = vshll.u32 %v7570_v60, 16  ;;  %v9584_v57 = vrot.slane %v7485_v1, 9  ;;  %v7629_v39 = vld [vmem:[%s6884_s25 + $0x4c] sm:$0xf]  ;;  %v2285_v59 = vrot.slane %v2283_v49, 4  ;;  %v2288_v20 = vrot.slane %v2286_v62, 5 }
  0x82   : > { %6364 = vmatpush3.bf16.msra.mxu1 %v6732_v58  ;;  %6337 = vmatprep.mubr.bf16.mxu0 %v5444_v17  ;;  %v2241_v58 = vor.u32 %v2240_v47, %v2237_v10  ;;  %v2278_v17 = vshll.u32 %v7579_v0, 16  ;;  %v2292_v47 = vshll.u32 %v7595_v46, 16  ;;  %v5529_v10 = vld [vmem:[%s6884_s25 + $0x48] sm:$0xf]  ;;  %v2251_v8 = vor.u32 %v2250_v35, %v7591_v51 }
  0x83   : > { %6445 = vmatprep.subr.bf16.mxu1 %v7553_v36  ;;  %v2298_v1 = vrot.slane %v2296_v12, 4  ;;  %v7633_v46 = vrot.slane %v2227_v14, 4  ;;  %v2199_v62 = vsel %vm6915_vm2, %v7581_v4, %v7515_v19  ;;  %v2209_v35 = vsel %vm6915_vm2, %v7583_v7, %v7567_v25  ;;  %v5532_v4 = vld [vmem:[%s6884_s25 + $0x54] sm:$0xf] }
  0x84   : > { %v7631_v60 = vrot.slane %v2292_v47, 5  ;;  %v2310_v14 = vshll.u32 %v5529_v10, 16  ;;  %v2302_v49 = vshll.u32 %v7608_v45, 16  ;;  %v2320_v19 = vshrl.u32 %v7629_v39, 16 }
  0x85   : > { %6286 = vmatmul.mubr.bf16.gmra.mxu1 %v5403_v54  ;;  %v7619_v54 = vsel %vm7226_vm5, %v9584_v57, %v9583_v16  ;;  %v7635_v16 = vrot.slane %v2241_v58, 4  ;;  %v7637_v57 = vrot.slane %v2254_v34, 5  ;;  %v2316_v58 = vshll.u32 %v7629_v39, 16 }
  0x86   : > { %6289 = vmatprep.mubr.bf16.mxu1 %v5404_v33  ;;  %v9585_v33 = vrot.slane %v9579_v5, 5  ;;  %v2307_v5 = vshrl.u32 %v5529_v10, 16  ;;  %v9587_v34 = vcombine.low %v7410_v44, %v7426_v41  ;;  %v7658_v47 = vrot.slane %v2251_v8, 4  ;;  %v7664_v10 = vld [vmem:[%s6884_s25 + $0x58] sm:$0xf] }
  0x87   : > { %v7660_v12 = vrot.slane %v2278_v17, 5  ;;  %v2289_v25 = vor.u32 %v2288_v20, %v2285_v59  ;;  %v2299_v7 = vor.u32 %v2298_v1, %v7631_v60  ;;  %v9588_v44 = vcombine.low %v7005_v13, %v7012_v22  ;;  %v7670_v41 = vld [vmem:[%s6884_s25 + $0x50] sm:$0x1] }
  0x88   : > { %v7625_v3 = vsel %vm7226_vm5, %v1428_v55, %v9585_v33  ;;  %v9586_v55 = vcombine.low %v7390_v6, %v7402_v21  ;;  %v2265_v6 = vor.u32 %v2264_v63, %v2261_v53  ;;  %v2275_v21 = vor.u32 %v2274_v48, %v7605_v50 }
  0x89   : > { %v2309_v48 = vrot.slane %v2307_v5, 4  ;;  %v2312_v53 = vrot.slane %v2310_v14, 5  ;;  %v7672_v63 = vrot.slane %v2316_v58, 5  ;;  %v2322_v17 = vrot.slane %v2320_v19, 4  ;;  %v5535_v5 = vld [vmem:[%s6884_s25 + $0x60] sm:$0xf] }
  0x8a   : > { %6338 = vmatmul.mubr.bf16.gmra.mxu0 %v9586_v55  ;;  %v9589_v33 = vcombine.low %v7057_v18, %v7063_v31  ;;  %v2331_v8 = vshrl.u32 %v5532_v4, 16  ;;  %v2334_v59 = vshll.u32 %v5532_v4, 16  ;;  %v7677_v20 = vrot.slane %v2265_v6, 4  ;;  %v7694_v31 = vld [vmem:[%s6884_s25 + $0x64] sm:$0xf] }
  0x8b   : > { %6341 = vmatprep.mubr.bf16.mxu0 %v9587_v34  ;;  %v7679_v1 = vrot.slane %v2275_v21, 4  ;;  %v7681_v13 = vrot.slane %v2302_v49, 5  ;;  %v2340_v22 = vshll.u32 %v7664_v10, 16  ;;  %v5449_v55 = vcombine.low %v7619_v54, %v7625_v3  ;;  %v7690_v34 = vld [vmem:[%s6884_s25 + $0x5c] sm:$0x1] }
  0x8c   : > { %v5562_v14 = vcombine.low %v2199_v62, %v2209_v35  ;;  %v7687_v58 = vrot.slane %v2289_v25, 4  ;;  %v2344_v18 = vshrl.u32 %v7664_v10, 16  ;;  %v7696_v6 = vrot.slane %v2299_v7, 4 }
  0x8d   : > { %6290 = vmatmul.mubr.bf16.gmra.mxu1 %v9588_v44  ;;  %v2326_v21 = vshll.u32 %v7670_v41, 16  ;;  %v2355_v49 = vshrl.u32 %v5535_v5, 16  ;;  %v2358_v19 = vshll.u32 %v5535_v5, 16  ;;  %v9590_v4 = vcombine.low %v7430_v26, %v7458_v37 }
  0x8e   : > { %6293 = vmatprep.mubr.bf16.mxu1 %v9589_v33  ;;  %v2313_v54 = vor.u32 %v2312_v53, %v2309_v48  ;;  %v2323_v3 = vor.u32 %v2322_v17, %v7672_v63  ;;  %v2333_v62 = vrot.slane %v2331_v8, 4  ;;  %v2336_v35 = vrot.slane %v2334_v59, 5  ;;  %v7734_v8 = vld [vmem:[%s6884_s25 + $0x70] sm:$0xf] }
  0x8f   : > { %v9591_v25 = vcombine.low %v7440_v2, %v7470_v29  ;;  %v7706_v7 = vrot.slane %v2340_v22, 5  ;;  %v2346_v44 = vrot.slane %v2344_v18, 4  ;;  %v2350_v33 = vshll.u32 %v7690_v34, 16 }
  0x90   : > { %v2364_v26 = vshll.u32 %v7694_v31, 16  ;;  %v2223_v37 = vsel %vm6915_vm2, %v7589_v30, %v7576_v11  ;;  %v2233_v2 = vsel %vm6915_vm2, %v7633_v46, %v7585_v38  ;;  %v2357_v29 = vrot.slane %v2355_v49, 4  ;;  %v5538_v46 = vld [vmem:[%s6884_s25 + $0x6c] sm:$0xf] }
  0x91   : > { %v2360_v48 = vrot.slane %v2358_v19, 5  ;;  %v9592_v53 = vcombine.low %v7099_v9, %v7108_v28  ;;  %v2247_v17 = vsel %vm6915_vm2, %v7635_v16, %v7591_v51  ;;  %v2257_v11 = vsel %vm6915_vm2, %v7658_v47, %v7637_v57  ;;  %v7742_v16 = vld [vmem:[%s6884_s25 + $0x68] sm:$0x1] }
  0x92   : > { %6342 = vmatmul.mubr.bf16.gmra.mxu0 %v9590_v4  ;;  %v7729_v30 = vrot.slane %v2326_v21, 5  ;;  %v2368_v38 = vshrl.u32 %v7694_v31, 16  ;;  %v9593_v9 = vcombine.low %v9574_v24, %v7163_v52  ;;  %v7739_v28 = vrot.slane %v2313_v54, 4  ;;  %v6734_v52 = vld [vmem:[%s6884_s25 + $0xc] sm:$0xff]  }
  0x93   : > { %6345 = vmatprep.mubr.bf16.mxu0 %v9591_v25  ;;  %v2337_v51 = vor.u32 %v2336_v35, %v2333_v62  ;;  %v2379_v59 = vshrl.u32 %v5538_v46, 16  ;;  %v2382_v57 = vshll.u32 %v5538_v46, 16  ;;  %v7744_v47 = vrot.slane %v2323_v3, 4  ;;  %v7755_v62 = vld [vmem:[%s6884_s25 + $0x74] sm:$0x1] }
  0x94   : > { %v2347_v22 = vor.u32 %v2346_v44, %v7706_v7  ;;  %v7747_v5 = vrot.slane %v2350_v33, 5  ;;  %v2388_v18 = vshll.u32 %v7734_v8, 16  ;;  %v2361_v24 = vor.u32 %v2360_v48, %v2357_v29  ;;  %v5541_v25 = vld [vmem:[%s6884_s25 + $0x78] sm:$0xf]  ;;  %v7759_v44 = vld [vmem:[%s6884_s25 + $0x7c] sm:$0xf] }
  0x95   : > { %6294 = vmatmul.mubr.bf16.gmra.mxu1 %v9592_v53  ;;  %v7751_v21 = vrot.slane %v2364_v26, 5  ;;  %v2370_v49 = vrot.slane %v2368_v38, 4  ;;  %v2392_v19 = vshrl.u32 %v7734_v8, 16  ;;  %v5563_v4 = vcombine.low %v2223_v37, %v2233_v2  ;;  %v7766_v26 = vld [vmem:[%s6884_s25 + $0x80] sm:$0x1] }
  0x96   : > { %6297 = vmatprep.mubr.bf16.mxu1 %v9593_v9  ;;  %v5564_v54 = vcombine.low %v2247_v17, %v2257_v11  ;;  %v2381_v3 = vrot.slane %v2379_v59, 4  ;;  %v2384_v35 = vrot.slane %v2382_v57, 5  ;;  %v7761_v33 = vrot.slane %v2337_v51, 4 }
  0x97   : > { %v7763_v53 = vrot.slane %v2388_v18, 5  ;;  %v2394_v29 = vrot.slane %v2392_v19, 4  ;;  %v2403_v48 = vshrl.u32 %v5541_v25, 16  ;;  %v2374_v37 = vshll.u32 %v7742_v16, 16  ;;  %v5544_v19 = vld [vmem:[%s6884_s25 + $0x84] sm:$0xf] }
  0x98   : > { %v2406_v2 = vshll.u32 %v5541_v25, 16  ;;  %v2412_v17 = vshll.u32 %v7759_v44, 16  ;;  %v2416_v11 = vshrl.u32 %v7759_v44, 16  ;;  %v7771_v38 = vrot.slane %v2347_v22, 4  ;;  %v6738_v25 = vld [vmem:[%s6884_s25 + $0x24] sm:$0xff]  }
  0x99   : > { %v7773_v46 = vrot.slane %v2361_v24, 4  ;;  %v2405_v9 = vrot.slane %v2403_v48, 4  ;;  %v9594_v51 = vcombine.low %v9577_v43, %v9576_v40  ;;  %v2271_v22 = vsel %vm6915_vm2, %v7677_v20, %v7605_v50 }
  0x9a   : > { %6346 = vmatmul.mubr.bf16.gmra.mxu0 %v5449_v55  ;;  %v2371_v55 = vor.u32 %v2370_v49, %v7751_v21  ;;  %v2408_v59 = vrot.slane %v2406_v2, 5  ;;  %v7779_v57 = vrot.slane %v2412_v17, 5  ;;  %v2418_v18 = vrot.slane %v2416_v11, 4  ;;  %v7828_v17 = vld [vmem:[%s6884_s25 + $0x8c] sm:$0x1] }
  0x9b   : > { %6413 = vmatprep.mubr.bf16.mxu0 %v5562_v14  ;;  %v2385_v14 = vor.u32 %v2384_v35, %v2381_v3  ;;  %v2395_v24 = vor.u32 %v2394_v29, %v7763_v53  ;;  %v2398_v49 = vshll.u32 %v7755_v62, 16  ;;  %v2422_v40 = vshll.u32 %v7766_v26, 16  ;;  %v7802_v3 = vld [vmem:[%s6884_s25 + $0x88] sm:$0xf]  ;;  %v6735_v35 = vld [vmem:[%s6884_s25 + $0x18] sm:$0xff]  }
  0x9c   : > { %v2281_v43 = vsel %vm6915_vm2, %v7679_v1, %v7660_v12  ;;  %v2305_v50 = vsel %vm6915_vm2, %v7696_v6, %v7681_v13  ;;  %v2409_v20 = vor.u32 %v2408_v59, %v2405_v9  ;;  %v6741_v12 = vld [vmem:[%s9535_s1 + $0x1b0] sm:$0xff]   ;;  %v7809_v1 = vrot.slane %v2374_v37, 5  ;;  %v7833_v11 = vld [vmem:[%s9535_s1 + $0x1a8] sm:$0xff]  }
  0x9d   : > { %6298 = vmatmul.mubr.bf16.gmra.mxu1 %v9594_v51  ;;  %v2430_v29 = vshll.u32 %v5544_v19, 16  ;;  %v6740_v13 = vld [vmem:[%s9535_s1 + $0x170] sm:$0xff]   ;;  %v2319_v6 = vsel %vm6915_vm2, %v7739_v28, %v7672_v63  ;;  %v2329_v48 = vsel %vm6915_vm2, %v7744_v47, %v7729_v30  ;;  %v7823_v37 = vrot.slane %v2371_v55, 4 }
  0x9e   : > { %6365 = vmatprep.mubr.bf16.mxu1 %v6734_v52  ;;  %v2295_v52 = vsel %vm6915_vm2, %v7687_v58, %v7631_v60  ;;  %v2419_v60 = vor.u32 %v2418_v18, %v7779_v57  ;;  %v2427_v58 = vshrl.u32 %v5544_v19, 16  ;;  %v7825_v2 = vrot.slane %v2385_v14, 4  ;;  %v5547_v14 = vld [vmem:[%s6884_s25 + $0x90] sm:$0xf]  ;;  %v7856_v59 = vld [vmem:[%s6884_s25 + $0x94] sm:$0xf] }
  0x9f   : > { %v7835_v63 = vrot.slane %v2395_v24, 4  ;;  %v7837_v28 = vrot.slane %v2398_v49, 5  ;;  %v2436_v30 = vshll.u32 %v7802_v3, 16  ;;  %v2440_v47 = vshrl.u32 %v7802_v3, 16  ;;  %9595 = vst [vmem:[#allocation6_spill] sm:$0xff] %v7856_v59 }
  0xa0   : > { %v2353_v55 = vsel %vm6915_vm2, %v7771_v38, %v7747_v5  ;;  %v7850_v9 = vrot.slane %v2409_v20, 4  ;;  %v7852_v51 = vrot.slane %v2422_v40, 5  ;;  %v2432_v18 = vrot.slane %v2430_v29, 5  ;;  %v6744_v5 = vld [vmem:[%s9535_s1 + $0x168] sm:$0xff]  }
  0xa1   : > { %v2454_v38 = vshll.u32 %v5547_v14, 16  ;;  %v2460_v24 = vshll.u32 %v7856_v59, 16  ;;  %v2464_v49 = vshrl.u32 %v7856_v59, 16  ;;  %v5565_v40 = vcombine.low %v2271_v22, %v2281_v43 }
  0xa2   : > { %6414 = vmatmul.mubr.bf16.vlgmr.msra.gmra.mxu0 %v5563_v4  ;;  %v2343_v4 = vsel %vm6915_vm2, %v7761_v33, %v7706_v7  ;;  %v2446_v7 = vshll.u32 %v7828_v17, 16  ;;  %v2451_v33 = vshrl.u32 %v5547_v14, 16  ;;  %v5566_v20 = vcombine.low %v2295_v52, %v2305_v50 }
  0xa3   : > { %6494 = vmatpush3.bf16.msra.mxu0 %v7558_v15  ;;  %6417 = vmatprep.mubr.bf16.mxu0 %v5564_v54  ;;  %v7858_v15 = vrot.slane %v2419_v60, 4  ;;  %v2429_v54 = vrot.slane %v2427_v58, 4  ;;  %v7867_v19 = vrot.slane %v2436_v30, 5  ;;  %v6739_v60 = vld [vmem:[%s6884_s25 + $0x30] sm:$0xff]   ;;  %v6749_v58 = vld [vmem:[%s9535_s1 + $0x1a0] sm:$0xff]   ;;  %v2456_v14 = vrot.slane %v2454_v38, 5 }
  0xa4   : > { %6495 = vmatprep.subr.bf16.mxu0 %v6741_v12  ;;  %v2453_v29 = vrot.slane %v2451_v33, 4  ;;  %v2466_v22 = vrot.slane %v2464_v49, 4  ;;  %v7875_v43 = vcombine.low %v2319_v6, %v2329_v48  ;;  %v7878_v52 = vcombine.low %v2343_v4, %v2353_v55  ;;  %v5550_v30 = vld [vmem:[%s6884_s25 + $0x9c] sm:$0xf]  ;;  %v7900_v4 = vld [vmem:[%s6884_s25 + $0xa4] sm:$0x1] }
  0xa5   : > { %6366 = vmatmul.mubr.bf16.vlgmr.msra.gmra.mxu1 %v6735_v35  ;;  %v2442_v35 = vrot.slane %v2440_v47, 4  ;;  %v2433_v48 = vor.u32 %v2432_v18, %v2429_v54  ;;  %v7897_v47 = vld [vmem:[%s6884_s25 + $0xa0] sm:$0xf]  ;;  %9598 = vst [vmem:[#allocation9_spill] sm:$0xff] %v7900_v4  ;;  %v2475_v55 = vshrl.u32 %v5550_v30, 16  ;;  %v2478_v33 = vshll.u32 %v5550_v30, 16 }
  0xa6   : > { %6446 = vmatpush3.bf16.msra.mxu1 %v7553_v36  ;;  %6369 = vmatprep.mubr.bf16.mxu1 %v6738_v25  ;;  %v7873_v36 = vrot.slane %v2460_v24, 5  ;;  %v2377_v25 = vsel %vm6915_vm2, %v7823_v37, %v7809_v1  ;;  %9597 = vst [vmem:[#allocation8_spill] sm:$0xff] %v7897_v47  ;;  %v6742_v38 = vld [vmem:[%s6884_s25 + $0x3c] sm:$0xff]   ;;  %v2484_v37 = vshll.u32 %v7897_v47, 16  ;;  %v2488_v24 = vshrl.u32 %v7897_v47, 16 }
  0xa7   : > { %6447 = vmatprep.subr.bf16.mxu1 %v6740_v13  ;;  %6496 = vmatpush3.bf16.msra.mxu0 %v6741_v12  ;;  %v7889_v12 = vld [vmem:[%s6884_s25 + $0x98] sm:$0x1]  ;;  %v2443_v1 = vor.u32 %v2442_v35, %v7867_v19  ;;  %v6748_v54 = vld [vmem:[%s9535_s1 + $0x160] sm:$0xff]   ;;  %v2457_v18 = vor.u32 %v2456_v14, %v2453_v29  ;;  %v2477_v30 = vrot.slane %v2475_v55, 4  ;;  %v2480_v49 = vrot.slane %v2478_v33, 5 }
  0xa8   : > { %6497 = vmatprep.subr.bf16.mxu0 %v7833_v11  ;;  %9596 = vst [vmem:[#allocation7_spill] sm:$0xff] %v7889_v12  ;;  %v2470_v35 = vshll.u32 %v7889_v12, 16  ;;  %v2490_v6 = vrot.slane %v2488_v24, 4  ;;  %v2494_v50 = vshll.u32 %v7900_v4, 16  ;;  %v5553_v47 = vld [vmem:[%s6884_s25 + $0xa8] sm:$0xf] }
  0xa9   : > { %v6752_v29 = vld [vmem:[%s9535_s1 + $0x158] sm:$0xff]   ;;  %v7923_v14 = vrot.slane %v2433_v48, 4  ;;  %v2499_v55 = vshrl.u32 %v5553_v47, 16  ;;  %v2502_v33 = vshll.u32 %v5553_v47, 16  ;;  %v7936_v4 = vld [vmem:[%s6884_s25 + $0xb0] sm:$0x1] }
  0xaa   : > { %6418 = vmatmul.mubr.bf16.gmra.mxu0 %v5565_v40  ;;  %6448 = vmatpush3.bf16.msra.mxu1 %v6740_v13  ;;  %v6753_v13 = vld [vmem:[%s9535_s1 + $0x198] sm:$0xff]   ;;  %v2467_v40 = vor.u32 %v2466_v22, %v7873_v36  ;;  %v7925_v22 = vrot.slane %v2446_v7, 5  ;;  %v6743_v48 = vld [vmem:[%s6884_s25 + $0x48] sm:$0xff]   ;;  %v7939_v7 = vrot.slane %v2443_v1, 4  ;;  %v7941_v12 = vrot.slane %v2457_v18, 4 }
  0xab   : > { %6421 = vmatprep.mubr.bf16.mxu0 %v5566_v20  ;;  %6449 = vmatprep.subr.bf16.mxu1 %v6744_v5  ;;  %v7916_v20 = vrot.slane %v2484_v37, 5  ;;  %v2481_v37 = vor.u32 %v2480_v49, %v2477_v30  ;;  %v7943_v59 = vrot.slane %v2470_v35, 5  ;;  %v6756_v49 = vld [vmem:[%s9535_s1 + $0x150] sm:$0xff]   ;;  %v7960_v18 = vrot.slane %v2502_v33, 5 }
  0xac   : > { %6498 = vmatpush3.bf16.msra.mxu0 %v7833_v11  ;;  %v7928_v11 = vld [vmem:[%s6884_s25 + $0xac] sm:$0xf]  ;;  %v2518_v35 = vshll.u32 %v7936_v4, 16 }
  0xad   : > { %6370 = vmatmul.mubr.bf16.gmra.mxu1 %v6739_v60  ;;  %6499 = vmatprep.subr.bf16.mxu0 %v6749_v58  ;;  %9599 = vst [vmem:[#allocation10_spill] sm:$0xff] %v7928_v11  ;;  %v2401_v60 = vsel %vm6915_vm2, %v7835_v63, %v7837_v28  ;;  %v2491_v24 = vor.u32 %v2490_v6, %v7916_v20  ;;  %v2508_v47 = vshll.u32 %v7928_v11, 16  ;;  %v6746_v63 = vld [vmem:[%s6884_s25 + $0x54] sm:$0xff]   ;;  %v7950_v28 = vrot.slane %v2467_v40, 4 }
  0xae   : > { %6373 = vmatprep.mubr.bf16.mxu1 %v6742_v38  ;;  %6450 = vmatpush3.bf16.msra.mxu1 %v6744_v5  ;;  %v6757_v5 = vld [vmem:[%s9535_s1 + $0x190] sm:$0xff]   ;;  %v7952_v6 = vrot.slane %v2494_v50, 5  ;;  %v7954_v38 = vrot.slane %v2499_v55, 4  ;;  %v2512_v1 = vshrl.u32 %v7928_v11, 16  ;;  %v7969_v40 = vrot.slane %v2481_v37, 4 }
  0xaf   : > { %6451 = vmatprep.subr.bf16.mxu1 %v6748_v54  ;;  %v7971_v30 = vrot.slane %v2491_v24, 4  ;;  %v5556_v55 = vld [vmem:[%s6884_s25 + $0xb4] sm:$0xf]  ;;  %v7975_v11 = vld [vmem:[%s6884_s25 + $0xb8] sm:$0xf]  ;;  %v6760_v24 = vld [vmem:[%s9535_s1 + $0x148] sm:$0xff]  }
  0xb0   : > { %6500 = vmatpush3.bf16.msra.mxu0 %v6749_v58  ;;  %v9600_v58 = vsel %vm6915_vm2, %v7773_v46, %v7751_v21  ;;  %9601 = vst [vmem:[#allocation11_spill] sm:$0xff] %v7975_v11  ;;  %v2415_v21 = vsel %vm6915_vm2, %v7850_v9, %v7779_v57  ;;  %v7987_v46 = vrot.slane %v2508_v47, 5  ;;  %v5559_v37 = vld [vmem:[%s6884_s25 + $0xc0] sm:$0xf]  ;;  %v2425_v57 = vsel %vm6915_vm2, %v7858_v15, %v7852_v51  ;;  %v8014_v47 = vld [vmem:[%s6884_s25 + $0xc4] sm:$0xf] }
  0xb1   : > { %6501 = vmatprep.subr.bf16.mxu0 %v6753_v13  ;;  %v5569_v50 = vcombine.low %v9600_v58, %v2377_v25  ;;  %v2523_v25 = vshrl.u32 %v5556_v55, 16  ;;  %v2439_v9 = vsel %vm6915_vm2, %v7923_v14, %v7867_v19  ;;  %9604 = vst [vmem:[#allocation13_spill] sm:$0xff] %v8014_v47  ;;  %v8017_v51 = vld [vmem:[%s6884_s25 + $0xc8] sm:$0x1]  ;;  %v2556_v58 = vshll.u32 %v8014_v47, 16 }
  0xb2   : > { %6422 = vmatmul.mubr.bf16.gmra.mxu0 %v7875_v43  ;;  %6452 = vmatpush3.bf16.msra.mxu1 %v6748_v54  ;;  %v9602_v43 = vsel %vm6915_vm2, %v7825_v2, %v7763_v53  ;;  %v2514_v54 = vrot.slane %v2512_v1, 4  ;;  %v2526_v53 = vshll.u32 %v5556_v55, 16  ;;  %v2532_v2 = vshll.u32 %v7975_v11, 16 }
  0xb3   : > { %6425 = vmatprep.mubr.bf16.mxu0 %v7878_v52  ;;  %v5570_v33 = vcombine.low %v9602_v43, %v2401_v60  ;;  %6453 = vmatprep.subr.bf16.mxu1 %v6752_v29  ;;  %v6761_v52 = vld [vmem:[%s9535_s1 + $0x188] sm:$0xff]   ;;  %v2536_v60 = vshrl.u32 %v7975_v11, 16  ;;  %v2525_v15 = vrot.slane %v2523_v25, 4  ;;  %v9605_v55 = vrot.slane %v7422_v32, 5 }
  0xb4   : > { %6502 = vmatpush3.bf16.msra.mxu0 %v6753_v13  ;;  %v2449_v13 = vsel %vm6915_vm2, %v7939_v7, %v7925_v22  ;;  %v2528_v19 = vrot.slane %v2526_v53, 5  ;;  %v8019_v14 = vrot.slane %v2532_v2, 5  ;;  %v2547_v22 = vshrl.u32 %v5559_v37, 16  ;;  %v6747_v2 = vld [vmem:[%s6884_s25 + $0x60] sm:$0xff]  }
  0xb5   : > { %6374 = vmatmul.mubr.bf16.gmra.mxu1 %v6743_v48  ;;  %6503 = vmatprep.subr.bf16.mxu0 %v6757_v5  ;;  %v8011_v48 = vld [vmem:[%s6884_s25 + $0xbc] sm:$0x1]  ;;  %v2538_v1 = vrot.slane %v2536_v60, 4  ;;  %v2550_v7 = vshll.u32 %v5559_v37, 16  ;;  %v8024_v43 = vrot.slane %v9605_v55, 4  ;;  %v8029_v25 = vrot.slane %v2518_v35, 5 }
  0xb6   : > { %9603 = vst [vmem:[#allocation12_spill] sm:$0xff] %v8011_v48  ;;  %6377 = vmatprep.mubr.bf16.mxu1 %v6746_v63  ;;  %6454 = vmatpush3.bf16.msra.mxu1 %v6752_v29  ;;  %v2505_v63 = vor.u32 %v7960_v18, %v7954_v38  ;;  %v2515_v29 = vor.u32 %v2514_v54, %v7987_v46  ;;  %v2560_v53 = vshrl.u32 %v8014_v47, 16  ;;  %v2542_v60 = vshll.u32 %v8011_v48, 16  ;;  %v6750_v38 = vld [vmem:[%s6884_s25 + $0x6c] sm:$0xff]   ;;  %v8049_v48 = vld [vmem:[%s6884_s25 + $0x18] sm:$0xe] }
  0xb7   : > { %6455 = vmatprep.subr.bf16.mxu1 %v6756_v49  ;;  %v2549_v37 = vrot.slane %v2547_v22, 4  ;;  %v2552_v11 = vrot.slane %v2550_v7, 5  ;;  %v8034_v55 = vrot.slane %v2556_v58, 5  ;;  %v2529_v18 = vor.u32 %v2528_v19, %v2525_v15  ;;  %v6764_v22 = vld [vmem:[%s9535_s1 + $0x140] sm:$0xff]   ;;  %v8046_v58 = vld [vmem:[%s6884_s25 + $0xc] sm:$0xe] }
  0xb8   : > { %6504 = vmatpush3.bf16.msra.mxu0 %v6757_v5  ;;  %v6765_v5 = vld [vmem:[%s9535_s1 + $0x180] sm:$0xff]   ;;  %v2539_v35 = vor.u32 %v2538_v1, %v8019_v14  ;;  %v2562_v54 = vrot.slane %v2560_v53, 4  ;;  %v2566_v47 = vshll.u32 %v8017_v51, 16  ;;  %v5571_v15 = vcombine.low %v2415_v21, %v2425_v57 }
  0xb9   : > { %6505 = vmatprep.subr.bf16.mxu0 %v6761_v52  ;;  %v2553_v7 = vor.u32 %v2552_v11, %v2549_v37  ;;  %v5572_v19 = vcombine.low %v2439_v9, %v2449_v13  ;;  %v8057_v1 = vrot.slane %v2505_v63, 4  ;;  %v8059_v11 = vrot.slane %v2515_v29, 4  ;;  %v6751_v9 = vld [vmem:[%s6884_s25 + $0x78] sm:$0xff]   ;;  %v6754_v37 = vld [vmem:[%s6884_s25 + $0x84] sm:$0xff]  }
  0xba   : > { %6426 = vmatmul.mubr.bf16.gmra.mxu0 %v5569_v50  ;;  %6456 = vmatpush3.bf16.msra.mxu1 %v6756_v49  ;;  %v8054_v49 = vld [vmem:[%s9535_s1 + $0x238] sm:$0xff]   ;;  %v2563_v50 = vor.u32 %v2562_v54, %v8034_v55  ;;  %v8068_v53 = vrot.slane %v2539_v35, 4  ;;  %v8070_v21 = vrot.slane %v2542_v60, 5  ;;  %v8076_v63 = vrot.slane %v2566_v47, 5  ;;  %v5589_v60 = vld [vmem:[%s6884_s25 + $0x30] sm:$0xe] }
  0xbb   : > { %6429 = vmatprep.mubr.bf16.mxu0 %v5570_v33  ;;  %6457 = vmatprep.subr.bf16.mxu1 %v6760_v24  ;;  %v8064_v33 = vld [vmem:[%s9535_s1 + $0x1f8] sm:$0xff]   ;;  %v8074_v13 = vrot.slane %v2553_v7, 4  ;;  %v2960_v29 = vrot.slane %v7496_v42, 5  ;;  %v9606_v35 = vld [vmem:[#allocation2_spill] sm:$0xff]  ;;  %v5605_v47 = vrot.slane %v5589_v60, 9  ;;  %v9609_v60 = vld [vmem:[#allocation3_spill] sm:$0xff] }
  0xbc   : > { %6506 = vmatpush3.bf16.msra.mxu0 %v6761_v52  ;;  %v8066_v52 = vrot.slane %v2529_v18, 4  ;;  %v9607_v7 = vld [vmem:[#allocation5_spill] sm:$0xff]  ;;  %v2981_v18 = vrot.slane %v7579_v0, 5  ;;  %v2497_v0 = vsel %vm6915_vm2, %v7971_v30, %v7952_v6  ;;  %v2995_v30 = vrot.slane %v7670_v41, 5 }
  0xbd   : > { %6378 = vmatmul.mubr.bf16.gmra.mxu1 %v6747_v2  ;;  %6507 = vmatprep.subr.bf16.mxu0 %v6765_v5  ;;  %v2978_v57 = vrot.slane %v9607_v7, 5  ;;  %v9608_v2 = vld [vmem:[#allocation4_spill] sm:$0xff] }
  0xbe   : > { %6381 = vmatprep.mubr.bf16.mxu1 %v6750_v38  ;;  %6458 = vmatpush3.bf16.msra.mxu1 %v6760_v24  ;;  %v8081_v24 = vrot.slane %v2563_v50, 4  ;;  %v2964_v38 = vrot.slane %v7513_v61, 5  ;;  %v2463_v50 = vsel %vm6915_vm2, %v7941_v12, %v7873_v36  ;;  %v2985_v54 = vrot.slane %v9608_v2, 5  ;;  %v5590_v12 = vld [vmem:[%s6884_s25 + $0x3c] sm:$0xe] }
  0xbf   : > { %6459 = vmatprep.subr.bf16.mxu1 %v6764_v22  ;;  %v8103_v7 = vsel %vm7226_vm5, %v5605_v47, %v2978_v57  ;;  %v2980_v36 = vrot.slane %v2978_v57, 4  ;;  %v5606_v2 = vrot.slane %v5590_v12, 9  ;;  %v6755_v47 = vld [vmem:[%s6884_s25 + $0x90] sm:$0xff]   ;;  %v3002_v12 = vrot.slane %v7690_v34, 5 }
  0xc0   : > { %6508 = vmatpush3.bf16.msra.mxu0 %v6765_v5  ;;  %v2473_v5 = vsel %vm6915_vm2, %v7950_v28, %v7943_v59  ;;  %v2487_v59 = vsel %vm6915_vm2, %v7969_v40, %v7916_v20  ;;  %v2987_v28 = vrot.slane %v2985_v54, 4  ;;  %v2992_v20 = vrot.slane %v7629_v39, 5 }
  0xc1   : > { %6589 = vmatprep.subr.bf16.mxu0 %v8054_v49  ;;  %v8117_v57 = vsel %vm7226_vm5, %v2980_v36, %v2981_v18  ;;  %v5574_v18 = vcombine.low %v2487_v59, %v2497_v0  ;;  %v8132_v39 = vsel %vm7226_vm5, %v5606_v2, %v2985_v54  ;;  %v2511_v36 = vsel %vm6915_vm2, %v8057_v1, %v7987_v46  ;;  %v5592_v54 = vld [vmem:[%s6884_s25 + $0x54] sm:$0xe] }
  0xc2   : > { %6430 = vmatmul.mubr.bf16.gmra.mxu0 %v5571_v15  ;;  %6460 = vmatpush3.bf16.msra.mxu1 %v6764_v22  ;;  %v2974_v15 = vrot.slane %v9609_v60, 5  ;;  %v2988_v22 = vrot.slane %v7608_v45, 5  ;;  %v5621_v40 = vcombine.low %v8103_v7, %v8117_v57  ;;  %v5591_v45 = vld [vmem:[%s6884_s25 + $0x48] sm:$0xe]  ;;  %v2521_v46 = vsel %vm6915_vm2, %v8059_v11, %v8029_v25  ;;  %v6775_v7 = vld [vmem:[%s6884_s25 + $0x54] sm:$0xff]  }
  0xc3   : > { %6433 = vmatprep.mubr.bf16.mxu0 %v5572_v19  ;;  %6541 = vmatprep.subr.bf16.mxu1 %v8064_v33  ;;  %v5573_v19 = vcombine.low %v2463_v50, %v2473_v5  ;;  %v2994_v50 = vrot.slane %v2992_v20, 4  ;;  %v6758_v5 = vld [vmem:[%s6884_s25 + $0x9c] sm:$0xff]   ;;  %v3006_v2 = vrot.slane %v7694_v31, 5  ;;  %v2535_v34 = vsel %vm6915_vm2, %v8066_v52, %v8019_v14 }
  0xc4   : > { %v8124_v6 = vsel %vm7226_vm5, %v2987_v28, %v2988_v22  ;;  %v5608_v28 = vrot.slane %v5592_v54, 9  ;;  %v5593_v22 = vld [vmem:[%s6884_s25 + $0x60] sm:$0xe]  ;;  %v3009_v25 = vrot.slane %v7742_v16, 5  ;;  %v2545_v11 = vsel %vm6915_vm2, %v8068_v53, %v8070_v21 }
  0xc5   : > { %6382 = vmatmul.mubr.bf16.gmra.mxu1 %v6751_v9  ;;  %v2999_v9 = vrot.slane %v7664_v10, 5  ;;  %v5622_v41 = vcombine.low %v8132_v39, %v8124_v6  ;;  %v8147_v59 = vsel %vm7226_vm5, %v2994_v50, %v2995_v30  ;;  %v3013_v14 = vrot.slane %v7734_v8, 5  ;;  %v5771_v6 = vld [vmem:[%s6884_s25 + $0x24] sm:$0xe] }
  0xc6   : > { %6385 = vmatprep.mubr.bf16.mxu1 %v6754_v37  ;;  %v5607_v37 = vrot.slane %v5591_v45, 9  ;;  %v3008_v45 = vrot.slane %v3006_v2, 4  ;;  %v5575_v52 = vcombine.low %v2511_v36, %v2521_v46  ;;  %v3016_v8 = vrot.slane %v7755_v62, 5  ;;  %v5595_v36 = vld [vmem:[%s6884_s25 + $0x78] sm:$0xe] }
  0xc7   : > { %v3001_v0 = vrot.slane %v2999_v9, 4  ;;  %v8174_v31 = vsel %vm7226_vm5, %v5608_v28, %v2999_v9  ;;  %v3015_v9 = vrot.slane %v3013_v14, 4  ;;  %v3020_v54 = vrot.slane %v7759_v44, 5 }
  0xc8   : > { %v8143_v10 = vsel %vm7226_vm5, %v5607_v37, %v2992_v20  ;;  %v5609_v20 = vrot.slane %v5593_v22, 9  ;;  %v8186_v53 = vsel %vm7226_vm5, %v3008_v45, %v3009_v25  ;;  %v5576_v37 = vcombine.low %v2535_v34, %v2545_v11 }
  0xc9   : > { %v8202_v46 = vsel %vm7226_vm5, %v3015_v9, %v3016_v8  ;;  %v5611_v62 = vrot.slane %v5595_v36, 9  ;;  %v3027_v28 = vrot.slane %v7802_v3, 5  ;;  %v3022_v44 = vrot.slane %v3020_v54, 4  ;;  %v6766_v8 = vld [vmem:[%s6884_s25 + $0x18] sm:$0xff]   ;;  %v9614_v36 = vld [vmem:[#allocation8_spill] sm:$0xff] }
  0xca   : > { %6434 = vmatmul.mubr.bf16.gmra.mxu0 %v5573_v19  ;;  %v8165_v19 = vsel %vm7226_vm5, %v3001_v0, %v3002_v12  ;;  %v8181_v16 = vsel %vm7226_vm5, %v5609_v20, %v3006_v2  ;;  %v3023_v0 = vrot.slane %v7766_v26, 5  ;;  %v3030_v26 = vrot.slane %v7828_v17, 5  ;;  %v5596_v20 = vld [vmem:[%s6884_s25 + $0x84] sm:$0xe] }
  0xcb   : > { %6437 = vmatprep.mubr.bf16.mxu0 %v5574_v18  ;;  %v5594_v18 = vld [vmem:[%s6884_s25 + $0x6c] sm:$0xe]  ;;  %v2559_v2 = vsel %vm6915_vm2, %v8074_v13, %v8034_v55  ;;  %v8214_v34 = vsel %vm7226_vm5, %v5611_v62, %v3020_v54  ;;  %v2569_v3 = vsel %vm6915_vm2, %v8081_v24, %v8076_v63  ;;  %v5612_v25 = vrot.slane %v5596_v20, 9  ;;  %v9612_v63 = vld [vmem:[#allocation6_spill] sm:$0xff] }
  0xcc   : > { %v5610_v21 = vrot.slane %v5594_v18, 9  ;;  %v8223_v17 = vsel %vm7226_vm5, %v3022_v44, %v3023_v0  ;;  %v3029_v11 = vrot.slane %v3027_v28, 4  ;;  %v9610_v45 = vrot.slane %v7422_v32, 5  ;;  %v5597_v18 = vld [vmem:[%s6884_s25 + $0x90] sm:$0xe]  ;;  %v6778_v62 = vld [vmem:[%s6884_s25 + $0x60] sm:$0xff]  }
  0xcd   : > { %6386 = vmatmul.mubr.bf16.gmra.mxu1 %v6755_v47  ;;  %v6759_v47 = vld [vmem:[%s6884_s25 + $0xa8] sm:$0xff]   ;;  %v9611_v55 = vrot.slane %v8046_v58, 9  ;;  %v3034_v24 = vrot.slane %v9612_v63, 5  ;;  %v8240_v32 = vsel %vm7226_vm5, %v5612_v25, %v3027_v28  ;;  %v3041_v54 = vrot.slane %v9614_v36, 5 }
  0xce   : > { %6389 = vmatprep.mubr.bf16.mxu1 %v6758_v5  ;;  %v6762_v5 = vld [vmem:[%s6884_s25 + $0xb4] sm:$0xff]   ;;  %v8198_v12 = vsel %vm7226_vm5, %v5610_v21, %v3013_v14  ;;  %v5588_v14 = vld [vmem:[%s6884_s25 + $0x24] sm:$0xe]  ;;  %v9613_v21 = vld [vmem:[#allocation7_spill] sm:$0xff]  ;;  %v8244_v58 = vsel %vm7226_vm5, %v3029_v11, %v3030_v26  ;;  %v5577_v0 = vcombine.low %v2559_v2, %v2569_v3  ;;  %v2961_v28 = vsel %vm7226_vm5, %v8024_v43, %v2960_v29 }
  0xcf   : > { %v2958_v13 = vsel %vm7226_vm5, %v9611_v55, %v9610_v45  ;;  %v3037_v9 = vrot.slane %v9613_v21, 5  ;;  %v3036_v44 = vrot.slane %v3034_v24, 4  ;;  %v6763_v45 = vld [vmem:[%s6884_s25 + $0xc0] sm:$0xff]   ;;  %v2966_v26 = vrot.slane %v2964_v38, 4  ;;  %v5598_v2 = vld [vmem:[%s6884_s25 + $0x9c] sm:$0xe] }
  0xd0   : > { %v3043_v3 = vrot.slane %v3041_v54, 4  ;;  %v5614_v11 = vrot.slane %v5598_v2, 9  ;;  %v9616_v55 = vld [vmem:[#allocation10_spill] sm:$0xff]  ;;  %v5599_v63 = vld [vmem:[%s6884_s25 + $0xa8] sm:$0xe]  ;;  %v5618_v21 = vcombine.low %v2958_v13, %v2961_v28  ;;  %v9620_v28 = vrot.slane %v8049_v48, 9 }
  0xd1   : > { %v8265_v25 = vsel %vm7226_vm5, %v3036_v44, %v3037_v9  ;;  %v3048_v42 = vrot.slane %v9616_v55, 5  ;;  %v8388_v43 = vld [vmem:[%s6884_s25 + $0x34] sm:$0xf] }
  0xd2   : > { %6438 = vmatmul.mubr.bf16.gmra.mxu0 %v5575_v52  ;;  %v8278_v9 = vsel %vm7226_vm5, %v5614_v11, %v3041_v54  ;;  %v5600_v54 = vld [vmem:[%s6884_s25 + $0xb4] sm:$0xe]  ;;  %v3880_v39 = vshll.u32 %v8388_v43, 16 }
  0xd3   : > { %6441 = vmatprep.mubr.bf16.mxu0 %v5576_v37  ;;  %v5613_v37 = vrot.slane %v5597_v18, 9  ;;  %v5604_v18 = vrot.slane %v5588_v14, 9  ;;  %v3050_v36 = vrot.slane %v3048_v42, 4  ;;  %v9617_v14 = vrot.slane %v9606_v35, 5 }
  0xd4   : > { %v5616_v55 = vrot.slane %v5600_v54, 9 }
  0xd5   : > { %6390 = vmatmul.mubr.bf16.gmra.mxu1 %v6759_v47  ;;  %v9615_v47 = vld [vmem:[#allocation9_spill] sm:$0xff]  ;;  %v2973_v44 = vrot.slane %v9617_v14, 4  ;;  %v9622_v61 = vmov %v9617_v14  ;;  %v3065_v14 = vrot.slane %v8017_v51, 5  ;;  %v5704_v51 = vld [vmem:[%s6884_s25 + $0x30] sm:$0xf] }
  0xd6   : > { %6393 = vmatprep.mubr.bf16.mxu1 %v6762_v5  ;;  %v3044_v20 = vrot.slane %v9615_v47, 5  ;;  %v8260_v5 = vsel %vm7226_vm5, %v5613_v37, %v3034_v24  ;;  %v3051_v24 = vrot.slane %v7936_v4, 5  ;;  %v5615_v37 = vrot.slane %v5599_v63, 9 }
  0xd7   : > { %v9621_v63 = vrot.slane %v7527_v23, 5  ;;  %v2972_v48 = vsel %vm7226_vm5, %v5604_v18, %v9622_v61  ;;  %v2975_v23 = vsel %vm7226_vm5, %v2973_v44, %v2974_v15  ;;  %v8358_v61 = vld [vmem:[%s6884_s25 + $0x28] sm:$0xf] }
  0xd8   : > { %v8272_v29 = vsel %vm7226_vm5, %v3043_v3, %v3044_v20  ;;  %v9618_v20 = vld [vmem:[#allocation11_spill] sm:$0xff]  ;;  %v8287_v4 = vsel %vm7226_vm5, %v5615_v37, %v3048_v42  ;;  %v8291_v13 = vsel %vm7226_vm5, %v3050_v36, %v3051_v24  ;;  %v2965_v3 = vsel %vm7226_vm5, %v9620_v28, %v2964_v38  ;;  %v5601_v37 = vld [vmem:[%s6884_s25 + $0xc0] sm:$0xe]  ;;  %v9623_v38 = vld [vmem:[#allocation13_spill] sm:$0xff] }
  0xd9   : > { %v3055_v2 = vrot.slane %v9618_v20, 5  ;;  %v2968_v24 = vsel %vm7226_vm5, %v2966_v26, %v9621_v63  ;;  %v3062_v36 = vrot.slane %v9623_v38, 5  ;;  %v5617_v18 = vrot.slane %v5601_v37, 9  ;;  %v6773_v20 = vld [vmem:[%s9535_s1 + $0x230] sm:$0xff]   ;;  %v5701_v63 = vld [vmem:[%s6884_s25 + $0x24] sm:$0xf] }
  0xda   : > { %6442 = vmatmul.mubr.bf16.gmra.mxu0 %v5577_v0  ;;  %v5619_v15 = vcombine.low %v2965_v3, %v2968_v24  ;;  %v5620_v54 = vcombine.low %v2972_v48, %v2975_v23  ;;  %v6772_v28 = vld [vmem:[%s9535_s1 + $0x1f0] sm:$0xff]   ;;  %v6771_v48 = vld [vmem:[%s6884_s25 + $0x3c] sm:$0xff]   ;;  %v3847_v37 = vshrl.u32 %v5701_v63, 16  ;;  %v6774_v38 = vld [vmem:[%s6884_s25 + $0x48] sm:$0xff]   ;;  %v3856_v23 = vshll.u32 %v8358_v61, 16 }
  0xdb   : > { %6509 = vmatprep.mubr.bf16.mxu0 %v6766_v8  ;;  %v9619_v8 = vld [vmem:[#allocation12_spill] sm:$0xff]  ;;  %v3057_v42 = vrot.slane %v3055_v2, 4  ;;  %v8322_v26 = vsel %vm7226_vm5, %v5616_v55, %v3055_v2  ;;  %v3064_v60 = vrot.slane %v3062_v36, 4  ;;  %v8335_v44 = vsel %vm7226_vm5, %v5617_v18, %v3062_v36  ;;  %v5698_v2 = vld [vmem:[%s6884_s25 + $0x18] sm:$0xf]  ;;  %v6777_v55 = vld [vmem:[%s9535_s1 + $0x228] sm:$0xff]  }
  0xdc   : > { %v3058_v0 = vrot.slane %v9619_v8, 5  ;;  %v3826_v24 = vshll.u32 %v5698_v2, 16  ;;  %v6776_v36 = vld [vmem:[%s9535_s1 + $0x1e8] sm:$0xff]   ;;  %v5700_v18 = vld [vmem:[%s6884_s25 + $0x20] sm:$0x1]  ;;  %v3849_v11 = vrot.slane %v3847_v37, 4 }
  0xdd   : > { %6394 = vmatmul.mubr.bf16.gmra.mxu1 %v6763_v45  ;;  %v6767_v45 = vld [vmem:[%s6884_s25 + $0x24] sm:$0xff]   ;;  %v8340_v8 = vsel %vm7226_vm5, %v3064_v60, %v3065_v14  ;;  %v3850_v14 = vshll.u32 %v5701_v63, 16  ;;  %v8378_v63 = vld [vmem:[%s6884_s25 + $0x2c] sm:$0x1]  ;;  %v3871_v37 = vshrl.u32 %v5704_v51, 16 }
  0xde   : > { %6461 = vmatprep.mubr.bf16.mxu1 %v5618_v21  ;;  %v6770_v21 = vld [vmem:[%s6884_s25 + $0x30] sm:$0xff]   ;;  %v8326_v35 = vsel %vm7226_vm5, %v3057_v42, %v3058_v0  ;;  %v8343_v0 = vld [vmem:[%s6884_s25 + $0x1c] sm:$0xf]  ;;  %v3823_v42 = vshrl.u32 %v5698_v2, 16 }
  0xdf   : > { %v4593_v3 = vrot.slane %v8343_v0, 5  ;;  %v3852_v47 = vrot.slane %v3850_v14, 5 }
  0xe0   : > { %v3825_v60 = vrot.slane %v3823_v42, 4  ;;  %v6780_v42 = vld [vmem:[%s9535_s1 + $0x1e0] sm:$0xff]  }
  0xe2   : > { %6510 = vmatmul.mubr.bf16.vlgmr.msra.gmra.mxu0 %v6767_v45  ;;  %v3836_v45 = vshrl.u32 %v8343_v0, 16 }
  0xe3   : > { %6590 = vmatpush3.bf16.msra.mxu0 %v8054_v49  ;;  %6513 = vmatprep.mubr.bf16.mxu0 %v6770_v21  ;;  %v3832_v49 = vshll.u32 %v8343_v0, 16  ;;  %v3860_v21 = vshrl.u32 %v8358_v61, 16 }
  0xe4   : > { %6591 = vmatprep.subr.bf16.mxu0 %v6773_v20 }
  0xe5   : > { %6462 = vmatmul.mubr.bf16.vlgmr.msra.gmra.mxu1 %v5619_v15  ;;  %v5770_v15 = vld [vmem:[%s6884_s25 + $0x18] sm:$0xe]  ;;  %v8373_v2 = vrot.slane %v3832_v49, 5  ;;  %v3842_v49 = vshll.u32 %v5700_v18, 16  ;;  %v3862_v0 = vrot.slane %v3860_v21, 4 }
  0xe6   : > { %6542 = vmatpush3.bf16.msra.mxu1 %v8064_v33  ;;  %6465 = vmatprep.mubr.bf16.mxu1 %v5620_v54  ;;  %v6781_v33 = vld [vmem:[%s9535_s1 + $0x220] sm:$0xff]   ;;  %v3838_v54 = vrot.slane %v3836_v45, 4  ;;  %v8385_v45 = vrot.slane %v3856_v23, 5  ;;  %v6785_v23 = vld [vmem:[%s9535_s1 + $0x218] sm:$0xff]  }
  0xe7   : > { %6543 = vmatprep.subr.bf16.mxu1 %v6772_v28  ;;  %6592 = vmatpush3.bf16.msra.mxu0 %v6773_v20  ;;  %v3828_v20 = vrot.slane %v3826_v24, 5 }
  0xe8   : > { %6593 = vmatprep.subr.bf16.mxu0 %v6777_v55  ;;  %v3839_v21 = vor.u32 %v3838_v54, %v8373_v2  ;;  %v3863_v54 = vor.u32 %v3862_v0, %v8385_v45 }
  0xea   : > { %6514 = vmatmul.mubr.bf16.gmra.mxu0 %v6771_v48  ;;  %6544 = vmatpush3.bf16.msra.mxu1 %v6772_v28  ;;  %v5786_v48 = vrot.slane %v5770_v15, 9  ;;  %v4596_v28 = vrot.slane %v5700_v18, 5  ;;  %v4595_v18 = vrot.slane %v4593_v3, 4  ;;  %v3866_v15 = vshll.u32 %v8378_v63, 16 }
  0xeb   : > { %6517 = vmatprep.mubr.bf16.mxu0 %v6774_v38  ;;  %6545 = vmatprep.subr.bf16.mxu1 %v6776_v36  ;;  %v3874_v38 = vshll.u32 %v5704_v51, 16  ;;  %v4600_v51 = vrot.slane %v8358_v61, 5  ;;  %v3884_v61 = vshrl.u32 %v8388_v43, 16 }
  0xec   : > { %6594 = vmatpush3.bf16.msra.mxu0 %v6777_v55  ;;  %v3829_v55 = vor.u32 %v3828_v20, %v3825_v60  ;;  %v6784_v60 = vld [vmem:[%s9535_s1 + $0x1d8] sm:$0xff]   ;;  %v8411_v20 = vrot.slane %v3842_v49, 5  ;;  %v6789_v49 = vld [vmem:[%s9535_s1 + $0x210] sm:$0xff]  }
  0xed   : > { %v8383_v24 = vpop.f32.mrf.mxu0  ;;  %6466 = vmatmul.mubr.bf16.gmra.mxu1 %v5621_v40  ;;  %6595 = vmatprep.subr.bf16.mxu0 %v6781_v33  ;;  %v8393_v14 = vpop.f32.mrf.mxu1  ;;  %v3853_v40 = vor.u32 %v3852_v47, %v3849_v11  ;;  %v3873_v47 = vrot.slane %v3871_v37, 4  ;;  %v3876_v11 = vrot.slane %v3874_v38, 5  ;;  %v8438_v37 = vld [vmem:[%s6884_s25 + $0x40] sm:$0xf]  ;;  %v4602_v50 = vrot.slane %v4600_v51, 4 }
  0xee   : > { %9624 = vst [vmem:[#allocation2_spill] sm:$0xff] %v8393_v14  ;;  %6469 = vmatprep.mubr.bf16.mxu1 %v5622_v41  ;;  %6546 = vmatpush3.bf16.msra.mxu1 %v6776_v36  ;;  %v8418_v41 = vsel %vm7226_vm5, %v5786_v48, %v4593_v3  ;;  %v5707_v36 = vld [vmem:[%s6884_s25 + $0x3c] sm:$0xf]  ;;  %v8427_v0 = vrot.slane %v3829_v55, 4  ;;  %v8433_v3 = vsel %vm7226_vm5, %v4595_v18, %v4596_v28  ;;  %v8435_v48 = vrot.slane %v3866_v15, 5  ;;  %v6788_v55 = vld [vmem:[%s9535_s1 + $0x1d0] sm:$0xff]  }
  0xef   : > { %v8404_v57 = vpop.f32.mrf.mxu0  ;;  %6547 = vmatprep.subr.bf16.mxu1 %v6780_v42  ;;  %v8422_v52 = vpop.f32.mrf.mxu1  ;;  %v8445_v22 = vrot.slane %v3853_v40, 4  ;;  %v4603_v28 = vrot.slane %v8378_v63, 5  ;;  %v3864_v18 = vrot.slane %v3863_v54, 4  ;;  %v8449_v15 = vld [vmem:[%s6884_s25 + $0x38] sm:$0x1]  ;;  %v3898_v30 = vshll.u32 %v5707_v36, 16 }
  0xf0   : > { %6596 = vmatpush3.bf16.msra.mxu0 %v6781_v33  ;;  %9625 = vst [vmem:[#allocation5_spill] sm:$0xff] %v8422_v52  ;;  %v8429_v33 = vrot.slane %v3839_v21, 4  ;;  %v5787_v21 = vrot.slane %v5771_v6, 9  ;;  %v3877_v1 = vor.u32 %v3876_v11, %v3873_v47  ;;  %v8453_v52 = vrot.slane %v3884_v61, 4  ;;  %v5772_v40 = vld [vmem:[%s6884_s25 + $0x30] sm:$0xe] }
  0xf1   : > { %6597 = vmatprep.subr.bf16.mxu0 %v6785_v23  ;;  %v8440_v38 = vpop.f32.mrf.mxu0  ;;  %v3904_v6 = vshll.u32 %v8438_v37, 16  ;;  %v3908_v63 = vshrl.u32 %v8438_v37, 16  ;;  %v8461_v54 = vpop.f32.mrf.mxu1  ;;  %v9628_v11 = vcombine.low %v8174_v31, %v8165_v19  ;;  %v6779_v61 = vld [vmem:[%s6884_s25 + $0x6c] sm:$0xff]   ;;  %v8494_v19 = vsel %vm7226_vm5, %v4602_v50, %v4603_v28  ;;  %v8512_v28 = vld [vmem:[%s6884_s25 + $0x44] sm:$0x1] }
  0xf2   : > { %6518 = vmatmul.mubr.bf16.gmra.mxu0 %v6775_v7  ;;  %6548 = vmatpush3.bf16.msra.mxu1 %v6780_v42  ;;  %v8451_v7 = vrot.slane %v3880_v39, 5  ;;  %v3895_v42 = vshrl.u32 %v5707_v36, 16  ;;  %9627 = vst [vmem:[#allocation4_spill] sm:$0xff] %v8461_v54  ;;  %v3835_v39 = vsel %vm6915_vm2, %v8427_v0, %v8373_v2  ;;  %v3845_v47 = vsel %vm6915_vm2, %v8429_v33, %v8411_v20  ;;  %v6782_v36 = vld [vmem:[%s6884_s25 + $0x78] sm:$0xff]   ;;  %v8505_v33 = vld [vmem:[%s6884_s25 + $0x4c] sm:$0xf] }
  0xf3   : > { %6521 = vmatprep.mubr.bf16.mxu0 %v6778_v62  ;;  %6549 = vmatprep.subr.bf16.mxu1 %v6784_v60  ;;  %v9626_v62 = vcombine.low %v8143_v10, %v8147_v59  ;;  %v4607_v59 = vrot.slane %v8388_v43, 5  ;;  %v3859_v2 = vsel %vm6915_vm2, %v8445_v22, %v8385_v45  ;;  %v8490_v20 = vsel %vm7226_vm5, %v5787_v21, %v4600_v51  ;;  %v5710_v43 = vld [vmem:[%s6884_s25 + $0x48] sm:$0xf]  ;;  %v8516_v54 = vpop.f32.mrf.mxu1  ;;  %v5773_v14 = vld [vmem:[%s6884_s25 + $0x3c] sm:$0xe] }
  0xf4   : > { %6598 = vmatpush3.bf16.msra.mxu0 %v6785_v23  ;;  %v6793_v23 = vld [vmem:[%s9535_s1 + $0x208] sm:$0xff]   ;;  %v3890_v31 = vshll.u32 %v8449_v15, 16  ;;  %v3869_v22 = vsel %vm6915_vm2, %v3864_v18, %v8435_v48  ;;  %v5788_v45 = vrot.slane %v5772_v40, 9  ;;  %v3897_v0 = vrot.slane %v3895_v42, 4  ;;  %9630 = vst [vmem:[#allocation6_spill] sm:$0xff] %v8516_v54  ;;  %v6796_v42 = vld [vmem:[%s9535_s1 + $0x1c0] sm:$0xff]  }
  0xf5   : > { %6470 = vmatmul.mubr.bf16.gmra.mxu1 %v9626_v62  ;;  %6599 = vmatprep.subr.bf16.mxu0 %v6789_v49  ;;  %v8482_v62 = vpop.f32.mrf.mxu0  ;;  %v3900_v51 = vrot.slane %v3898_v30, 5  ;;  %v8507_v50 = vrot.slane %v3877_v1, 4  ;;  %v3887_v21 = vor.u32 %v8453_v52, %v8451_v7  ;;  %v3910_v10 = vrot.slane %v3908_v63, 4  ;;  %v6797_v30 = vld [vmem:[%s9535_s1 + $0x200] sm:$0xff]  }
  0xf6   : > { %6473 = vmatprep.mubr.bf16.mxu1 %v9628_v11  ;;  %6550 = vmatpush3.bf16.msra.mxu1 %v6784_v60  ;;  %9629 = vst [vmem:[#allocation3_spill] sm:$0xff] %v8482_v62  ;;  %v6792_v60 = vld [vmem:[%s9535_s1 + $0x1c8] sm:$0xff]   ;;  %v8514_v11 = vrot.slane %v3904_v6, 5  ;;  %v4609_v48 = vrot.slane %v4607_v59, 4  ;;  %v3919_v1 = vshrl.u32 %v5710_v43, 16  ;;  %v3922_v18 = vshll.u32 %v5710_v43, 16 }
  0xf7   : > { %6551 = vmatprep.subr.bf16.mxu1 %v6788_v55  ;;  %v8527_v40 = vcombine.low %v3835_v39, %v3845_v47  ;;  %v3932_v63 = vshrl.u32 %v8505_v33, 16  ;;  %v8535_v43 = vrot.slane %v3890_v31, 5  ;;  %v3914_v54 = vshll.u32 %v8512_v28, 16  ;;  %v5713_v39 = vld [vmem:[%s6884_s25 + $0x54] sm:$0xf]  ;;  %v6783_v6 = vld [vmem:[%s6884_s25 + $0x84] sm:$0xff]  }
  0xf8   : > { %6600 = vmatpush3.bf16.msra.mxu0 %v6789_v49  ;;  %v4610_v49 = vrot.slane %v8449_v15, 5  ;;  %v8522_v52 = vpop.f32.mrf.mxu0  ;;  %v3928_v15 = vshll.u32 %v8505_v33, 16  ;;  %v4614_v31 = vrot.slane %v8438_v37, 5  ;;  %v9634_v37 = vcombine.low %v8198_v12, %v8202_v46  ;;  %v6786_v47 = vld [vmem:[%s6884_s25 + $0x90] sm:$0xff]  }
  0xf9   : > { %6601 = vmatprep.subr.bf16.mxu0 %v6793_v23  ;;  %9631 = vst [vmem:[#allocation7_spill] sm:$0xff] %v8522_v52 }
  0xfa   : > { %6522 = vmatmul.mubr.bf16.gmra.mxu0 %v6779_v61  ;;  %6552 = vmatpush3.bf16.msra.mxu1 %v6788_v55  ;;  %v8533_v61 = vcombine.low %v3859_v2, %v3869_v22  ;;  %v3901_v55 = vor.u32 %v3900_v51, %v3897_v0  ;;  %v3911_v2 = vor.u32 %v3910_v10, %v8514_v11  ;;  %v8551_v22 = vld [vmem:[%s6884_s25 + $0x58] sm:$0xf]  ;;  %v8558_v51 = vrot.slane %v3887_v21, 4 }
  0xfb   : > { %6525 = vmatprep.mubr.bf16.mxu0 %v6782_v36  ;;  %6553 = vmatprep.subr.bf16.mxu1 %v6792_v60  ;;  %v8546_v36 = vsel %vm7226_vm5, %v5788_v45, %v4607_v59  ;;  %v9632_v0 = vcombine.low %v8181_v16, %v8186_v53  ;;  %v8562_v59 = vsel %vm7226_vm5, %v4609_v48, %v4610_v49  ;;  %v3921_v45 = vrot.slane %v3919_v1, 4  ;;  %v8569_v16 = vpop.f32.mrf.mxu0  ;;  %v5712_v1 = vld [vmem:[%s6884_s25 + $0x50] sm:$0x1] }
  0xfc   : > { %6602 = vmatpush3.bf16.msra.mxu0 %v6793_v23  ;;  %v8556_v23 = vpop.f32.mrf.mxu1  ;;  %v3924_v10 = vrot.slane %v3922_v18, 5  ;;  %9635 = vst [vmem:[#allocation9_spill] sm:$0xff] %v8569_v16  ;;  %v5789_v53 = vrot.slane %v5773_v14, 9  ;;  %v3934_v21 = vrot.slane %v3932_v63, 4  ;;  %v3902_v48 = vrot.slane %v3901_v55, 4 }
  0xfd   : > { %6474 = vmatmul.mubr.bf16.gmra.mxu1 %v9632_v0  ;;  %9633 = vst [vmem:[#allocation8_spill] sm:$0xff] %v8556_v23  ;;  %6603 = vmatprep.subr.bf16.mxu0 %v6797_v30  ;;  %v8571_v0 = vrot.slane %v3928_v15, 5  ;;  %v3943_v23 = vshrl.u32 %v5713_v39, 16  ;;  %v3916_v49 = vrot.slane %v3914_v54, 5  ;;  %v3946_v18 = vshll.u32 %v5713_v39, 16  ;;  %v8587_v39 = vpop.f32.mrf.mxu0 }
  0xfe   : > { %6477 = vmatprep.mubr.bf16.mxu1 %v9634_v37  ;;  %6554 = vmatpush3.bf16.msra.mxu1 %v6792_v60  ;;  %v3952_v52 = vshll.u32 %v8551_v22, 16  ;;  %v3912_v12 = vrot.slane %v3911_v2, 4  ;;  %v4616_v46 = vrot.slane %v4614_v31, 4  ;;  %v4617_v37 = vrot.slane %v8512_v28, 5  ;;  %v8577_v60 = vpop.f32.mrf.mxu1  ;;  %v5716_v55 = vld [vmem:[%s6884_s25 + $0x60] sm:$0xf] }
  0xff   : > { %6555 = vmatprep.subr.bf16.mxu1 %v6796_v42  ;;  %v3956_v14 = vshrl.u32 %v8551_v22, 16  ;;  %9636 = vst [vmem:[#allocation10_spill] sm:$0xff] %v8577_v60  ;;  %v3893_v15 = vsel %vm6915_vm2, %v8558_v51, %v8535_v43  ;;  %v3925_v63 = vor.u32 %v3924_v10, %v3921_v45  ;;  %v3935_v28 = vor.u32 %v3934_v21, %v8571_v0  ;;  %v5774_v60 = vld [vmem:[%s6884_s25 + $0x48] sm:$0xe] }
 0x100   : > { %6604 = vmatpush3.bf16.msra.mxu0 %v6797_v30  ;;  %v4621_v30 = vrot.slane %v8505_v33, 5  ;;  %v3938_v2 = vshll.u32 %v5712_v1, 16  ;;  %v3945_v16 = vrot.slane %v3943_v23, 4  ;;  %v3948_v62 = vrot.slane %v3946_v18, 5  ;;  %v8612_v10 = vpop.f32.mrf.mxu1 }
 0x101   : > { %v3907_v43 = vsel %vm6915_vm2, %v3902_v48, %v8514_v11  ;;  %v8596_v33 = vsel %vm7226_vm5, %v5789_v53, %v4614_v31  ;;  %v3917_v51 = vsel %vm6915_vm2, %v3912_v12, %v3916_v49  ;;  %v8604_v23 = vsel %vm7226_vm5, %v4616_v46, %v4617_v37  ;;  %9638 = vst [vmem:[#allocation11_spill] sm:$0xff] %v8612_v10  ;;  %v8615_v49 = vld [vmem:[%s6884_s25 + $0x64] sm:$0xf]  ;;  %v6787_v12 = vld [vmem:[%s6884_s25 + $0x9c] sm:$0xff]   ;;  %v8621_v46 = vpop.f32.mrf.mxu0 }
 0x102   : > { %6526 = vmatmul.mubr.bf16.gmra.mxu0 %v6783_v6  ;;  %6556 = vmatpush3.bf16.msra.mxu1 %v6796_v42  ;;  %v8598_v6 = vrot.slane %v3952_v52, 5  ;;  %v3958_v42 = vrot.slane %v3956_v14, 4  ;;  %v3967_v45 = vshrl.u32 %v5716_v55, 16  ;;  %v3970_v11 = vshll.u32 %v5716_v55, 16  ;;  %v6790_v55 = vld [vmem:[%s6884_s25 + $0xa8] sm:$0xff]  }
 0x103   : > { %6529 = vmatprep.mubr.bf16.mxu0 %v6786_v47  ;;  %v8607_v47 = vld [vmem:[%s6884_s25 + $0x5c] sm:$0x1]  ;;  %v9637_v31 = vcombine.low %v8214_v34, %v8223_v17  ;;  %v3926_v52 = vrot.slane %v3925_v63, 4  ;;  %v5790_v53 = vrot.slane %v5774_v60, 9  ;;  %v4623_v21 = vrot.slane %v4621_v30, 4 }
 0x104   : > { %v4624_v48 = vrot.slane %v5712_v1, 5  ;;  %v9639_v18 = vcombine.low %v8240_v32, %v8244_v58  ;;  %v3936_v37 = vrot.slane %v3935_v28, 4  ;;  %v3940_v14 = vrot.slane %v3938_v2, 5  ;;  %v5775_v63 = vld [vmem:[%s6884_s25 + $0x54] sm:$0xe]  ;;  %v8639_v28 = vpop.f32.mrf.mxu1 }
 0x105   : > { %6478 = vmatmul.mubr.bf16.gmra.mxu1 %v9637_v31  ;;  %v3949_v34 = vor.u32 %v3948_v62, %v3945_v16  ;;  %v4628_v17 = vrot.slane %v8551_v22, 5  ;;  %v3959_v60 = vor.u32 %v3958_v42, %v8598_v6  ;;  %v3962_v1 = vshll.u32 %v8607_v47, 16  ;;  %9641 = vst [vmem:[#allocation12_spill] sm:$0xff] %v8639_v28  ;;  %v5776_v62 = vld [vmem:[%s6884_s25 + $0x60] sm:$0xe] }
 0x106   : > { %6481 = vmatprep.mubr.bf16.mxu1 %v9639_v18  ;;  %v3969_v31 = vrot.slane %v3967_v45, 4  ;;  %v3972_v54 = vrot.slane %v3970_v11, 5  ;;  %v9640_v32 = vsel %vm6915_vm2, %v8507_v50, %v8451_v7  ;;  %v3976_v22 = vshll.u32 %v8615_v49, 16 }
 0x107   : > { %v8633_v58 = vcombine.low %v9640_v32, %v3893_v15  ;;  %v3980_v16 = vshrl.u32 %v8615_v49, 16  ;;  %v8641_v2 = vcombine.low %v3907_v43, %v3917_v51  ;;  %v3931_v42 = vsel %vm6915_vm2, %v3926_v52, %v8571_v0  ;;  %v5719_v15 = vld [vmem:[%s6884_s25 + $0x6c] sm:$0xf]  ;;  %v8659_v32 = vld [vmem:[%s6884_s25 + $0x70] sm:$0xf] }
 0x108   : > { %v8648_v7 = vsel %vm7226_vm5, %v5790_v53, %v4621_v30  ;;  %v8652_v50 = vsel %vm7226_vm5, %v4623_v21, %v4624_v48  ;;  %v8655_v45 = vpop.f32.mrf.mxu0  ;;  %v3950_v43 = vrot.slane %v3949_v34, 4  ;;  %v5791_v51 = vrot.slane %v5775_v63, 9  ;;  %v5718_v53 = vld [vmem:[%s6884_s25 + $0x68] sm:$0x1] }
 0x109   : > { %9642 = vst [vmem:[#allocation13_spill] sm:$0xff] %v8655_v45  ;;  %v4630_v11 = vrot.slane %v4628_v17, 4  ;;  %v4631_v18 = vrot.slane %v8607_v47, 5  ;;  %v3941_v0 = vsel %vm6915_vm2, %v3936_v37, %v3940_v14  ;;  %v3960_v30 = vrot.slane %v3959_v60, 4  ;;  %v5778_v45 = vld [vmem:[%s6884_s25 + $0x78] sm:$0xe] }
 0x10a   : > { %6530 = vmatmul.mubr.bf16.gmra.mxu0 %v6787_v12  ;;  %v3964_v52 = vrot.slane %v3962_v1, 5  ;;  %v3973_v21 = vor.u32 %v3972_v54, %v3969_v31  ;;  %v8664_v48 = vrot.slane %v3976_v22, 5  ;;  %v3982_v12 = vrot.slane %v3980_v16, 4  ;;  %v6791_v31 = vld [vmem:[%s6884_s25 + $0xb4] sm:$0xff]  }
 0x10b   : > { %6533 = vmatprep.mubr.bf16.mxu0 %v6790_v55  ;;  %v3991_v34 = vshrl.u32 %v5719_v15, 16  ;;  %v3994_v63 = vshll.u32 %v5719_v15, 16  ;;  %v9643_v47 = vcombine.low %v8260_v5, %v8265_v25  ;;  %v4635_v14 = vrot.slane %v8615_v49, 5  ;;  %v8681_v5 = vpop.f32.mrf.mxu0 }
 0x10c   : > { %v4000_v54 = vshll.u32 %v8659_v32, 16  ;;  %v4004_v60 = vshrl.u32 %v8659_v32, 16  ;;  %v9645_v1 = vcombine.low %v8278_v9, %v8272_v29  ;;  %9646 = vst [vmem:[#allocation15_spill] sm:$0xff] %v8681_v5  ;;  %v8683_v25 = vcombine.low %v3931_v42, %v3941_v0  ;;  %v5722_v29 = vld [vmem:[%s6884_s25 + $0x78] sm:$0xf]  ;;  %v6794_v9 = vld [vmem:[%s6884_s25 + $0xc0] sm:$0xff]  }
 0x10d   : > { %6482 = vmatmul.mubr.bf16.gmra.mxu1 %v9643_v47  ;;  %v8670_v55 = vpop.f32.mrf.mxu1  ;;  %v3955_v22 = vsel %vm6915_vm2, %v3950_v43, %v8598_v6  ;;  %v8690_v49 = vsel %vm7226_vm5, %v5791_v51, %v4628_v17  ;;  %v8694_v16 = vsel %vm7226_vm5, %v4630_v11, %v4631_v18  ;;  %v3965_v15 = vsel %vm6915_vm2, %v3960_v30, %v3964_v52  ;;  %v8707_v43 = vld [vmem:[%s6884_s25 + $0x74] sm:$0x1]  ;;  %v8764_v5 = vld [vmem:[%s6884_s25 + $0x8c] sm:$0x1] }
 0x10e   : > { %9644 = vst [vmem:[#allocation14_spill] sm:$0xff] %v8670_v55  ;;  %6485 = vmatprep.mubr.bf16.mxu1 %v9645_v1  ;;  %v8700_v47 = vrot.slane %v3973_v21, 4  ;;  %v3986_v42 = vshll.u32 %v5718_v53, 16  ;;  %v5792_v0 = vrot.slane %v5776_v62, 9  ;;  %v8703_v1 = vld [vmem:[%s6884_s25 + $0x7c] sm:$0xf]  ;;  %v3983_v6 = vor.u32 %v3982_v12, %v8664_v48  ;;  %v8713_v21 = vpop.f32.mrf.mxu0 }
 0x10f   : > { %v4638_v17 = vrot.slane %v5718_v53, 5  ;;  %v3993_v51 = vrot.slane %v3991_v34, 4  ;;  %v3996_v11 = vrot.slane %v3994_v63, 5  ;;  %v8709_v18 = vpop.f32.mrf.mxu1  ;;  %v4637_v37 = vrot.slane %v4635_v14, 4  ;;  %9648 = vst [vmem:[#allocation17_spill] sm:$0xff] %v8713_v21 }
 0x110   : > { %9647 = vst [vmem:[#allocation16_spill] sm:$0xff] %v8709_v18  ;;  %v8711_v55 = vrot.slane %v4000_v54, 5  ;;  %v4006_v30 = vrot.slane %v4004_v60, 4  ;;  %v4015_v52 = vshrl.u32 %v5722_v29, 16  ;;  %v5777_v53 = vld [vmem:[%s6884_s25 + $0x6c] sm:$0xe]  ;;  %v8720_v18 = vcombine.low %v3955_v22, %v3965_v15 }
 0x111   : > { %v4018_v12 = vshll.u32 %v5722_v29, 16  ;;  %v4024_v34 = vshll.u32 %v8703_v1, 16  ;;  %v4028_v63 = vshrl.u32 %v8703_v1, 16  ;;  %v8722_v54 = vrot.slane %v3986_v42, 5  ;;  %v5725_v62 = vld [vmem:[%s6884_s25 + $0x84] sm:$0xf]  ;;  %v8743_v42 = vpop.f32.mrf.mxu1 }
 0x112   : > { %6534 = vmatmul.mubr.bf16.gmra.mxu0 %v6791_v31  ;;  %9649 = vst [vmem:[#allocation18_spill] sm:$0xff] %v8720_v18  ;;  %v8726_v60 = vsel %vm7226_vm5, %v5792_v0, %v4635_v14  ;;  %v4010_v31 = vshll.u32 %v8707_v43, 16  ;;  %v8734_v28 = vrot.slane %v3983_v6, 4  ;;  %v4642_v22 = vrot.slane %v8659_v32, 5  ;;  %v8738_v15 = vld [vmem:[%s6884_s25 + $0x88] sm:$0xf] }
 0x113   : > { %6537 = vmatprep.mubr.bf16.mxu0 %v6794_v9  ;;  %v3997_v9 = vor.u32 %v3996_v11, %v3993_v51  ;;  %v9650_v14 = vcombine.low %v8287_v4, %v8291_v13  ;;  %9651 = vst [vmem:[#allocation19_spill] sm:$0xff] %v8743_v42  ;;  %v6795_v0 = vld [vmem:[%s6884_s25 + $0xcc] sm:$0xff]   ;;  %v8748_v10 = vsel %vm7226_vm5, %v4637_v37, %v4638_v17  ;;  %v5793_v6 = vrot.slane %v5777_v53, 9  ;;  %v8751_v11 = vpop.f32.mrf.mxu0  ;;  %v8757_v4 = vld [vmem:[%s6884_s25 + $0x80] sm:$0x1] }
 0x114   : > { %v4007_v29 = vor.u32 %v4006_v30, %v8711_v55  ;;  %v4017_v51 = vrot.slane %v4015_v52, 4  ;;  %9652 = vst [vmem:[#allocation20_spill] sm:$0xff] %v8751_v11  ;;  %v9653_v32 = vcombine.low %v8322_v26, %v8326_v35  ;;  %v4020_v13 = vrot.slane %v4018_v12, 5 }
 0x115   : > { %6486 = vmatmul.mubr.bf16.gmra.mxu1 %v9650_v14  ;;  %v8759_v14 = vrot.slane %v4024_v34, 5  ;;  %v4030_v42 = vrot.slane %v4028_v63, 4  ;;  %v4039_v21 = vshrl.u32 %v5725_v62, 16  ;;  %v4012_v37 = vrot.slane %v4010_v31, 5 }
 0x116   : > { %6489 = vmatprep.mubr.bf16.mxu1 %v9653_v32  ;;  %v4645_v17 = vrot.slane %v8707_v43, 5  ;;  %v4042_v30 = vshll.u32 %v5725_v62, 16  ;;  %v4048_v52 = vshll.u32 %v8738_v15, 16  ;;  %v3998_v53 = vrot.slane %v3997_v9, 4  ;;  %v8767_v32 = vpop.f32.mrf.mxu1 }
 0x117   : > { %v4644_v11 = vrot.slane %v4642_v22, 4  ;;  %v4041_v26 = vrot.slane %v4039_v21, 4  ;;  %v4052_v35 = vshrl.u32 %v8738_v15, 16  ;;  %v4008_v12 = vrot.slane %v4007_v29, 4 }
 0x118   : > { %v4034_v34 = vshll.u32 %v8757_v4, 16  ;;  %v4044_v63 = vrot.slane %v4042_v30, 5  ;;  %v8770_v31 = vrot.slane %v4048_v52, 5  ;;  %v4021_v62 = vor.u32 %v4020_v13, %v4017_v51  ;;  %v5779_v52 = vld [vmem:[%s6884_s25 + $0x84] sm:$0xe] }
 0x119   : > { %v8772_v43 = vpop.f32.mrf.mxu0  ;;  %v4031_v9 = vor.u32 %v4030_v42, %v8759_v14  ;;  %v4649_v21 = vrot.slane %v8703_v1, 5  ;;  %v4054_v18 = vrot.slane %v4052_v35, 4  ;;  %v9654_v29 = vcombine.low %v8418_v41, %v8433_v3 }
 0x11a   : > { %6538 = vmatmul.mubr.bf16.gmra.mxu0 %v6795_v0  ;;  %v3989_v30 = vsel %vm6915_vm2, %v8734_v28, %v8722_v54  ;;  %v8788_v51 = vsel %vm7226_vm5, %v5793_v6, %v4642_v22  ;;  %v4058_v42 = vshll.u32 %v8764_v5, 16  ;;  %v4003_v41 = vsel %vm6915_vm2, %v3998_v53, %v8711_v55  ;;  %v5728_v54 = vld [vmem:[%s6884_s25 + $0x90] sm:$0xf] }
 0x11b   : > { %6605 = vmatprep.mubr.bf16.mxu0 %v9654_v29  ;;  %v8791_v1 = vpop.f32.mrf.mxu0  ;;  %v4045_v3 = vor.u32 %v4044_v63, %v4041_v26  ;;  %v4055_v13 = vor.u32 %v4054_v18, %v8770_v31  ;;  %v4656_v28 = vrot.slane %v8738_v15, 5  ;;  %v9656_v22 = vcombine.low %v8335_v44, %v8340_v8 }
 0x11c   : > { %v4013_v6 = vsel %vm6915_vm2, %v4008_v12, %v4012_v37  ;;  %v8809_v55 = vsel %vm7226_vm5, %v4644_v11, %v4645_v17  ;;  %v4036_v53 = vrot.slane %v4034_v34, 5  ;;  %v5794_v18 = vrot.slane %v5778_v45, 9  ;;  %v8818_v12 = vld [vmem:[%s6884_s25 + $0x94] sm:$0xf] }
 0x11d   : > { %v8800_v35 = vpop.f32.mrf.mxu1  ;;  %6490 = vmatmul.mubr.bf16.gmra.mxu1 %v9656_v22  ;;  %v8811_v26 = vpop.f32.mrf.mxu0  ;;  %v4022_v15 = vrot.slane %v4021_v62, 4  ;;  %v4032_v63 = vrot.slane %v4031_v9, 4  ;;  %v4651_v29 = vrot.slane %v4649_v21, 4  ;;  %v4652_v0 = vrot.slane %v8757_v4, 5 }
 0x11e   : > { %9655 = vst [vmem:[#allocation21_spill] sm:$0xff] %v8800_v35  ;;  %6557 = vmatprep.mubr.bf16.mxu1 %v8527_v40  ;;  %v4060_v8 = vrot.slane %v4058_v42, 5  ;;  %v5795_v37 = vrot.slane %v5779_v52, 9  ;;  %v4063_v11 = vshrl.u32 %v5728_v54, 16  ;;  %v4066_v17 = vshll.u32 %v5728_v54, 16 }
 0x11f   : > { %v8815_v44 = vpop.f32.mrf.mxu1  ;;  %v8820_v34 = vpop.f32.mrf.mxu0  ;;  %v4046_v45 = vrot.slane %v4045_v3, 4  ;;  %v4056_v22 = vrot.slane %v4055_v13, 4  ;;  %v4658_v40 = vrot.slane %v4656_v28, 4  ;;  %v4659_v62 = vrot.slane %v8764_v5, 5  ;;  %v8841_v54 = vld [vmem:[%s6884_s25 + $0x98] sm:$0x1] }
 0x120   : > { %9657 = vst [vmem:[#allocation22_spill] sm:$0xff] %v8815_v44  ;;  %v9659_v4 = vsel %vm6915_vm2, %v8700_v47, %v8664_v48  ;;  %v8832_v52 = vcombine.low %v4003_v41, %v4013_v6  ;;  %v8838_v13 = vsel %vm7226_vm5, %v5794_v18, %v4649_v21  ;;  %v4027_v48 = vsel %vm6915_vm2, %v4022_v15, %v8759_v14  ;;  %v5731_v41 = vld [vmem:[%s6884_s25 + $0x9c] sm:$0xf]  ;;  %v8858_v6 = vld [vmem:[%s6884_s25 + $0xa0] sm:$0xf] }
 0x121   : > { %v8823_v9 = vpop.f32.mrf.mxu1  ;;  %v8830_v42 = vcombine.low %v9659_v4, %v3989_v30  ;;  %v6319_v5 = vpop.f32.mrf.mxu0  ;;  %v4037_v47 = vsel %vm6915_vm2, %v4032_v63, %v4036_v53  ;;  %v8853_v30 = vsel %vm7226_vm5, %v4651_v29, %v4652_v0  ;;  %v4072_v21 = vshll.u32 %v8818_v12, 16  ;;  %v8945_v35 = vld [vmem:[%s6884_s25 + $0xb0] sm:$0x1] }
 0x122   : > { %9658 = vst [vmem:[#allocation23_spill] sm:$0xff] %v8823_v9  ;;  %v9660_v9 = vcombine.low %v8490_v20, %v8494_v19  ;;  %v9662_v20 = vcombine.low %v8546_v36, %v8562_v59  ;;  %v8867_v19 = vsel %vm7226_vm5, %v5795_v37, %v4656_v28  ;;  %v4065_v14 = vrot.slane %v4063_v11, 4  ;;  %v8882_v37 = vld [vmem:[%s6884_s25 + $0x90] sm:$0xe] }
 0x123   : > { %v8860_v18 = vpop.f32.mrf.mxu1  ;;  %v4068_v53 = vrot.slane %v4066_v17, 5  ;;  %v4076_v0 = vshrl.u32 %v8818_v12, 16  ;;  %v1593_v15 = vpop.f32.mrf.mxu0  ;;  %v4051_v63 = vsel %vm6915_vm2, %v4046_v45, %v8770_v31  ;;  %v4061_v29 = vsel %vm6915_vm2, %v4056_v22, %v4060_v8 }
 0x124   : > { %6606 = vmatmul.mubr.bf16.vlgmr.msra.gmra.mxu0 %v9660_v9  ;;  %9661 = vst [vmem:[#allocation24_spill] sm:$0xff] %v8860_v18  ;;  %v8877_v36 = vsel %vm7226_vm5, %v4658_v40, %v4659_v62  ;;  %v4082_v59 = vshll.u32 %v8841_v54, 16  ;;  %v4087_v11 = vshrl.u32 %v5731_v41, 16  ;;  %v4090_v17 = vshll.u32 %v5731_v41, 16 }
 0x125   : > { %6609 = vmatprep.mubr.bf16.mxu0 %v9662_v20  ;;  %v6271_v28 = vpop.f32.mrf.mxu1  ;;  %6558 = vmatmul.mubr.bf16.vlgmr.msra.gmra.mxu1 %v8533_v61  ;;  %v4096_v9 = vshll.u32 %v8858_v6, 16  ;;  %v4100_v31 = vshrl.u32 %v8858_v6, 16  ;;  %v6320_v45 = vpop.f32.mrf.mxu0  ;;  %v8888_v22 = vcombine.low %v4027_v48, %v4037_v47  ;;  %v8892_v40 = vrot.slane %v4072_v21, 5  ;;  %v8906_v61 = vld [vmem:[%s6884_s25 + $0xa4] sm:$0x1] }
 0x126   : > { %v1150_v8 = vadd.f32 %v6271_v28, %v8383_v24  ;;  %6561 = vmatprep.mubr.bf16.mxu1 %v8633_v58  ;;  %v8894_v4 = vcombine.low %v4051_v63, %v4061_v29  ;;  %v4069_v20 = vor.u32 %v4068_v53, %v4065_v14  ;;  %v4078_v24 = vrot.slane %v4076_v0, 4  ;;  %v5734_v28 = vld [vmem:[%s6884_s25 + $0xa8] sm:$0xf]  ;;  %v8911_v14 = vld [vmem:[%s6884_s25 + $0xac] sm:$0xf] }
 0x127   : > { %v1141_v62 = vpop.f32.mrf.mxu1  ;;  %v1596_v48 = vpop.f32.mrf.mxu0  ;;  %v8902_v47 = vrot.slane %v4082_v59, 5  ;;  %v5796_v21 = vrot.slane %v8882_v37, 9  ;;  %v4089_v29 = vrot.slane %v4087_v11, 4  ;;  %v4092_v18 = vrot.slane %v4090_v17, 5 }
 0x128   : > { %v8899_v3 = vadd.f32 %v6319_v5, %v1150_v8  ;;  %v1142_v58 = vadd.f32 %v1141_v62, %v8404_v57  ;;  %v8908_v44 = vrot.slane %v4096_v9, 5  ;;  %v4102_v41 = vrot.slane %v4100_v31, 4  ;;  %v9668_v62 = vld [vmem:[#allocation3_spill] sm:$0xff] }
 0x129   : > { %v6272_v63 = vpop.f32.mrf.mxu1  ;;  %v6323_v5 = vpop.f32.mrf.mxu0  ;;  %v9665_v0 = vcombine.low %v8596_v33, %v8604_v23  ;;  %v4111_v59 = vshrl.u32 %v5734_v28, 16  ;;  %v4114_v37 = vshll.u32 %v5734_v28, 16  ;;  %v9666_v11 = vcombine.low %v8648_v7, %v8652_v50 }
 0x12a   : > { %9663 = vst [vmem:[#allocation25_spill] sm:$0xff] %v8899_v3  ;;  %v8913_v53 = vadd.f32 %v1593_v15, %v1142_v58  ;;  %v1153_v57 = vadd.f32 %v6272_v63, %v8440_v38  ;;  %v8922_v17 = vrot.slane %v4069_v20, 4  ;;  %v4079_v15 = vor.u32 %v4078_v24, %v8892_v40  ;;  %v5781_v58 = vld [vmem:[%s6884_s25 + $0x9c] sm:$0xe] }
 0x12b   : > { %v1144_v8 = vpop.f32.mrf.mxu1  ;;  %v4663_v9 = vrot.slane %v8818_v12, 5  ;;  %v4106_v38 = vshll.u32 %v8906_v61, 16  ;;  %v1609_v23 = vpop.f32.mrf.mxu0  ;;  %v4666_v28 = vrot.slane %v8841_v54, 5  ;;  %v4120_v63 = vshll.u32 %v8911_v14, 16 }
 0x12c   : > { %9664 = vst [vmem:[#allocation26_spill] sm:$0xff] %v8913_v53  ;;  %6610 = vmatmul.mubr.bf16.gmra.mxu0 %v9665_v0  ;;  %v8927_v31 = vadd.f32 %v6320_v45, %v1153_v57  ;;  %v1145_v33 = vadd.f32 %v1144_v8, %v9668_v62  ;;  %v4093_v50 = vor.u32 %v4092_v18, %v4089_v29  ;;  %v4670_v12 = vrot.slane %v8858_v6, 5  ;;  %v9669_v57 = vld [vmem:[#allocation7_spill] sm:$0xff]  ;;  %v9670_v6 = vld [vmem:[#allocation9_spill] sm:$0xff] }
 0x12d   : > { %6613 = vmatprep.mubr.bf16.mxu0 %v9666_v11  ;;  %v6275_v7 = vpop.f32.mrf.mxu1  ;;  %6562 = vmatmul.mubr.bf16.gmra.mxu1 %v8641_v2  ;;  %v4103_v20 = vor.u32 %v4102_v41, %v8908_v44  ;;  %v4124_v45 = vshrl.u32 %v8911_v14, 16  ;;  %v6324_v8 = vpop.f32.mrf.mxu0  ;;  %v4113_v54 = vrot.slane %v4111_v59, 4  ;;  %v4116_v11 = vrot.slane %v4114_v37, 5 }
 0x12e   : > { %9667 = vst [vmem:[#allocation27_spill] sm:$0xff] %v8927_v31  ;;  %v8937_v24 = vadd.f32 %v1596_v48, %v1145_v33  ;;  %v1166_v0 = vadd.f32 %v6275_v7, %v9669_v57  ;;  %6565 = vmatprep.mubr.bf16.mxu1 %v8683_v25  ;;  %v4080_v31 = vrot.slane %v4079_v15, 4  ;;  %v4665_v2 = vrot.slane %v4663_v9, 4 }
 0x12f   : > { %v1157_v62 = vpop.f32.mrf.mxu1  ;;  %v4108_v18 = vrot.slane %v4106_v38, 5  ;;  %v5797_v29 = vrot.slane %v5781_v58, 9  ;;  %v1612_v3 = vpop.f32.mrf.mxu0  ;;  %v8947_v48 = vrot.slane %v4120_v63, 5  ;;  %v4126_v33 = vrot.slane %v4124_v45, 4 }
 0x130   : > { %v8941_v41 = vadd.f32 %v6323_v5, %v1166_v0  ;;  %v1158_v53 = vadd.f32 %v1157_v62, %v9670_v6  ;;  %v4094_v57 = vrot.slane %v4093_v50, 4  ;;  %v4104_v25 = vrot.slane %v4103_v20, 4 }
 0x131   : > { %v6276_v7 = vpop.f32.mrf.mxu1  ;;  %v4672_v59 = vrot.slane %v4670_v12, 4  ;;  %v4673_v37 = vrot.slane %v8906_v61, 5  ;;  %v6327_v38 = vpop.f32.mrf.mxu0  ;;  %v9671_v58 = vcombine.low %v8690_v49, %v8694_v16  ;;  %v8958_v63 = vsel %vm7226_vm5, %v5796_v21, %v4663_v9  ;;  %v5782_v21 = vld [vmem:[%s6884_s25 + $0xa8] sm:$0xe] }
 0x132   : > { %v8950_v15 = vadd.f32 %v1609_v23, %v1158_v53  ;;  %v1169_v5 = vadd.f32 %v6276_v7, %v8587_v39  ;;  %v4117_v50 = vor.u32 %v4116_v11, %v4113_v54  ;;  %v9672_v20 = vcombine.low %v8726_v60, %v8748_v10 }
 0x133   : > { %v1160_v45 = vpop.f32.mrf.mxu1  ;;  %v4075_v39 = vsel %vm6915_vm2, %v8922_v17, %v8892_v40  ;;  %v4085_v49 = vsel %vm6915_vm2, %v4080_v31, %v8902_v47  ;;  %v8972_v16 = vsel %vm7226_vm5, %v4665_v2, %v4666_v28  ;;  %v4130_v61 = vshll.u32 %v8945_v35, 16  ;;  %v1625_v60 = vpop.f32.mrf.mxu0  ;;  %v5737_v17 = vld [vmem:[%s6884_s25 + $0xb4] sm:$0xf]  ;;  %v9673_v47 = vld [vmem:[#allocation18_spill] sm:$0xff]  ;;  %v9001_v2 = vld [vmem:[%s6884_s25 + $0xb8] sm:$0xf] }
 0x134   : > { %6614 = vmatmul.mubr.bf16.gmra.mxu0 %v9671_v58  ;;  %v8976_v53 = vadd.f32 %v6324_v8, %v1169_v5  ;;  %v1161_v10 = vadd.f32 %v1160_v45, %v8621_v46  ;;  %v4127_v9 = vor.u32 %v4126_v33, %v8947_v48  ;;  %v4677_v40 = vrot.slane %v8911_v14, 5  ;;  %v9674_v8 = vld [vmem:[#allocation13_spill] sm:$0xff] }
 0x135   : > { %6617 = vmatprep.mubr.bf16.mxu0 %v9672_v20  ;;  %v6279_v23 = vpop.f32.mrf.mxu1  ;;  %6566 = vmatmul.mubr.bf16.gmra.mxu1 %v9673_v47  ;;  %v4099_v31 = vsel %vm6915_vm2, %v4094_v57, %v8908_v44  ;;  %v4109_v28 = vsel %vm6915_vm2, %v4104_v25, %v4108_v18  ;;  %v8990_v46 = vsel %vm7226_vm5, %v5797_v29, %v4670_v12  ;;  %v6328_v11 = vpop.f32.mrf.mxu0  ;;  %v4118_v62 = vrot.slane %v4117_v50, 4  ;;  %v9675_v57 = vld [vmem:[#allocation15_spill] sm:$0xff]  ;;  %v9679_v47 = vld [vmem:[#allocation20_spill] sm:$0xff] }
 0x136   : > { %v8994_v0 = vsel %vm7226_vm5, %v4672_v59, %v4673_v37  ;;  %v8996_v14 = vadd.f32 %v1612_v3, %v1161_v10  ;;  %v1182_v54 = vadd.f32 %v6279_v23, %v9674_v8  ;;  %6569 = vmatprep.mubr.bf16.mxu1 %v8830_v42  ;;  %v5798_v44 = vrot.slane %v5782_v21, 9 }
 0x137   : > { %v1173_v18 = vpop.f32.mrf.mxu1  ;;  %v4132_v6 = vrot.slane %v4130_v61, 5  ;;  %v4680_v12 = vrot.slane %v8945_v35, 5  ;;  %v4135_v29 = vshrl.u32 %v5737_v17, 16  ;;  %v4138_v33 = vshll.u32 %v5737_v17, 16  ;;  %v1628_v25 = vpop.f32.mrf.mxu0 }
 0x138   : > { %v9004_v7 = vadd.f32 %v6327_v38, %v1182_v54  ;;  %v1174_v3 = vadd.f32 %v1173_v18, %v9675_v57  ;;  %v4128_v59 = vrot.slane %v4127_v9, 4  ;;  %v4679_v37 = vrot.slane %v4677_v40, 4  ;;  %v9676_v38 = vld [vmem:[#allocation17_spill] sm:$0xff] }
 0x139   : > { %v6280_v42 = vpop.f32.mrf.mxu1  ;;  %v9007_v5 = vcombine.low %v4075_v39, %v4085_v49  ;;  %v5812_v58 = vcombine.low %v8958_v63, %v8972_v16  ;;  %v9011_v50 = vcombine.low %v4099_v31, %v4109_v28  ;;  %v4144_v35 = vshll.u32 %v9001_v2, 16  ;;  %v6331_v61 = vpop.f32.mrf.mxu0  ;;  %v5740_v49 = vld [vmem:[%s6884_s25 + $0xc0] sm:$0xf]  ;;  %v9025_v16 = vld [vmem:[%s6884_s25 + $0xc4] sm:$0xf] }
 0x13a   : > { %v9014_v45 = vadd.f32 %v1625_v60, %v1174_v3  ;;  %v1185_v20 = vadd.f32 %v6280_v42, %v9676_v38  ;;  %v9677_v21 = vcombine.low %v8788_v51, %v8809_v55  ;;  %v5813_v39 = vcombine.low %v8990_v46, %v8994_v0  ;;  %v9684_v46 = vld [vmem:[#allocation6_spill] sm:$0xff] }
 0x13b   : > { %v4148_v63 = vshrl.u32 %v9001_v2, 16  ;;  %v1176_v10 = vpop.f32.mrf.mxu1  ;;  %v9678_v60 = vcombine.low %v8838_v13, %v8853_v30  ;;  %v4123_v51 = vsel %vm6915_vm2, %v4118_v62, %v8947_v48  ;;  %v9035_v55 = vsel %vm7226_vm5, %v5798_v44, %v4677_v40  ;;  %v1641_v28 = vpop.f32.mrf.mxu0  ;;  %v9047_v30 = vld [vmem:[%s6884_s25 + $0xbc] sm:$0x1]  ;;  %v5783_v48 = vld [vmem:[%s6884_s25 + $0xb4] sm:$0xe] }
 0x13c   : > { %6618 = vmatmul.mubr.bf16.gmra.mxu0 %v9677_v21  ;;  %v4137_v9 = vrot.slane %v4135_v29, 4  ;;  %v4140_v17 = vrot.slane %v4138_v33, 5  ;;  %v9037_v23 = vadd.f32 %v6328_v11, %v1185_v20  ;;  %v1177_v31 = vadd.f32 %v1176_v10, %v9679_v47  ;;  %v9069_v20 = vld [vmem:[%s6884_s25 + $0xc8] sm:$0x1] }
 0x13d   : > { %6621 = vmatprep.mubr.bf16.mxu0 %v9678_v60  ;;  %v4133_v8 = vsel %vm6915_vm2, %v4128_v59, %v4132_v6  ;;  %v9044_v13 = vsel %vm7226_vm5, %v4679_v37, %v4680_v12  ;;  %v6283_v54 = vpop.f32.mrf.mxu1  ;;  %6570 = vmatmul.mubr.bf16.gmra.mxu1 %v8832_v52  ;;  %v9051_v40 = vrot.slane %v4144_v35, 5  ;;  %v4159_v11 = vshrl.u32 %v5740_v49, 16  ;;  %v6332_v29 = vpop.f32.mrf.mxu0 }
 0x13e   : > { %v4162_v62 = vshll.u32 %v5740_v49, 16  ;;  %v4168_v44 = vshll.u32 %v9025_v16, 16  ;;  %v9054_v18 = vadd.f32 %v1628_v25, %v1177_v31  ;;  %v1198_v6 = vadd.f32 %v6283_v54, %v8772_v43  ;;  %6573 = vmatprep.mubr.bf16.mxu1 %v8888_v22 }
 0x13f   : > { %v4150_v12 = vrot.slane %v4148_v63, 4  ;;  %v4172_v33 = vshrl.u32 %v9025_v16, 16  ;;  %v1189_v57 = vpop.f32.mrf.mxu1  ;;  %v4141_v3 = vor.u32 %v4140_v17, %v4137_v9  ;;  %v4154_v52 = vshll.u32 %v9047_v30, 16  ;;  %v1644_v43 = vpop.f32.mrf.mxu0  ;;  %v5743_v9 = vld [vmem:[%s6884_s25 + $0xcc] sm:$0xf] }
 0x140   : > { %v5799_v59 = vrot.slane %v5783_v48, 9  ;;  %v4684_v37 = vrot.slane %v9001_v2, 5  ;;  %v9061_v42 = vadd.f32 %v6331_v61, %v1198_v6  ;;  %v1190_v25 = vadd.f32 %v1189_v57, %v8791_v1  ;;  %v5784_v48 = vld [vmem:[%s6884_s25 + $0xc0] sm:$0xe] }
 0x141   : > { %v9064_v35 = vcombine.low %v4123_v51, %v4133_v8  ;;  %v5814_v22 = vcombine.low %v9035_v55, %v9044_v13  ;;  %v6284_v38 = vpop.f32.mrf.mxu1  ;;  %v4161_v21 = vrot.slane %v4159_v11, 4  ;;  %v4164_v63 = vrot.slane %v4162_v62, 5  ;;  %v6335_v10 = vpop.f32.mrf.mxu0  ;;  %v9091_v8 = vld [vmem:[%s6884_s25 + $0xd0] sm:$0xf] }
 0x142   : > { %v9071_v49 = vrot.slane %v4168_v44, 5  ;;  %v4174_v2 = vrot.slane %v4172_v33, 4  ;;  %v9073_v61 = vadd.f32 %v1641_v28, %v1190_v25  ;;  %v1201_v1 = vadd.f32 %v6284_v38, %v8811_v26 }
 0x143   : > { %v9680_v60 = vcombine.low %v8867_v19, %v8877_v36  ;;  %v4151_v51 = vor.u32 %v4150_v12, %v9051_v40  ;;  %v4687_v55 = vrot.slane %v9047_v30, 5  ;;  %v1192_v17 = vpop.f32.mrf.mxu1  ;;  %v9082_v47 = vrot.slane %v4141_v3, 4  ;;  %v1657_v13 = vpop.f32.mrf.mxu0 }
 0x144   : > { %v9084_v31 = vrot.slane %v4154_v52, 5  ;;  %v9088_v26 = vsel %vm7226_vm5, %v5799_v59, %v4684_v37  ;;  %v4686_v28 = vrot.slane %v4684_v37, 4  ;;  %v9093_v19 = vadd.f32 %v6332_v29, %v1201_v1  ;;  %v9681_v29 = vld [vmem:[#allocation2_spill] sm:$0xff] }
 0x145   : > { %6622 = vmatmul.mubr.bf16.gmra.mxu0 %v9680_v60  ;;  %v1193_v36 = vadd.f32 %v1192_v17, %v8820_v34  ;;  %v4178_v30 = vshll.u32 %v9069_v20, 16  ;;  %v6287_v54 = vpop.f32.mrf.mxu1  ;;  %6574 = vmatmul.mubr.bf16.gmra.mxu1 %v8894_v4  ;;  %v4165_v11 = vor.u32 %v4164_v63, %v4161_v21  ;;  %v4175_v62 = vor.u32 %v4174_v2, %v9071_v49  ;;  %v6336_v57 = vpop.f32.mrf.mxu0 }
 0x146   : > { %6625 = vmatprep.mubr.bf16.mxu0 %v5812_v58  ;;  %v4691_v58 = vrot.slane %v9025_v16, 5  ;;  %v4183_v44 = vshrl.u32 %v5743_v9, 16  ;;  %v4186_v6 = vshll.u32 %v5743_v9, 16  ;;  %v1214_v33 = vadd.f32 %v6287_v54, %v9681_v29  ;;  %6577 = vmatprep.mubr.bf16.mxu1 %v9007_v5 }
 0x147   : > { %v9101_v12 = vadd.f32 %v1644_v43, %v1193_v36  ;;  %v4192_v34 = vshll.u32 %v9091_v8, 16  ;;  %v4196_v3 = vshrl.u32 %v9091_v8, 16  ;;  %v1205_v16 = vpop.f32.mrf.mxu1  ;;  %v4152_v52 = vrot.slane %v4151_v51, 4  ;;  %v9682_v43 = vld [vmem:[#allocation5_spill] sm:$0xff]  ;;  %v1660_v21 = vpop.f32.mrf.mxu0  ;;  %v9683_v36 = vld [vmem:[#allocation4_spill] sm:$0xff] }
 0x148   : > { %v4688_v4 = vsel %vm7226_vm5, %v4686_v28, %v4687_v55  ;;  %v5800_v59 = vrot.slane %v5784_v48, 9  ;;  %v4694_v37 = vrot.slane %v9069_v20, 5  ;;  %v9110_v25 = vadd.f32 %v6335_v10, %v1214_v33  ;;  %v5745_v20 = vld [vmem:[%s6884_s25 + $0xd4] sm:$0x1] }
 0x149   : > { %v1206_v38 = vadd.f32 %v1205_v16, %v9682_v43  ;;  %v4180_v63 = vrot.slane %v4178_v30, 5  ;;  %v4693_v5 = vrot.slane %v4691_v58, 4  ;;  %v6288_v2 = vpop.f32.mrf.mxu1  ;;  %v4166_v1 = vrot.slane %v4165_v11, 4 }
 0x14a   : > { %v4176_v60 = vrot.slane %v4175_v62, 4  ;;  %v4185_v9 = vrot.slane %v4183_v44, 4  ;;  %v4188_v17 = vrot.slane %v4186_v6, 5  ;;  %v1217_v55 = vadd.f32 %v6288_v2, %v9683_v36  ;;  %v6339_v28 = vpop.f32.mrf.mxu0  ;;  %v5785_v6 = vld [vmem:[%s6884_s25 + $0xcc] sm:$0xe] }
 0x14b   : > { %v9113_v51 = vadd.f32 %v1657_v13, %v1206_v38  ;;  %v9120_v10 = vrot.slane %v4192_v34, 5  ;;  %v4198_v30 = vrot.slane %v4196_v3, 4  ;;  %v1208_v48 = vpop.f32.mrf.mxu1  ;;  %v4147_v13 = vsel %vm6915_vm2, %v9082_v47, %v9051_v40 }
 0x14c   : > { %v4157_v54 = vsel %vm6915_vm2, %v4152_v52, %v9084_v31  ;;  %v4698_v11 = vrot.slane %v9091_v8, 5  ;;  %v9130_v62 = vadd.f32 %v6336_v57, %v1217_v55  ;;  %v1209_v0 = vadd.f32 %v1208_v48, %v9684_v46  ;;  %v9685_v57 = vld [vmem:[#allocation8_spill] sm:$0xff] }
 0x14d   : > { %6626 = vmatmul.mubr.bf16.gmra.mxu0 %v5813_v39  ;;  %v1673_v39 = vpop.f32.mrf.mxu0  ;;  %v4692_v44 = vsel %vm7226_vm5, %v5800_v59, %v4691_v58  ;;  %v6291_v29 = vpop.f32.mrf.mxu1  ;;  %6578 = vmatmul.mubr.bf16.gmra.mxu1 %v9011_v50  ;;  %v5815_v40 = vcombine.low %v9088_v26, %v4688_v4  ;;  %v4171_v47 = vsel %vm6915_vm2, %v4166_v1, %v9071_v49  ;;  %v4202_v8 = vshll.u32 %v5745_v20, 16  ;;  %v9688_v48 = vld [vmem:[#allocation12_spill] sm:$0xff] }
 0x14e   : > { %6629 = vmatprep.mubr.bf16.mxu0 %v5814_v22  ;;  %v4695_v22 = vsel %vm7226_vm5, %v4693_v5, %v4694_v37  ;;  %v4189_v31 = vor.u32 %v4188_v17, %v4185_v9  ;;  %v9143_v33 = vadd.f32 %v1660_v21, %v1209_v0  ;;  %v1230_v34 = vadd.f32 %v6291_v29, %v9685_v57  ;;  %v9686_v37 = vld [vmem:[#allocation10_spill] sm:$0xff]  ;;  %v9687_v9 = vld [vmem:[#allocation11_spill] sm:$0xff] }
 0x14f   : > { %v6340_v58 = vpop.f32.mrf.mxu0  ;;  %6581 = vmatprep.mubr.bf16.mxu1 %v9064_v35  ;;  %v4181_v3 = vsel %vm6915_vm2, %v4176_v60, %v4180_v63  ;;  %v4199_v50 = vor.u32 %v4198_v30, %v9120_v10  ;;  %v1221_v16 = vpop.f32.mrf.mxu1  ;;  %v5816_v26 = vcombine.low %v4692_v44, %v4695_v22  ;;  %v5801_v52 = vrot.slane %v5785_v6, 9  ;;  %v9689_v44 = vld [vmem:[#allocation14_spill] sm:$0xff] }
 0x150   : > { %v4700_v4 = vrot.slane %v4698_v11, 4  ;;  %v4701_v59 = vrot.slane %v5745_v20, 5  ;;  %v9150_v49 = vadd.f32 %v6339_v28, %v1230_v34  ;;  %v1222_v43 = vadd.f32 %v1221_v16, %v9686_v37  ;;  %v9692_v37 = vld [vmem:[#allocation21_spill] sm:$0xff] }
 0x151   : > { %v1676_v38 = vpop.f32.mrf.mxu0  ;;  %v6292_v21 = vpop.f32.mrf.mxu1  ;;  %v5759_v5 = vcombine.low %v4147_v13, %v4157_v54  ;;  %v5760_v2 = vcombine.low %v4171_v47, %v4181_v3  ;;  %v4190_v1 = vrot.slane %v4189_v31, 4  ;;  %v4200_v17 = vrot.slane %v4199_v50, 4  ;;  %v9690_v47 = vld [vmem:[#allocation16_spill] sm:$0xff] }
 0x152   : > { %v9153_v35 = vadd.f32 %v1673_v39, %v1222_v43  ;;  %v1233_v63 = vadd.f32 %v6292_v21, %v9687_v9  ;;  %v4204_v36 = vrot.slane %v4202_v8, 5  ;;  %v4699_v28 = vsel %vm7226_vm5, %v5801_v52, %v4698_v11 }
 0x153   : > { %v6343_v60 = vpop.f32.mrf.mxu0  ;;  %v1224_v55 = vpop.f32.mrf.mxu1  ;;  %v4702_v20 = vsel %vm7226_vm5, %v4700_v4, %v4701_v59  ;;  %v4195_v0 = vsel %vm6915_vm2, %v4190_v1, %v9120_v10  ;;  %v9691_v10 = vld [vmem:[#allocation19_spill] sm:$0xff] }
 0x154   : > { %v9160_v30 = vadd.f32 %v6340_v58, %v1233_v63  ;;  %v1225_v13 = vadd.f32 %v1224_v55, %v9688_v48  ;;  %v4205_v56 = vsel %vm6915_vm2, %v4200_v17, %v4204_v36  ;;  %v5817_v11 = vcombine.low %v4699_v28, %v4702_v20  ;;  %v9694_v17 = vld [vmem:[#allocation23_spill] sm:$0xff]  ;;  %v9695_v20 = vld [vmem:[#allocation24_spill] sm:$0xff] }
 0x155   : > { %6630 = vmatmul.mubr.bf16.gmra.mxu0 %v5815_v40  ;;  %v1689_v54 = vpop.f32.mrf.mxu0  ;;  %v6295_v46 = vpop.f32.mrf.mxu1  ;;  %6582 = vmatmul.mubr.bf16.gmra.mxu1 %v5759_v5  ;;  %v5761_v34 = vcombine.low %v4195_v0, %v4205_v56  ;;  %v9696_v0 = vld [vmem:[#allocation25_spill] sm:$0xff] }
 0x156   : > { %6633 = vmatprep.mubr.bf16.mxu0 %v5816_v26  ;;  %v9166_v39 = vadd.f32 %v1676_v38, %v1225_v13  ;;  %v1246_v22 = vadd.f32 %v6295_v46, %v9689_v44  ;;  %6585 = vmatprep.mubr.bf16.mxu1 %v5760_v2  ;;  %v9693_v2 = vld [vmem:[#allocation22_spill] sm:$0xff] }
 0x157   : > { %v6344_v6 = vpop.f32.mrf.mxu0  ;;  %v1237_v29 = vpop.f32.mrf.mxu1 }
 0x158   : > { %v9171_v40 = vadd.f32 %v6343_v60, %v1246_v22  ;;  %v1238_v31 = vadd.f32 %v1237_v29, %v9690_v47 }
 0x159   : > { %v1692_v8 = vpop.f32.mrf.mxu0  ;;  %v6296_v57 = vpop.f32.mrf.mxu1 }
 0x15a   : > { %v9174_v58 = vadd.f32 %v1689_v54, %v1238_v31  ;;  %v1249_v3 = vadd.f32 %v6296_v57, %v9691_v10  ;;  %v9698_v57 = vld [vmem:[#allocation27_spill] sm:$0xff] }
 0x15b   : > { %v6347_v50 = vpop.f32.mrf.mxu0  ;;  %v1240_v16 = vpop.f32.mrf.mxu1 }
 0x15c   : > { %v9177_v26 = vadd.f32 %v6344_v6, %v1249_v3  ;;  %v1241_v27 = vadd.f32 %v1240_v16, %v8767_v32 }
 0x15d   : > { %6634 = vmatmul.mubr.bf16.gmra.mxu0 %v5817_v11  ;;  %v1705_v52 = vpop.f32.mrf.mxu0  ;;  %v6299_v4 = vpop.f32.mrf.mxu1  ;;  %6586 = vmatmul.mubr.bf16.gmra.mxu1 %v5761_v34  ;;  %v9697_v11 = vld [vmem:[#allocation26_spill] sm:$0xff] }
 0x15e   : > { %v9180_v59 = vadd.f32 %v1692_v8, %v1241_v27  ;;  %v1262_v43 = vadd.f32 %v6299_v4, %v9692_v37 }
 0x15f   : > { %v6348_v38 = vpop.f32.mrf.mxu0  ;;  %v1253_v21 = vpop.f32.mrf.mxu1 }
 0x160   : > { %v9183_v5 = vadd.f32 %v6347_v50, %v1262_v43  ;;  %v1254_v1 = vadd.f32 %v1253_v21, %v9693_v2 }
 0x161   : > { %v1708_v9 = vpop.f32.mrf.mxu0  ;;  %v6300_v63 = vpop.f32.mrf.mxu1 }
 0x162   : > { %v9186_v60 = vadd.f32 %v1705_v52, %v1254_v1  ;;  %v1265_v36 = vadd.f32 %v6300_v63, %v9694_v17 }
 0x163   : > { %v6415_v32 = vpop.f32.mrf.mxu0  ;;  %v1256_v55 = vpop.f32.mrf.mxu1 }
 0x164   : > { %v9189_v28 = vadd.f32 %v6348_v38, %v1265_v36  ;;  %v1257_v48 = vadd.f32 %v1256_v55, %v9695_v20 }
 0x165   : > { %v2732_v13 = vpop.f32.mrf.mxu0  ;;  %v6367_v54 = vpop.f32.mrf.mxu1 }
 0x166   : > { %v9192_v46 = vadd.f32 %v1708_v9, %v1257_v48  ;;  %v2108_v44 = vadd.f32 %v6367_v54, %v9696_v0 }
 0x167   : > { %v6416_v22 = vpop.f32.mrf.mxu0  ;;  %v1979_v6 = vpop.f32.mrf.mxu1 }
 0x168   : > { %v9195_v56 = vadd.f32 %v6415_v32, %v2108_v44  ;;  %v2106_v29 = vadd.f32 %v1979_v6, %v9697_v11 }
 0x169   : > { %v2735_v47 = vpop.f32.mrf.mxu0  ;;  %v6368_v31 = vpop.f32.mrf.mxu1 }
 0x16a   : > { %v9198_v8 = vadd.f32 %v2732_v13, %v2106_v29  ;;  %v2109_v34 = vadd.f32 %v6368_v31, %v9698_v57 }
 0x16b   : > { %v6419_v10 = vpop.f32.mrf.mxu0  ;;  %v1982_v3 = vpop.f32.mrf.mxu1 }
 0x16c   : > { %v9201_v50 = vadd.f32 %v6416_v22, %v2109_v34  ;;  %v2107_v16 = vadd.f32 %v1982_v3, %v8937_v24 }
 0x16d   : > { %v2748_v27 = vpop.f32.mrf.mxu0  ;;  %v6371_v52 = vpop.f32.mrf.mxu1 }
 0x16e   : > { %v9204_v4 = vadd.f32 %v2735_v47, %v2107_v16  ;;  %v2112_v37 = vadd.f32 %v6371_v52, %v8941_v41 }
 0x16f   : > { %v6420_v43 = vpop.f32.mrf.mxu0  ;;  %v1995_v38 = vpop.f32.mrf.mxu1 }
 0x170   : > { %v9207_v21 = vadd.f32 %v6419_v10, %v2112_v37  ;;  %v2110_v2 = vadd.f32 %v1995_v38, %v8950_v15 }
 0x171   : > { %v2751_v1 = vpop.f32.mrf.mxu0  ;;  %v6372_v9 = vpop.f32.mrf.mxu1 }
 0x172   : > { %v9210_v63 = vadd.f32 %v2748_v27, %v2110_v2  ;;  %v2113_v17 = vadd.f32 %v6372_v9, %v8976_v53 }
 0x173   : > { %v6423_v36 = vpop.f32.mrf.mxu0  ;;  %v1998_v24 = vpop.f32.mrf.mxu1 }
 0x174   : > { %v9213_v32 = vadd.f32 %v6420_v43, %v2113_v17  ;;  %v2111_v55 = vadd.f32 %v1998_v24, %v8996_v14 }
 0x175   : > { %v2764_v20 = vpop.f32.mrf.mxu0  ;;  %v6375_v41 = vpop.f32.mrf.mxu1 }
 0x176   : > { %v9216_v48 = vadd.f32 %v2751_v1, %v2111_v55  ;;  %v2116_v13 = vadd.f32 %v6375_v41, %v9004_v7 }
 0x177   : > { %v6424_v54 = vpop.f32.mrf.mxu0  ;;  %v2011_v15 = vpop.f32.mrf.mxu1 }
 0x178   : > { %v9219_v0 = vadd.f32 %v6423_v36, %v2116_v13  ;;  %v2114_v44 = vadd.f32 %v2011_v15, %v9014_v45 }
 0x179   : > { %v2767_v22 = vpop.f32.mrf.mxu0  ;;  %v6376_v53 = vpop.f32.mrf.mxu1 }
 0x17a   : > { %v9222_v6 = vadd.f32 %v2764_v20, %v2114_v44  ;;  %v2117_v11 = vadd.f32 %v6376_v53, %v9037_v23 }
 0x17b   : > { %v6427_v29 = vpop.f32.mrf.mxu0  ;;  %v2014_v14 = vpop.f32.mrf.mxu1 }
 0x17c   : > { %v9225_v47 = vadd.f32 %v6424_v54, %v2117_v11  ;;  %v2115_v31 = vadd.f32 %v2014_v14, %v9054_v18 }
 0x17d   : > { %v2780_v57 = vpop.f32.mrf.mxu0  ;;  %v6379_v7 = vpop.f32.mrf.mxu1 }
 0x17e   : > { %v9228_v34 = vadd.f32 %v2767_v22, %v2115_v31  ;;  %v2120_v10 = vadd.f32 %v6379_v7, %v9061_v42 }
 0x17f   : > { %v6428_v3 = vpop.f32.mrf.mxu0  ;;  %v2027_v45 = vpop.f32.mrf.mxu1 }
 0x180   : > { %v9231_v16 = vadd.f32 %v6427_v29, %v2120_v10  ;;  %v2118_v27 = vadd.f32 %v2027_v45, %v9073_v61 }
 0x181   : > { %v2783_v52 = vpop.f32.mrf.mxu0  ;;  %v6380_v23 = vpop.f32.mrf.mxu1 }
 0x182   : > { %v9234_v37 = vadd.f32 %v2780_v57, %v2118_v27  ;;  %v2121_v43 = vadd.f32 %v6380_v23, %v9093_v19 }
 0x183   : > { %v6431_v38 = vpop.f32.mrf.mxu0  ;;  %v2030_v18 = vpop.f32.mrf.mxu1 }
 0x184   : > { %v9237_v2 = vadd.f32 %v6428_v3, %v2121_v43  ;;  %v2119_v1 = vadd.f32 %v2030_v18, %v9101_v12 }
 0x185   : > { %v2796_v9 = vpop.f32.mrf.mxu0  ;;  %v6383_v42 = vpop.f32.mrf.mxu1 }
 0x186   : > { %v9240_v17 = vadd.f32 %v2783_v52, %v2119_v1  ;;  %v2124_v36 = vadd.f32 %v6383_v42, %v9110_v25 }
 0x187   : > { %v6432_v24 = vpop.f32.mrf.mxu0  ;;  %v2043_v61 = vpop.f32.mrf.mxu1 }
 0x188   : > { %v9243_v55 = vadd.f32 %v6431_v38, %v2124_v36  ;;  %v2122_v20 = vadd.f32 %v2043_v61, %v9113_v51 }
 0x189   : > { %v2799_v41 = vpop.f32.mrf.mxu0  ;;  %v6384_v19 = vpop.f32.mrf.mxu1 }
 0x18a   : > { %v9246_v13 = vadd.f32 %v2796_v9, %v2122_v20  ;;  %v2125_v54 = vadd.f32 %v6384_v19, %v9130_v62 }
 0x18b   : > { %v6435_v15 = vpop.f32.mrf.mxu0  ;;  %v2046_v12 = vpop.f32.mrf.mxu1 }
 0x18c   : > { %v9249_v44 = vadd.f32 %v6432_v24, %v2125_v54  ;;  %v2123_v22 = vadd.f32 %v2046_v12, %v9143_v33 }
 0x18d   : > { %v2812_v53 = vpop.f32.mrf.mxu0  ;;  %v6387_v25 = vpop.f32.mrf.mxu1 }
 0x18e   : > { %v9252_v11 = vadd.f32 %v2799_v41, %v2123_v22  ;;  %v2128_v29 = vadd.f32 %v6387_v25, %v9150_v49 }
 0x18f   : > { %v6436_v14 = vpop.f32.mrf.mxu0  ;;  %v2059_v51 = vpop.f32.mrf.mxu1 }
 0x190   : > { %v9255_v31 = vadd.f32 %v6435_v15, %v2128_v29  ;;  %v2126_v57 = vadd.f32 %v2059_v51, %v9153_v35 }
 0x191   : > { %v2815_v7 = vpop.f32.mrf.mxu0  ;;  %v6388_v62 = vpop.f32.mrf.mxu1 }
 0x192   : > { %v9258_v10 = vadd.f32 %v2812_v53, %v2126_v57  ;;  %v2129_v3 = vadd.f32 %v6388_v62, %v9160_v30 }
 0x193   : > { %v6439_v45 = vpop.f32.mrf.mxu0  ;;  %v2062_v33 = vpop.f32.mrf.mxu1 }
 0x194   : > { %v9261_v27 = vadd.f32 %v6436_v14, %v2129_v3  ;;  %v2127_v52 = vadd.f32 %v2062_v33, %v9166_v39 }
 0x195   : > { %v2828_v23 = vpop.f32.mrf.mxu0  ;;  %v6391_v49 = vpop.f32.mrf.mxu1 }
 0x196   : > { %v9264_v43 = vadd.f32 %v2815_v7, %v2127_v52  ;;  %v2132_v38 = vadd.f32 %v6391_v49, %v9171_v40 }
 0x197   : > { %v6440_v18 = vpop.f32.mrf.mxu0  ;;  %v2075_v35 = vpop.f32.mrf.mxu1 }
 0x198   : > { %v9267_v1 = vadd.f32 %v6439_v45, %v2132_v38  ;;  %v2130_v9 = vadd.f32 %v2075_v35, %v9174_v58 }
 0x199   : > { %v2831_v42 = vpop.f32.mrf.mxu0  ;;  %v6392_v30 = vpop.f32.mrf.mxu1 }
 0x19a   : > { %v9270_v36 = vadd.f32 %v2828_v23, %v2130_v9  ;;  %v2133_v24 = vadd.f32 %v6392_v30, %v9177_v26 }
 0x19b   : > { %v6443_v61 = vpop.f32.mrf.mxu0  ;;  %v2078_v39 = vpop.f32.mrf.mxu1 }
 0x19c   : > { %v9273_v20 = vadd.f32 %v6440_v18, %v2133_v24  ;;  %v2131_v41 = vadd.f32 %v2078_v39, %v9180_v59 }
 0x19d   : > { %v2844_v19 = vpop.f32.mrf.mxu0  ;;  %v6395_v40 = vpop.f32.mrf.mxu1 }
 0x19e   : > { %9699 = vst [vmem:[#allocation3_spill] sm:$0xff] %v9273_v20  ;;  %v9276_v54 = vadd.f32 %v2831_v42, %v2131_v41  ;;  %v2136_v15 = vadd.f32 %v6395_v40, %v9183_v5 }
 0x19f   : > { %v6444_v12 = vpop.f32.mrf.mxu0  ;;  %v2091_v58 = vpop.f32.mrf.mxu1 }
 0x1a0   : > { %9700 = vst [vmem:[#allocation7_spill] sm:$0xff] %v9276_v54  ;;  %v9279_v22 = vadd.f32 %v6443_v61, %v2136_v15  ;;  %v2134_v53 = vadd.f32 %v2091_v58, %v9186_v60 }
 0x1a1   : > { %v2847_v25 = vpop.f32.mrf.mxu0  ;;  %v6396_v26 = vpop.f32.mrf.mxu1 }
 0x1a2   : > { %v9282_v29 = vadd.f32 %v2844_v19, %v2134_v53  ;;  %v2137_v14 = vadd.f32 %v6396_v26, %v9189_v28 }
 0x1a3   : > { %v6511_v51 = vpop.f32.mrf.mxu0  ;;  %v2094_v59 = vpop.f32.mrf.mxu1 }
 0x1a4   : > { %v9285_v57 = vadd.f32 %v6444_v12, %v2137_v14  ;;  %v2135_v7 = vadd.f32 %v2094_v59, %v9192_v46 }
 0x1a5   : > { %v3615_v62 = vpop.f32.mrf.mxu0  ;;  %v6463_v5 = vpop.f32.mrf.mxu1 }
 0x1a6   : > { %9701 = vst [vmem:[#allocation9_spill] sm:$0xff] %v9285_v57  ;;  %v9288_v3 = vadd.f32 %v2847_v25, %v2135_v7  ;;  %v3358_v45 = vadd.f32 %v6463_v5, %v9195_v56 }
 0x1a7   : > { %v9291_v33 = vpop.f32.mrf.mxu0  ;;  %v3229_v60 = vpop.f32.mrf.mxu1 }
 0x1a8   : > { %9702 = vst [vmem:[#allocation18_spill] sm:$0xff] %v9288_v3  ;;  %v9293_v52 = vadd.f32 %v6511_v51, %v3358_v45  ;;  %v3356_v23 = vadd.f32 %v3229_v60, %v9198_v8 }
 0x1a9   : > { %v9296_v28 = vpop.f32.mrf.mxu0  ;;  %v9298_v49 = vpop.f32.mrf.mxu1 }
 0x1aa   : > { %v9300_v38 = vadd.f32 %v3615_v62, %v3356_v23 }
 0x1ab   : > { %v6515_v46 = vpop.f32.mrf.mxu0  ;;  %v9302_v18 = vpop.f32.mrf.mxu1 }
 0x1ad   : > { %v3631_v35 = vpop.f32.mrf.mxu0  ;;  %v6467_v9 = vpop.f32.mrf.mxu1 }
 0x1ae   : > { %v3362_v56 = vadd.f32 %v6467_v9, %v9207_v21 }
 0x1af   : > { %v9305_v42 = vpop.f32.mrf.mxu0  ;;  %v3245_v30 = vpop.f32.mrf.mxu1 }
 0x1b0   : > { %v9307_v24 = vadd.f32 %v6515_v46, %v3362_v56  ;;  %v3360_v8 = vadd.f32 %v3245_v30, %v9210_v63 }
 0x1b1   : > { %v9310_v61 = vpop.f32.mrf.mxu0  ;;  %v9312_v39 = vpop.f32.mrf.mxu1 }
 0x1b2   : > { %v9314_v41 = vadd.f32 %v3631_v35, %v3360_v8 }
 0x1b3   : > { %v6519_v19 = vpop.f32.mrf.mxu0  ;;  %v9316_v40 = vpop.f32.mrf.mxu1 }
 0x1b5   : > { %v3647_v15 = vpop.f32.mrf.mxu0  ;;  %v6471_v12 = vpop.f32.mrf.mxu1 }
 0x1b6   : > { %v3366_v21 = vadd.f32 %v6471_v12, %v9219_v0 }
 0x1b7   : > { %v9319_v58 = vpop.f32.mrf.mxu0  ;;  %v3261_v53 = vpop.f32.mrf.mxu1 }
 0x1b8   : > { %v9321_v25 = vadd.f32 %v6519_v19, %v3366_v21  ;;  %v3364_v63 = vadd.f32 %v3261_v53, %v9222_v6 }
 0x1b9   : > { %v9324_v26 = vpop.f32.mrf.mxu0  ;;  %v9326_v14 = vpop.f32.mrf.mxu1 }
 0x1ba   : > { %v9328_v51 = vadd.f32 %v3647_v15, %v3364_v63 }
 0x1bb   : > { %v6523_v59 = vpop.f32.mrf.mxu0  ;;  %v9330_v7 = vpop.f32.mrf.mxu1 }
 0x1bd   : > { %v3663_v62 = vpop.f32.mrf.mxu0  ;;  %v6475_v5 = vpop.f32.mrf.mxu1 }
 0x1be   : > { %v3370_v0 = vadd.f32 %v6475_v5, %v9231_v16 }
 0x1bf   : > { %v9333_v45 = vpop.f32.mrf.mxu0  ;;  %v3277_v60 = vpop.f32.mrf.mxu1 }
 0x1c0   : > { %v9335_v23 = vadd.f32 %v6523_v59, %v3370_v0  ;;  %v3368_v6 = vadd.f32 %v3277_v60, %v9234_v37 }
 0x1c1   : > { %v9338_v46 = vpop.f32.mrf.mxu0  ;;  %v9340_v35 = vpop.f32.mrf.mxu1 }
 0x1c2   : > { %v9342_v9 = vadd.f32 %v3663_v62, %v3368_v6 }
 0x1c3   : > { %v6527_v56 = vpop.f32.mrf.mxu0  ;;  %v9344_v30 = vpop.f32.mrf.mxu1 }
 0x1c5   : > { %v3679_v8 = vpop.f32.mrf.mxu0  ;;  %v6479_v19 = vpop.f32.mrf.mxu1 }
 0x1c6   : > { %v3374_v16 = vadd.f32 %v6479_v19, %v9243_v55 }
 0x1c7   : > { %v9347_v15 = vpop.f32.mrf.mxu0  ;;  %v3293_v12 = vpop.f32.mrf.mxu1 }
 0x1c8   : > { %v9349_v21 = vadd.f32 %v6527_v56, %v3374_v16  ;;  %v3372_v37 = vadd.f32 %v3293_v12, %v9246_v13 }
 0x1c9   : > { %v9352_v53 = vpop.f32.mrf.mxu0  ;;  %v9354_v63 = vpop.f32.mrf.mxu1 }
 0x1ca   : > { %v9356_v59 = vadd.f32 %v3679_v8, %v3372_v37 }
 0x1cb   : > { %v6531_v62 = vpop.f32.mrf.mxu0  ;;  %v9358_v5 = vpop.f32.mrf.mxu1 }
 0x1cd   : > { %v3695_v0 = vpop.f32.mrf.mxu0  ;;  %v6483_v60 = vpop.f32.mrf.mxu1 }
 0x1ce   : > { %v3378_v55 = vadd.f32 %v6483_v60, %v9255_v31 }
 0x1cf   : > { %v9361_v6 = vpop.f32.mrf.mxu0  ;;  %v3309_v19 = vpop.f32.mrf.mxu1 }
 0x1d0   : > { %9703 = vst [vmem:[#allocation13_spill] sm:$0xff] %v9361_v6  ;;  %v9363_v56 = vadd.f32 %v6531_v62, %v3378_v55  ;;  %v3376_v13 = vadd.f32 %v3309_v19, %v9258_v10 }
 0x1d1   : > { %v9366_v16 = vpop.f32.mrf.mxu0  ;;  %v9368_v12 = vpop.f32.mrf.mxu1 }
 0x1d2   : > { %9704 = vst [vmem:[#allocation15_spill] sm:$0xff] %v9366_v16  ;;  %v9370_v8 = vadd.f32 %v3695_v0, %v3376_v13 }
 0x1d3   : > { %v6535_v37 = vpop.f32.mrf.mxu0  ;;  %v9372_v3 = vpop.f32.mrf.mxu1 }
 0x1d4   : > { %9705 = vst [vmem:[#allocation17_spill] sm:$0xff] %v9370_v8 }
 0x1d5   : > { %v3711_v57 = vpop.f32.mrf.mxu0  ;;  %v6487_v54 = vpop.f32.mrf.mxu1 }
 0x1d6   : > { %v3382_v31 = vadd.f32 %v6487_v54, %v9267_v1 }
 0x1d7   : > { %v9375_v60 = vpop.f32.mrf.mxu0  ;;  %v3325_v20 = vpop.f32.mrf.mxu1 }
 0x1d8   : > { %9706 = vst [vmem:[#allocation20_spill] sm:$0xff] %v9375_v60  ;;  %v9377_v62 = vadd.f32 %v6535_v37, %v3382_v31  ;;  %v3380_v10 = vadd.f32 %v3325_v20, %v9270_v36 }
 0x1d9   : > { %v9380_v55 = vpop.f32.mrf.mxu0  ;;  %v9382_v19 = vpop.f32.mrf.mxu1 }
 0x1da   : > { %9707 = vst [vmem:[#allocation2_spill] sm:$0xff] %v9380_v55  ;;  %v9384_v0 = vadd.f32 %v3711_v57, %v3380_v10 }
 0x1db   : > { %v6539_v13 = vpop.f32.mrf.mxu0  ;;  %v9386_v16 = vpop.f32.mrf.mxu1 }
 0x1dc   : > { %9708 = vst [vmem:[#allocation5_spill] sm:$0xff] %v9384_v0  ;;  %v3359_v0 = vadd.f32 %v9298_v49, %v9201_v50  ;;  %v9412_v50 = vld [vmem:[%s9536_s2] ss:$0 sm:$0xff] }
 0x1dd   : > { %v3727_v8 = vpop.f32.mrf.mxu0  ;;  %v6491_v6 = vpop.f32.mrf.mxu1 }
 0x1de   : > { %v3386_v1 = vadd.f32 %v6491_v6, %v9279_v22 }
 0x1df   : > { %v9389_v54 = vpop.f32.mrf.mxu0  ;;  %v3341_v60 = vpop.f32.mrf.mxu1 }
 0x1e0   : > { %9709 = vst [vmem:[#allocation4_spill] sm:$0xff] %v9389_v54  ;;  %v9391_v37 = vadd.f32 %v6539_v13, %v3386_v1  ;;  %v3384_v36 = vadd.f32 %v3341_v60, %v9282_v29  ;;  %v3357_v13 = vadd.f32 %v9302_v18, %v9204_v4 }
 0x1e1   : > { %v9394_v20 = vpop.f32.mrf.mxu0  ;;  %v9396_v31 = vpop.f32.mrf.mxu1 }
 0x1e2   : > { %9710 = vst [vmem:[#allocation6_spill] sm:$0xff] %v9391_v37  ;;  %9711 = vst [vmem:[#allocation8_spill] sm:$0xff] %v9394_v20  ;;  %v9398_v57 = vadd.f32 %v3727_v8, %v3384_v36  ;;  %v3745_v20 = vadd.f32 %v9291_v33, %v3359_v0 }
 0x1e3   : > { %v9400_v55 = vpop.f32.mrf.mxu1 }
 0x1e4   : > { %9712 = vst [vmem:[#allocation10_spill] sm:$0xff] %v9398_v57  ;;  %v6607_v10 = vpop.f32.mrf.mxu0  ;;  %9713 = vst [vmem:[#allocation11_spill] sm:$0xff] %v9400_v55  ;;  %v3743_v57 = vadd.f32 %v9296_v28, %v3357_v13 }
 0x1e5   : > { %v6559_v6 = vpop.f32.mrf.mxu1 }
 0x1e6   : > { %v4865_v22 = vpop.f32.mrf.mxu0  ;;  %v4497_v1 = vadd.f32 %v6559_v6, %v9293_v52 }
 0x1e7   : > { %v4368_v60 = vpop.f32.mrf.mxu1 }
 0x1e8   : > { %v6608_v29 = vpop.f32.mrf.mxu0  ;;  %v4994_v54 = vadd.f32 %v6607_v10, %v4497_v1  ;;  %v4495_v8 = vadd.f32 %v4368_v60, %v9300_v38  ;;  %v3363_v38 = vadd.f32 %v9312_v39, %v9213_v32  ;;  %v3361_v1 = vadd.f32 %v9316_v40, %v9216_v48 }
 0x1e9   : > { %v6560_v49 = vpop.f32.mrf.mxu1 }
 0x1ea   : > { %v4868_v36 = vpop.f32.mrf.mxu0  ;;  %v4992_v4 = vadd.f32 %v4865_v22, %v4495_v8  ;;  %v4498_v18 = vadd.f32 %v6560_v49, %v3745_v20  ;;  %v5033_v37 = vadd.f32 %v9412_v50, %v4994_v54  ;;  %v3749_v48 = vadd.f32 %v9305_v42, %v3363_v38 }
 0x1eb   : > { %v4371_v6 = vpop.f32.mrf.mxu1  ;;  %v3747_v40 = vadd.f32 %v9310_v61, %v3361_v1  ;;  %v3367_v42 = vadd.f32 %v9326_v14, %v9225_v47 }
 0x1ec   : > { %v6611_v52 = vpop.f32.mrf.mxu0  ;;  %v4995_v33 = vadd.f32 %v6608_v29, %v4498_v18  ;;  %v4496_v0 = vadd.f32 %v4371_v6, %v3743_v57  ;;  %v5031_v55 = vadd.f32 %v9412_v50, %v4992_v4  ;;  %v5065_v29 = vmax.f32 %v5033_v37, 0.0 }
 0x1ed   : > { %v6563_v60 = vpop.f32.mrf.mxu1 }
 0x1ee   : > { %v4881_v10 = vpop.f32.mrf.mxu0  ;;  %v5034_v28 = vadd.f32 %v9412_v50, %v4995_v33  ;;  %v4993_v20 = vadd.f32 %v4868_v36, %v4496_v0  ;;  %v4501_v22 = vadd.f32 %v6563_v60, %v9307_v24  ;;  %v5063_v37 = vmax.f32 %v5031_v55, 0.0 }
 0x1ef   : > { %v4384_v54 = vpop.f32.mrf.mxu1 }
 0x1f0   : > { %v6612_v13 = vpop.f32.mrf.mxu0  ;;  %v5066_v57 = vmax.f32 %v5034_v28, 0.0  ;;  %v5032_v8 = vadd.f32 %v9412_v50, %v4993_v20  ;;  %v4499_v32 = vadd.f32 %v4384_v54, %v9314_v41  ;;  %v4998_v24 = vadd.f32 %v6611_v52, %v4501_v22 }
 0x1f1   : > { %v6564_v36 = vpop.f32.mrf.mxu1  ;;  %v3365_v22 = vadd.f32 %v9330_v7, %v9228_v34  ;;  %v3753_v54 = vadd.f32 %v9319_v58, %v3367_v42  ;;  %v3371_v58 = vadd.f32 %v9340_v35, %v9237_v2  ;;  %v3369_v42 = vadd.f32 %v9344_v30, %v9240_v17 }
 0x1f2   : > { %v4884_v39 = vpop.f32.mrf.mxu0  ;;  %v5902_v49 = vpack.c.bf16 %v5066_v57, %v5065_v29  ;;  %v5064_v4 = vmax.f32 %v5032_v8, 0.0  ;;  %v4996_v18 = vadd.f32 %v4881_v10, %v4499_v32  ;;  %v4502_v41 = vadd.f32 %v6564_v36, %v3749_v48 }
 0x1f3   : > { %v4387_v33 = vpop.f32.mrf.mxu1  ;;  %v5037_v1 = vadd.f32 %v9412_v50, %v4998_v24  ;;  %v3751_v7 = vadd.f32 %v9324_v26, %v3365_v22  ;;  %v3757_v35 = vadd.f32 %v9333_v45, %v3371_v58 }
 0x1f4   : > { %v6615_v6 = vpop.f32.mrf.mxu0  ;;  %5974 = vst [vmem:[%s9431_s8 + $0x8] sm:$0xff] %v5902_v49   ;;  %v5897_v61 = vpack.c.bf16 %v5064_v4, %v5063_v37  ;;  %v4500_v0 = vadd.f32 %v4387_v33, %v3747_v40  ;;  %v4999_v60 = vadd.f32 %v6612_v13, %v4502_v41  ;;  %v5035_v55 = vadd.f32 %v9412_v50, %v4996_v18 }
 0x1f5   : > { %v6567_v52 = vpop.f32.mrf.mxu1  ;;  %v5069_v32 = vmax.f32 %v5037_v1, 0.0 }
 0x1f6   : > { %v4897_v38 = vpop.f32.mrf.mxu0  ;;  %5898 = vst [vmem:[%s9431_s8] sm:$0xff] %v5897_v61   ;;  %v4997_v28 = vadd.f32 %v4884_v39, %v4500_v0  ;;  %v4505_v10 = vadd.f32 %v6567_v52, %v9321_v25  ;;  %v5038_v47 = vadd.f32 %v9412_v50, %v4999_v60  ;;  %v5067_v25 = vmax.f32 %v5035_v55, 0.0 }
 0x1f7   : > { %v4400_v14 = vpop.f32.mrf.mxu1 }
 0x1f8   : > { %v6616_v20 = vpop.f32.mrf.mxu0  ;;  %v5036_v29 = vadd.f32 %v9412_v50, %v4997_v28  ;;  %v5002_v57 = vadd.f32 %v6615_v6, %v4505_v10  ;;  %v4503_v13 = vadd.f32 %v4400_v14, %v9328_v51  ;;  %v5070_v39 = vmax.f32 %v5038_v47, 0.0 }
 0x1f9   : > { %v6568_v48 = vpop.f32.mrf.mxu1 }
 0x1fa   : > { %v4900_v8 = vpop.f32.mrf.mxu0  ;;  %v5068_v40 = vmax.f32 %v5036_v29, 0.0  ;;  %v4506_v24 = vadd.f32 %v6568_v48, %v3753_v54  ;;  %v5912_v36 = vpack.c.bf16 %v5070_v39, %v5069_v32  ;;  %v5000_v37 = vadd.f32 %v4897_v38, %v4503_v13 }
 0x1fb   : > { %v4403_v49 = vpop.f32.mrf.mxu1  ;;  %v5041_v51 = vadd.f32 %v9412_v50, %v5002_v57  ;;  %v3375_v32 = vadd.f32 %v9354_v63, %v9249_v44 }
 0x1fc   : > { %v6619_v34 = vpop.f32.mrf.mxu0  ;;  %v5907_v4 = vpack.c.bf16 %v5068_v40, %v5067_v25  ;;  %v5003_v18 = vadd.f32 %v6616_v20, %v4506_v24  ;;  %5976 = vst [vmem:[%s9431_s8 + $0x18] sm:$0xff] %v5912_v36   ;;  %v4504_v41 = vadd.f32 %v4403_v49, %v3751_v7  ;;  %v5039_v0 = vadd.f32 %v9412_v50, %v5000_v37 }
 0x1fd   : > { %v6571_v33 = vpop.f32.mrf.mxu1  ;;  %v5073_v60 = vmax.f32 %v5041_v51, 0.0  ;;  %v3755_v20 = vadd.f32 %v9338_v46, %v3369_v42  ;;  %v3373_v46 = vadd.f32 %v9358_v5, %v9252_v11  ;;  %v3761_v5 = vadd.f32 %v9347_v15, %v3375_v32 }
 0x1fe   : > { %v4913_v6 = vpop.f32.mrf.mxu0  ;;  %5975 = vst [vmem:[%s9431_s8 + $0x10] sm:$0xff] %v5907_v4   ;;  %v5042_v26 = vadd.f32 %v9412_v50, %v5003_v18  ;;  %v4509_v61 = vadd.f32 %v6571_v33, %v9335_v23  ;;  %v5001_v38 = vadd.f32 %v4900_v8, %v4504_v41  ;;  %v5071_v14 = vmax.f32 %v5039_v0, 0.0 }
 0x1ff   : > { %v4416_v1 = vpop.f32.mrf.mxu1  ;;  %v3759_v49 = vadd.f32 %v9352_v53, %v3373_v46 }
 0x200   : > { %v6620_v2 = vpop.f32.mrf.mxu0  ;;  %v5074_v52 = vmax.f32 %v5042_v26, 0.0  ;;  %v5006_v55 = vadd.f32 %v6619_v34, %v4509_v61  ;;  %v4507_v28 = vadd.f32 %v4416_v1, %v9342_v9  ;;  %v5040_v17 = vadd.f32 %v9412_v50, %v5001_v38 }
 0x201   : > { %v6572_v30 = vpop.f32.mrf.mxu1  ;;  %v3379_v61 = vadd.f32 %v9368_v12, %v9261_v27 }
 0x202   : > { %v4916_v10 = vpop.f32.mrf.mxu0  ;;  %v5922_v23 = vpack.c.bf16 %v5074_v52, %v5073_v60  ;;  %v5004_v22 = vadd.f32 %v4913_v6, %v4507_v28  ;;  %v4510_v47 = vadd.f32 %v6572_v30, %v3757_v35  ;;  %v5072_v54 = vmax.f32 %v5040_v17, 0.0  ;;  %v9714_v28 = vld [vmem:[#allocation13_spill] sm:$0xff] }
 0x203   : > { %v4419_v29 = vpop.f32.mrf.mxu1  ;;  %v5045_v57 = vadd.f32 %v9412_v50, %v5006_v55  ;;  %v3377_v55 = vadd.f32 %v9372_v3, %v9264_v43  ;;  %v9716_v3 = vld [vmem:[#allocation15_spill] sm:$0xff] }
 0x204   : > { %5978 = vst [vmem:[%s9431_s8 + $0x28] sm:$0xff] %v5922_v23   ;;  %v5007_v13 = vadd.f32 %v6620_v2, %v4510_v47  ;;  %v4508_v8 = vadd.f32 %v4419_v29, %v3755_v20  ;;  %v5917_v39 = vpack.c.bf16 %v5072_v54, %v5071_v14  ;;  %v5043_v25 = vadd.f32 %v9412_v50, %v5004_v22  ;;  %v9715_v20 = vld [vmem:[#allocation17_spill] sm:$0xff] }
 0x205   : > { %v6623_v45 = vpop.f32.mrf.mxu0  ;;  %v6575_v48 = vpop.f32.mrf.mxu1  ;;  %v5077_v36 = vmax.f32 %v5045_v57, 0.0  ;;  %v3763_v57 = vadd.f32 %v9716_v3, %v3377_v55  ;;  %v9723_v55 = vld [vmem:[#allocation18_spill] sm:$0xff] }
 0x206   : > { %v5046_v40 = vadd.f32 %v9412_v50, %v5007_v13  ;;  %v5005_v24 = vadd.f32 %v4916_v10, %v4508_v8  ;;  %v4513_v34 = vadd.f32 %v6575_v48, %v9349_v21  ;;  %5977 = vst [vmem:[%s9431_s8 + $0x20] sm:$0xff] %v5917_v39   ;;  %v5075_v18 = vmax.f32 %v5043_v25, 0.0  ;;  %v9717_v13 = vld [vmem:[#allocation3_spill] sm:$0xff] }
 0x207   : > { %v4929_v9 = vpop.f32.mrf.mxu0  ;;  %v4432_v58 = vpop.f32.mrf.mxu1  ;;  %v3765_v10 = vadd.f32 %v9714_v28, %v3379_v61  ;;  %v3383_v8 = vadd.f32 %v9382_v19, %v9717_v13 }
 0x208   : > { %v5078_v37 = vmax.f32 %v5046_v40, 0.0  ;;  %v5044_v44 = vadd.f32 %v9412_v50, %v5005_v24  ;;  %v4511_v63 = vadd.f32 %v4432_v58, %v9356_v59  ;;  %v5010_v4 = vadd.f32 %v6623_v45, %v4513_v34 }
 0x209   : > { %v6624_v7 = vpop.f32.mrf.mxu0  ;;  %v6576_v51 = vpop.f32.mrf.mxu1 }
 0x20a   : > { %v5932_v21 = vpack.c.bf16 %v5078_v37, %v5077_v36  ;;  %v5076_v6 = vmax.f32 %v5044_v44, 0.0  ;;  %v5008_v41 = vadd.f32 %v4929_v9, %v4511_v63  ;;  %v4514_v42 = vadd.f32 %v6576_v51, %v3761_v5  ;;  %v9719_v44 = vld [vmem:[#allocation20_spill] sm:$0xff] }
 0x20b   : > { %v4932_v11 = vpop.f32.mrf.mxu0  ;;  %v4435_v26 = vpop.f32.mrf.mxu1  ;;  %v5049_v15 = vadd.f32 %v9412_v50, %v5010_v4  ;;  %v3769_v63 = vadd.f32 %v9719_v44, %v3383_v8 }
 0x20c   : > { %5980 = vst [vmem:[%s9431_s8 + $0x38] sm:$0xff] %v5932_v21   ;;  %v5927_v59 = vpack.c.bf16 %v5076_v6, %v5075_v18  ;;  %v4512_v2 = vadd.f32 %v4435_v26, %v3759_v49  ;;  %v5011_v53 = vadd.f32 %v6624_v7, %v4514_v42  ;;  %v5047_v38 = vadd.f32 %v9412_v50, %v5008_v41  ;;  %v9718_v7 = vld [vmem:[#allocation7_spill] sm:$0xff]  ;;  %v9720_v21 = vld [vmem:[#allocation5_spill] sm:$0xff]  ;;  %v9721_v42 = vld [vmem:[#allocation2_spill] sm:$0xff] }
 0x20d   : > { %v6627_v33 = vpop.f32.mrf.mxu0  ;;  %v6579_v0 = vpop.f32.mrf.mxu1  ;;  %v5081_v47 = vmax.f32 %v5049_v15, 0.0  ;;  %v3381_v58 = vadd.f32 %v9386_v16, %v9718_v7 }
 0x20e   : > { %5979 = vst [vmem:[%s9431_s8 + $0x30] sm:$0xff] %v5927_v59   ;;  %v5009_v1 = vadd.f32 %v4932_v11, %v4512_v2  ;;  %v4517_v60 = vadd.f32 %v6579_v0, %v9363_v56  ;;  %v5050_v27 = vadd.f32 %v9412_v50, %v5011_v53  ;;  %v5079_v56 = vmax.f32 %v5047_v38, 0.0 }
 0x20f   : > { %v4945_v35 = vpop.f32.mrf.mxu0  ;;  %v4448_v12 = vpop.f32.mrf.mxu1  ;;  %v3767_v26 = vadd.f32 %v9721_v42, %v3381_v58 }
 0x210   : > { %v5048_v17 = vadd.f32 %v9412_v50, %v5009_v1  ;;  %v5014_v30 = vadd.f32 %v6627_v33, %v4517_v60  ;;  %v4515_v23 = vadd.f32 %v4448_v12, %v9715_v20  ;;  %v5082_v45 = vmax.f32 %v5050_v27, 0.0  ;;  %v9722_v60 = vld [vmem:[#allocation9_spill] sm:$0xff]  ;;  %v9724_v27 = vld [vmem:[#allocation11_spill] sm:$0xff] }
 0x211   : > { %v6628_v52 = vpop.f32.mrf.mxu0  ;;  %v6580_v14 = vpop.f32.mrf.mxu1  ;;  %v3385_v12 = vadd.f32 %v9724_v27, %v9723_v55 }
 0x212   : > { %v5080_v54 = vmax.f32 %v5048_v17, 0.0  ;;  %v4518_v29 = vadd.f32 %v6580_v14, %v3765_v10  ;;  %v5942_v9 = vpack.c.bf16 %v5082_v45, %v5081_v47  ;;  %v5012_v32 = vadd.f32 %v4945_v35, %v4515_v23 }
 0x213   : > { %v4948_v22 = vpop.f32.mrf.mxu0  ;;  %v4451_v46 = vpop.f32.mrf.mxu1  ;;  %v5053_v48 = vadd.f32 %v9412_v50, %v5014_v30 }
 0x214   : > { %v5937_v39 = vpack.c.bf16 %v5080_v54, %v5079_v56  ;;  %v5015_v25 = vadd.f32 %v6628_v52, %v4518_v29  ;;  %5982 = vst [vmem:[%s9431_s8 + $0x48] sm:$0xff] %v5942_v9   ;;  %v4516_v24 = vadd.f32 %v4451_v46, %v3763_v57  ;;  %v5051_v11 = vadd.f32 %v9412_v50, %v5012_v32  ;;  %v9726_v54 = vld [vmem:[#allocation10_spill] sm:$0xff]  ;;  %v9728_v57 = vld [vmem:[#allocation8_spill] sm:$0xff] }
 0x215   : > { %v6631_v43 = vpop.f32.mrf.mxu0  ;;  %v6583_v34 = vpop.f32.mrf.mxu1  ;;  %v5085_v4 = vmax.f32 %v5053_v48, 0.0  ;;  %v3387_v52 = vadd.f32 %v9396_v31, %v9722_v60  ;;  %v3771_v13 = vadd.f32 %v9728_v57, %v3385_v12 }
 0x216   : > { %5981 = vst [vmem:[%s9431_s8 + $0x40] sm:$0xff] %v5937_v39   ;;  %v5054_v36 = vadd.f32 %v9412_v50, %v5015_v25  ;;  %v4521_v37 = vadd.f32 %v6583_v34, %v9377_v62  ;;  %v5013_v5 = vadd.f32 %v4948_v22, %v4516_v24  ;;  %v5083_v35 = vmax.f32 %v5051_v11, 0.0  ;;  %v9725_v22 = vld [vmem:[#allocation6_spill] sm:$0xff] }
 0x217   : > { %v4961_v40 = vpop.f32.mrf.mxu0  ;;  %v4464_v49 = vpop.f32.mrf.mxu1 }
 0x218   : > { %v5086_v51 = vmax.f32 %v5054_v36, 0.0  ;;  %v5018_v18 = vadd.f32 %v6631_v43, %v4521_v37  ;;  %v4519_v6 = vadd.f32 %v4464_v49, %v9720_v21  ;;  %v5052_v16 = vadd.f32 %v9412_v50, %v5013_v5  ;;  %v9727_v43 = vld [vmem:[#allocation4_spill] sm:$0xff] }
 0x219   : > { %v6632_v19 = vpop.f32.mrf.mxu0  ;;  %v6584_v33 = vpop.f32.mrf.mxu1  ;;  %v3773_v3 = vadd.f32 %v9727_v43, %v3387_v52 }
 0x21a   : > { %v5952_v62 = vpack.c.bf16 %v5086_v51, %v5085_v4  ;;  %v5016_v61 = vadd.f32 %v4961_v40, %v4519_v6  ;;  %v4522_v59 = vadd.f32 %v6584_v33, %v3769_v63  ;;  %v5084_v15 = vmax.f32 %v5052_v16, 0.0 }
 0x21b   : > { %v4964_v41 = vpop.f32.mrf.mxu0  ;;  %v4467_v53 = vpop.f32.mrf.mxu1  ;;  %v5057_v0 = vadd.f32 %v9412_v50, %v5018_v18 }
 0x21c   : > { %5984 = vst [vmem:[%s9431_s8 + $0x58] sm:$0xff] %v5952_v62   ;;  %v5019_v38 = vadd.f32 %v6632_v19, %v4522_v59  ;;  %v4520_v1 = vadd.f32 %v4467_v53, %v3767_v26  ;;  %v5947_v28 = vpack.c.bf16 %v5084_v15, %v5083_v35  ;;  %v5055_v30 = vadd.f32 %v9412_v50, %v5016_v61 }
 0x21d   : > { %v6635_v2 = vpop.f32.mrf.mxu0  ;;  %v6587_v10 = vpop.f32.mrf.mxu1  ;;  %v5089_v14 = vmax.f32 %v5057_v0, 0.0 }
 0x21e   : > { %v5058_v20 = vadd.f32 %v9412_v50, %v5019_v38  ;;  %v5017_v23 = vadd.f32 %v4964_v41, %v4520_v1  ;;  %v4525_v47 = vadd.f32 %v6587_v10, %v9725_v22  ;;  %5983 = vst [vmem:[%s9431_s8 + $0x50] sm:$0xff] %v5947_v28   ;;  %v5087_v46 = vmax.f32 %v5055_v30, 0.0 }
 0x21f   : > { %v4977_v17 = vpop.f32.mrf.mxu0  ;;  %v4480_v45 = vpop.f32.mrf.mxu1 }
 0x220   : > { %v5090_v56 = vmax.f32 %v5058_v20, 0.0  ;;  %v5056_v31 = vadd.f32 %v9412_v50, %v5017_v23  ;;  %v4523_v29 = vadd.f32 %v4480_v45, %v9726_v54  ;;  %v5022_v8 = vadd.f32 %v6635_v2, %v4525_v47 }
 0x221   : > { %v6588_v9 = vpop.f32.mrf.mxu1  ;;  %v6636_v32 = vpop.f32.mrf.mxu0 }
 0x222   : > { %v5962_v39 = vpack.c.bf16 %v5090_v56, %v5089_v14  ;;  %v5088_v48 = vmax.f32 %v5056_v31, 0.0  ;;  %v5020_v25 = vadd.f32 %v4977_v17, %v4523_v29  ;;  %v4526_v40 = vadd.f32 %v6588_v9, %v3773_v3 }
 0x223   : > { %v4483_v24 = vpop.f32.mrf.mxu1  ;;  %v5061_v58 = vadd.f32 %v9412_v50, %v5022_v8  ;;  %v4980_v37 = vpop.f32.mrf.mxu0 }
 0x224   : > { %5986 = vst [vmem:[%s9431_s8 + $0x68] sm:$0xff] %v5962_v39   ;;  %v5957_v34 = vpack.c.bf16 %v5088_v48, %v5087_v46  ;;  %v4524_v7 = vadd.f32 %v4483_v24, %v3771_v13  ;;  %v5023_v36 = vadd.f32 %v6636_v32, %v4526_v40  ;;  %v5059_v19 = vadd.f32 %v9412_v50, %v5020_v25 }
 0x225   : > { %v5093_v5 = vmax.f32 %v5061_v58, 0.0 }
 0x226   : > { %5985 = vst [vmem:[%s9431_s8 + $0x60] sm:$0xff] %v5957_v34   ;;  %v5021_v44 = vadd.f32 %v4980_v37, %v4524_v7  ;;  %v5062_v63 = vadd.f32 %v9412_v50, %v5023_v36  ;;  %v5091_v4 = vmax.f32 %v5059_v19, 0.0 }
 0x228   : > { %v5060_v11 = vadd.f32 %v9412_v50, %v5021_v44  ;;  %v5094_v49 = vmax.f32 %v5062_v63, 0.0 }
 0x22a   : > { %v5092_v51 = vmax.f32 %v5060_v11, 0.0  ;;  %v5972_v18 = vpack.c.bf16 %v5094_v49, %v5093_v5 }
 0x22c   : > { %v5967_v21 = vpack.c.bf16 %v5092_v51, %v5091_v4  ;;  %5988 = vst [vmem:[%s9431_s8 + $0x78] sm:$0xff] %v5972_v18  }
 0x22e   : > { %5987 = vst [vmem:[%s9431_s8 + $0x70] sm:$0xff] %v5967_v21  }
 0x22f PF: > { %s13_s14 = sadd.s32 1, %s6829_s14   ;;  %s9729_s12 = smov %s6825_s13 }
 0x230   : > { %p10_p5 = scmp.ge.s32.totalorder %s13_s14, 4   ;;  %s9730_s13 = smov %s9732_s15 }
 0x232   :  { %12 = sbr.rel (!%p10_p5) target bundleno = 2 (0x2), region = 70 }

</bundles_post_ra>
